<compile_context>
chip_gen: v7x
topology: tpu7x:2x2x1
jax: 0.10.0
libtpu: 0.0.40
codegen_flags: <defaults>
</compile_context>

<pallas_src>
import jax
import jax.numpy as jnp
from jax.experimental import pallas as pl
from jax.experimental.pallas import tpu as pltpu

BN_EPS = 1e-5
INPUT_DIM = 784
LATENT_DIM = 2
H1 = 512
H2 = 400

# lane-padded sizes (multiples of 128)
IN_PAD = 896           # 784 -> 7*128
H2_PAD = 512           # 400 -> 4*128
LAT_OUT_PAD = 128      # 2*latent = 4 -> 128 (lane-dense mu/logvar store)

TB_MAX = 256           # batch tile cap (MXU M-dim friendly)


def _round_up(n, m):
    return (n + m - 1) // m * m


# --------------------------------------------------------------------------
# Kernel
# --------------------------------------------------------------------------
def vae_fwd_kernel(
    x_ref, eps_ref,
    w1, b1,            # Linear(784p -> 512)           bf16 / f32
    w2, b2,            # Linear(512 -> 400p), BN1 folded   bf16 / f32
    w3, b3,            # Linear(400p -> 128p), BN2 folded  f32  (mu|logvar head)
    w4, b4,            # Linear(2 -> 400p)             f32
    w5, b5,            # Linear(400p -> 512), BN3 folded   bf16 / f32
    w6, b6,            # Linear(512 -> 784p), BN4 folded   bf16 / f32
    recon_ref, mulv_ref,
):
    f32 = jnp.float32
    bf16 = jnp.bfloat16

    x = x_ref[...]                                              # (TB, 896) f32

    # ---------------- encoder ----------------
    h = jnp.dot(x.astype(bf16), w1[...], preferred_element_type=f32) + b1[...]
    h = jnp.maximum(h, 0.0)                                     # ReLU (BN1 folded into w2/b2)

    h = jnp.dot(h.astype(bf16), w2[...], preferred_element_type=f32) + b2[...]
    h = jnp.maximum(h, 0.0)                                     # ReLU (BN2 folded into w3/b3)

    # mu / logvar in one matmul; f32 operands for output accuracy.
    mulv = jnp.dot(h, w3[...], preferred_element_type=f32) + b3[...]   # (TB, 128)
    mulv_ref[...] = mulv                                        # lane-dense store

    mu = mulv[:, 0:LATENT_DIM]                                  # (TB, 2)
    logvar = mulv[:, LATENT_DIM:2 * LATENT_DIM]                 # (TB, 2)

    # ---------------- reparameterize ----------------
    z = mu + eps_ref[...] * jnp.exp(0.5 * logvar)               # (TB, 2)

    # ---------------- decoder ----------------
    # Linear(latent=2 -> 400p) as a VPU outer product (K=2 MXU matmul is waste).
    d = b4[...] + z[:, 0:1] * w4[0:1, :]
    for j in range(1, LATENT_DIM):
        d = d + z[:, j:j + 1] * w4[j:j + 1, :]
    d = jnp.maximum(d, 0.0)                                     # ReLU (BN3 folded into w5/b5)

    d = jnp.dot(d.astype(bf16), w5[...], preferred_element_type=f32) + b5[...]
    d = jnp.maximum(d, 0.0)                                     # ReLU (BN4 folded into w6/b6)

    d = jnp.dot(d.astype(bf16), w6[...], preferred_element_type=f32) + b6[...]
    recon_ref[...] = jax.nn.sigmoid(d)                          # (TB, 896) f32


# --------------------------------------------------------------------------
# Wrapper
# --------------------------------------------------------------------------
def _vae_forward_impl(x, eps, kparams):
    """x: (B,C,H,W) or (B,784); eps: (B, latent). Returns (recon, mu, logvar)."""
    B = x.shape[0]
    x2 = x.reshape(B, -1).astype(jnp.float32)
    assert x2.shape[1] == INPUT_DIM

    # batch tiling: TB multiple of 8, capped at TB_MAX; pad B to a multiple of TB
    B_pad = _round_up(B, 8)
    if B_pad <= TB_MAX:
        TB = B_pad
    else:
        TB = TB_MAX
        B_pad = _round_up(B_pad, TB)
    nb = B_pad // TB

    # zero-pad batch rows and the 784 -> 896 feature dim
    x_p = jnp.zeros((B_pad, IN_PAD), jnp.float32).at[:B, :INPUT_DIM].set(x2)
    eps_p = jnp.zeros((B_pad, LATENT_DIM), jnp.float32).at[:B].set(
        eps.astype(jnp.float32))

    in_specs = [
        pl.BlockSpec((TB, IN_PAD), lambda i: (i, 0)),        # x tile
        pl.BlockSpec((TB, LATENT_DIM), lambda i: (i, 0)),    # eps tile
    ] + [
        # weights/biases: full array, constant block index -> fetched once,
        # VMEM-resident across the batch grid.
        pl.BlockSpec(w.shape, lambda i: (0, 0)) for w in kparams
    ]
    out_specs = (
        pl.BlockSpec((TB, IN_PAD), lambda i: (i, 0)),        # recon tile
        pl.BlockSpec((TB, LAT_OUT_PAD), lambda i: (i, 0)),   # mu|logvar tile
    )
    out_shape = (
        jax.ShapeDtypeStruct((B_pad, IN_PAD), jnp.float32),
        jax.ShapeDtypeStruct((B_pad, LAT_OUT_PAD), jnp.float32),
    )

    recon_p, mulv_p = pl.pallas_call(
        vae_fwd_kernel,
        out_shape=out_shape,
        grid=(nb,),
        in_specs=in_specs,
        out_specs=out_specs,
        compiler_params=pltpu.CompilerParams(
            dimension_semantics=("parallel",),
            vmem_limit_bytes=32 * 1024 * 1024,
        ),
    )(x_p, eps_p, *kparams)

    recon = recon_p[:B, :INPUT_DIM]
    mu = mulv_p[:B, 0:LATENT_DIM]
    logvar = mulv_p[:B, LATENT_DIM:2 * LATENT_DIM]
    return recon, mu, logvar


vae_forward = jax.jit(_vae_forward_impl)


# --------------------------------------------------------------------------
# Parameters (torch-equivalent layout) + kernel-param preparation
# --------------------------------------------------------------------------
def _xavier_normal(key, fan_in, fan_out):
    # nn.init.xavier_normal_: std = sqrt(2 / (fan_in + fan_out)); stored as (in, out)
    std = (2.0 / (fan_in + fan_out)) ** 0.5
    return std * jax.random.normal(key, (fan_in, fan_out), jnp.float32)


def _bn_init(n):
    # gamma, beta, running_mean, running_var (fresh init)
    return (jnp.ones((n,), jnp.float32), jnp.zeros((n,), jnp.float32),
            jnp.zeros((n,), jnp.float32), jnp.ones((n,), jnp.float32))


def make_params(key):
    ks = jax.random.split(key, 6)
    return {
        "w1": _xavier_normal(ks[0], INPUT_DIM, H1),
        "b1": jnp.full((H1,), 0.01, jnp.float32),
        "bn1": _bn_init(H1),
        "w2": _xavier_normal(ks[1], H1, H2),
        "b2": jnp.full((H2,), 0.01, jnp.float32),
        "bn2": _bn_init(H2),
        "w3": _xavier_normal(ks[2], H2, 2 * LATENT_DIM),
        "b3": jnp.full((2 * LATENT_DIM,), 0.01, jnp.float32),
        "w4": _xavier_normal(ks[3], LATENT_DIM, H2),
        "b4": jnp.full((H2,), 0.01, jnp.float32),
        "bn3": _bn_init(H2),
        "w5": _xavier_normal(ks[4], H2, H1),
        "b5": jnp.full((H1,), 0.01, jnp.float32),
        "bn4": _bn_init(H1),
        "w6": _xavier_normal(ks[5], H1, INPUT_DIM),
        "b6": jnp.full((INPUT_DIM,), 0.01, jnp.float32),
    }


def _fold_bn_into_next(bn, w_next, b_next):
    # eval BN: y = (x - mean)/sqrt(var+eps)*gamma + beta = x*s + t
    # then y @ W + b == x @ (s[:,None]*W) + (t @ W + b)
    g, beta, mean, var = bn
    s = g / jnp.sqrt(var + BN_EPS)
    t = beta - mean * s
    return w_next * s[:, None], b_next + t @ w_next


def _pad2(w, rows, cols):
    return jnp.zeros((rows, cols), w.dtype).at[:w.shape[0], :w.shape[1]].set(w)


def _pad_bias(b, n):
    return jnp.zeros((1, n), b.dtype).at[0, :b.shape[0]].set(b)


def prepare_kernel_params(p):
    """Fold eval-mode BN into next Linear, zero-pad to lane-aligned shapes,
    cast large weights to bf16. Biases stay f32 as (1, N) rows."""
    w2f, b2f = _fold_bn_into_next(p["bn1"], p["w2"], p["b2"])
    w3f, b3f = _fold_bn_into_next(p["bn2"], p["w3"], p["b3"])
    w5f, b5f = _fold_bn_into_next(p["bn3"], p["w5"], p["b5"])
    w6f, b6f = _fold_bn_into_next(p["bn4"], p["w6"], p["b6"])

    return (
        _pad2(p["w1"], IN_PAD, H1).astype(jnp.bfloat16), _pad_bias(p["b1"], H1),
        _pad2(w2f, H1, H2_PAD).astype(jnp.bfloat16),     _pad_bias(b2f, H2_PAD),
        _pad2(w3f, H2_PAD, LAT_OUT_PAD),                 _pad_bias(b3f, LAT_OUT_PAD),
        _pad2(p["w4"], LATENT_DIM, H2_PAD),              _pad_bias(p["b4"], H2_PAD),
        _pad2(w5f, H2_PAD, H1).astype(jnp.bfloat16),     _pad_bias(b5f, H1),
        _pad2(w6f, H1, IN_PAD).astype(jnp.bfloat16),     _pad_bias(b6f, IN_PAD),
    )


# --------------------------------------------------------------------------
# Plain-JAX reference (f32, HIGHEST precision, unfolded params)
# --------------------------------------------------------------------------
def _reference(x, eps, p):
    hp = jax.lax.Precision.HIGHEST

    def bn(v, bn_p):
        g, b, m, var = bn_p
        return (v - m) / jnp.sqrt(var + BN_EPS) * g + b

    x2 = x.reshape(x.shape[0], -1)
    h = bn(jnp.maximum(jnp.dot(x2, p["w1"], precision=hp) + p["b1"], 0.0), p["bn1"])
    h = bn(jnp.maximum(jnp.dot(h, p["w2"], precision=hp) + p["b2"], 0.0), p["bn2"])
    hh = jnp.dot(h, p["w3"], precision=hp) + p["b3"]
    mu, lv = hh[:, :LATENT_DIM], hh[:, LATENT_DIM:]
    z = mu + eps * jnp.exp(0.5 * lv)
    d = bn(jnp.maximum(jnp.dot(z, p["w4"], precision=hp) + p["b4"], 0.0), p["bn3"])
    d = bn(jnp.maximum(jnp.dot(d, p["w5"], precision=hp) + p["b5"], 0.0), p["bn4"])
    recon = jax.nn.sigmoid(jnp.dot(d, p["w6"], precision=hp) + p["b6"])
    return recon, mu, lv


if __name__ == "__main__":
    key = jax.random.PRNGKey(0)
    k_param, k_x, k_eps = jax.random.split(key, 3)

    B = 8
    params = make_params(k_param)
    kparams = prepare_kernel_params(params)

    # MNIST-like input in [0, 1]: NCHW (B, 1, 28, 28) -> flattened to (B, 784)
    x = jax.random.uniform(k_x, (B, 1, 28, 28), jnp.float32)
    eps = jax.random.normal(k_eps, (B, LATENT_DIM), jnp.float32)

    recon, mu, logvar = vae_forward(x, eps, kparams)
    jax.block_until_ready((recon, mu, logvar))

    # sanity check against a plain-JAX f32 reference (tol covers bf16 MXU operands)
    r_ref, mu_ref, lv_ref = _reference(x, eps, params)
    assert recon.shape == (B, INPUT_DIM)
    assert mu.shape == (B, LATENT_DIM) and logvar.shape == (B, LATENT_DIM)
    assert jnp.allclose(recon, r_ref, atol=5e-2, rtol=5e-2)
    assert jnp.allclose(mu, mu_ref, atol=5e-2, rtol=5e-2)
    assert jnp.allclose(logvar, lv_ref, atol=5e-2, rtol=5e-2)

    print("KERNEL_OK")
</pallas_src>

<mosaic_0001>
module attributes {stable_mosaic.version = 11 : i64} {
  func.func @vae_fwd_kernel(%arg0: i32, %arg1: memref<8x896xf32, #tpu.memory_space<vmem>>, %arg2: memref<8x2xf32, #tpu.memory_space<vmem>>, %arg3: memref<896x512xbf16, #tpu.memory_space<vmem>>, %arg4: memref<1x512xf32, #tpu.memory_space<vmem>>, %arg5: memref<512x512xbf16, #tpu.memory_space<vmem>>, %arg6: memref<1x512xf32, #tpu.memory_space<vmem>>, %arg7: memref<512x128xf32, #tpu.memory_space<vmem>>, %arg8: memref<1x128xf32, #tpu.memory_space<vmem>>, %arg9: memref<2x512xf32, #tpu.memory_space<vmem>>, %arg10: memref<1x512xf32, #tpu.memory_space<vmem>>, %arg11: memref<512x512xbf16, #tpu.memory_space<vmem>>, %arg12: memref<1x512xf32, #tpu.memory_space<vmem>>, %arg13: memref<512x896xbf16, #tpu.memory_space<vmem>>, %arg14: memref<1x896xf32, #tpu.memory_space<vmem>>, %arg15: memref<8x896xf32, #tpu.memory_space<vmem>>, %arg16: memref<8x128xf32, #tpu.memory_space<vmem>>) attributes {dimension_semantics = [#tpu.dimension_semantics<parallel>], iteration_bounds = array<i64: 1>, scalar_prefetch = 0 : i64, scratch_operands = 0 : i64, tpu.core_type = #tpu.core_type<tc>, window_params = [{transform_indices = @transform_0, window_bounds = array<i64: 8, 896>}, {transform_indices = @transform_1, window_bounds = array<i64: 8, 2>}, {pipeline_mode = #tpu.pipeline_mode<synchronous>, transform_indices = @transform_2, window_bounds = array<i64: 896, 512>}, {pipeline_mode = #tpu.pipeline_mode<synchronous>, transform_indices = @transform_3, window_bounds = array<i64: 1, 512>}, {pipeline_mode = #tpu.pipeline_mode<synchronous>, transform_indices = @transform_4, window_bounds = array<i64: 512, 512>}, {pipeline_mode = #tpu.pipeline_mode<synchronous>, transform_indices = @transform_5, window_bounds = array<i64: 1, 512>}, {pipeline_mode = #tpu.pipeline_mode<synchronous>, transform_indices = @transform_6, window_bounds = array<i64: 512, 128>}, {pipeline_mode = #tpu.pipeline_mode<synchronous>, transform_indices = @transform_7, window_bounds = array<i64: 1, 128>}, {pipeline_mode = #tpu.pipeline_mode<synchronous>, transform_indices = @transform_8, window_bounds = array<i64: 2, 512>}, {pipeline_mode = #tpu.pipeline_mode<synchronous>, transform_indices = @transform_9, window_bounds = array<i64: 1, 512>}, {pipeline_mode = #tpu.pipeline_mode<synchronous>, transform_indices = @transform_10, window_bounds = array<i64: 512, 512>}, {pipeline_mode = #tpu.pipeline_mode<synchronous>, transform_indices = @transform_11, window_bounds = array<i64: 1, 512>}, {pipeline_mode = #tpu.pipeline_mode<synchronous>, transform_indices = @transform_12, window_bounds = array<i64: 512, 896>}, {pipeline_mode = #tpu.pipeline_mode<synchronous>, transform_indices = @transform_13, window_bounds = array<i64: 1, 896>}, {transform_indices = @transform_14, window_bounds = array<i64: 8, 896>}, {transform_indices = @transform_15, window_bounds = array<i64: 8, 128>}]} {
    %c0 = arith.constant 0 : index
    %c0_0 = arith.constant 0 : index
    %0 = vector.load %arg1[%c0, %c0_0] : memref<8x896xf32, #tpu.memory_space<vmem>>, vector<8x896xf32>
    %1 = arith.truncf %0 : vector<8x896xf32> to vector<8x896xbf16>
    %c0_1 = arith.constant 0 : index
    %c0_2 = arith.constant 0 : index
    %2 = vector.load %arg3[%c0_1, %c0_2] : memref<896x512xbf16, #tpu.memory_space<vmem>>, vector<896x512xbf16>
    %cst = arith.constant dense<0.000000e+00> : vector<8x512xf32>
    %3 = tpu.matmul %1, %2, %cst {dimension_numbers = #tpu.dot_dimension_numbers<[1], [0], [0], [1], [0, 0, 1, 1], [], []>} : vector<8x896xbf16>, vector<896x512xbf16>, vector<8x512xf32> -> vector<8x512xf32>
    %c0_3 = arith.constant 0 : index
    %c0_4 = arith.constant 0 : index
    %4 = vector.load %arg4[%c0_3, %c0_4] : memref<1x512xf32, #tpu.memory_space<vmem>>, vector<1x512xf32>
    %5 = vector.broadcast %4 : vector<1x512xf32> to vector<8x512xf32>
    %6 = arith.addf %3, %5 : vector<8x512xf32>
    %cst_5 = arith.constant 0.000000e+00 : f32
    %7 = vector.broadcast %cst_5 : f32 to vector<8x512xf32>
    %8 = arith.maximumf %6, %7 : vector<8x512xf32>
    %9 = arith.truncf %8 : vector<8x512xf32> to vector<8x512xbf16>
    %c0_6 = arith.constant 0 : index
    %c0_7 = arith.constant 0 : index
    %10 = vector.load %arg5[%c0_6, %c0_7] : memref<512x512xbf16, #tpu.memory_space<vmem>>, vector<512x512xbf16>
    %cst_8 = arith.constant dense<0.000000e+00> : vector<8x512xf32>
    %11 = tpu.matmul %9, %10, %cst_8 {dimension_numbers = #tpu.dot_dimension_numbers<[1], [0], [0], [1], [0, 0, 1, 1], [], []>} : vector<8x512xbf16>, vector<512x512xbf16>, vector<8x512xf32> -> vector<8x512xf32>
    %c0_9 = arith.constant 0 : index
    %c0_10 = arith.constant 0 : index
    %12 = vector.load %arg6[%c0_9, %c0_10] : memref<1x512xf32, #tpu.memory_space<vmem>>, vector<1x512xf32>
    %13 = vector.broadcast %12 : vector<1x512xf32> to vector<8x512xf32>
    %14 = arith.addf %11, %13 : vector<8x512xf32>
    %cst_11 = arith.constant 0.000000e+00 : f32
    %15 = vector.broadcast %cst_11 : f32 to vector<8x512xf32>
    %16 = arith.maximumf %14, %15 : vector<8x512xf32>
    %c0_12 = arith.constant 0 : index
    %c0_13 = arith.constant 0 : index
    %17 = vector.load %arg7[%c0_12, %c0_13] : memref<512x128xf32, #tpu.memory_space<vmem>>, vector<512x128xf32>
    %cst_14 = arith.constant dense<0.000000e+00> : vector<8x128xf32>
    %18 = tpu.matmul %16, %17, %cst_14 {dimension_numbers = #tpu.dot_dimension_numbers<[1], [0], [0], [1], [0, 0, 1, 1], [], []>} : vector<8x512xf32>, vector<512x128xf32>, vector<8x128xf32> -> vector<8x128xf32>
    %c0_15 = arith.constant 0 : index
    %c0_16 = arith.constant 0 : index
    %19 = vector.load %arg8[%c0_15, %c0_16] : memref<1x128xf32, #tpu.memory_space<vmem>>, vector<1x128xf32>
    %20 = vector.broadcast %19 : vector<1x128xf32> to vector<8x128xf32>
    %21 = arith.addf %18, %20 : vector<8x128xf32>
    %c0_17 = arith.constant 0 : index
    %c0_18 = arith.constant 0 : index
    %22 = vector.load %arg16[%c0_17, %c0_18] : memref<8x128xf32, #tpu.memory_space<vmem>>, vector<8x128xf32>
    tpu.vector_store %arg16[%c0_17, %c0_18], %21 {strides = array<i32>} : memref<8x128xf32, #tpu.memory_space<vmem>>, vector<8x128xf32>,
    %23 = vector.extract_strided_slice %21 {offsets = [0, 0], sizes = [8, 2], strides = [1, 1]} : vector<8x128xf32> to vector<8x2xf32>
    %24 = vector.extract_strided_slice %21 {offsets = [0, 2], sizes = [8, 2], strides = [1, 1]} : vector<8x128xf32> to vector<8x2xf32>
    %c0_19 = arith.constant 0 : index
    %c0_20 = arith.constant 0 : index
    %25 = vector.load %arg2[%c0_19, %c0_20] : memref<8x2xf32, #tpu.memory_space<vmem>>, vector<8x2xf32>
    %cst_21 = arith.constant 5.000000e-01 : f32
    %26 = vector.broadcast %cst_21 : f32 to vector<8x2xf32>
    %27 = arith.mulf %26, %24 : vector<8x2xf32>
    %28 = math.exp %27 : vector<8x2xf32>
    %29 = arith.mulf %25, %28 : vector<8x2xf32>
    %30 = arith.addf %23, %29 : vector<8x2xf32>
    %c0_22 = arith.constant 0 : index
    %c0_23 = arith.constant 0 : index
    %31 = vector.load %arg10[%c0_22, %c0_23] : memref<1x512xf32, #tpu.memory_space<vmem>>, vector<1x512xf32>
    %32 = vector.extract_strided_slice %30 {offsets = [0, 0], sizes = [8, 1], strides = [1, 1]} : vector<8x2xf32> to vector<8x1xf32>
    %c0_24 = arith.constant 0 : index
    %c0_25 = arith.constant 0 : index
    %33 = vector.load %arg9[%c0_24, %c0_25] : memref<2x512xf32, #tpu.memory_space<vmem>>, vector<1x512xf32>
    %34 = vector.broadcast %32 : vector<8x1xf32> to vector<8x512xf32>
    %35 = vector.broadcast %33 : vector<1x512xf32> to vector<8x512xf32>
    %36 = arith.mulf %34, %35 : vector<8x512xf32>
    %37 = vector.broadcast %31 : vector<1x512xf32> to vector<8x512xf32>
    %38 = arith.addf %37, %36 : vector<8x512xf32>
    %39 = vector.extract_strided_slice %30 {offsets = [0, 1], sizes = [8, 1], strides = [1, 1]} : vector<8x2xf32> to vector<8x1xf32>
    %c1 = arith.constant 1 : index
    %c0_26 = arith.constant 0 : index
    %40 = vector.load %arg9[%c1, %c0_26] : memref<2x512xf32, #tpu.memory_space<vmem>>, vector<1x512xf32>
    %41 = vector.broadcast %39 : vector<8x1xf32> to vector<8x512xf32>
    %42 = vector.broadcast %40 : vector<1x512xf32> to vector<8x512xf32>
    %43 = arith.mulf %41, %42 : vector<8x512xf32>
    %44 = arith.addf %38, %43 : vector<8x512xf32>
    %cst_27 = arith.constant 0.000000e+00 : f32
    %45 = vector.broadcast %cst_27 : f32 to vector<8x512xf32>
    %46 = arith.maximumf %44, %45 : vector<8x512xf32>
    %47 = arith.truncf %46 : vector<8x512xf32> to vector<8x512xbf16>
    %c0_28 = arith.constant 0 : index
    %c0_29 = arith.constant 0 : index
    %48 = vector.load %arg11[%c0_28, %c0_29] : memref<512x512xbf16, #tpu.memory_space<vmem>>, vector<512x512xbf16>
    %cst_30 = arith.constant dense<0.000000e+00> : vector<8x512xf32>
    %49 = tpu.matmul %47, %48, %cst_30 {dimension_numbers = #tpu.dot_dimension_numbers<[1], [0], [0], [1], [0, 0, 1, 1], [], []>} : vector<8x512xbf16>, vector<512x512xbf16>, vector<8x512xf32> -> vector<8x512xf32>
    %c0_31 = arith.constant 0 : index
    %c0_32 = arith.constant 0 : index
    %50 = vector.load %arg12[%c0_31, %c0_32] : memref<1x512xf32, #tpu.memory_space<vmem>>, vector<1x512xf32>
    %51 = vector.broadcast %50 : vector<1x512xf32> to vector<8x512xf32>
    %52 = arith.addf %49, %51 : vector<8x512xf32>
    %cst_33 = arith.constant 0.000000e+00 : f32
    %53 = vector.broadcast %cst_33 : f32 to vector<8x512xf32>
    %54 = arith.maximumf %52, %53 : vector<8x512xf32>
    %55 = arith.truncf %54 : vector<8x512xf32> to vector<8x512xbf16>
    %c0_34 = arith.constant 0 : index
    %c0_35 = arith.constant 0 : index
    %56 = vector.load %arg13[%c0_34, %c0_35] : memref<512x896xbf16, #tpu.memory_space<vmem>>, vector<512x896xbf16>
    %cst_36 = arith.constant dense<0.000000e+00> : vector<8x896xf32>
    %57 = tpu.matmul %55, %56, %cst_36 {dimension_numbers = #tpu.dot_dimension_numbers<[1], [0], [0], [1], [0, 0, 1, 1], [], []>} : vector<8x512xbf16>, vector<512x896xbf16>, vector<8x896xf32> -> vector<8x896xf32>
    %c0_37 = arith.constant 0 : index
    %c0_38 = arith.constant 0 : index
    %58 = vector.load %arg14[%c0_37, %c0_38] : memref<1x896xf32, #tpu.memory_space<vmem>>, vector<1x896xf32>
    %59 = vector.broadcast %58 : vector<1x896xf32> to vector<8x896xf32>
    %60 = arith.addf %57, %59 : vector<8x896xf32>
    %61 = arith.negf %60 : vector<8x896xf32>
    %62 = math.exp %61 : vector<8x896xf32>
    %cst_39 = arith.constant 1.000000e+00 : f32
    %63 = vector.broadcast %cst_39 : f32 to vector<8x896xf32>
    %64 = arith.addf %63, %62 : vector<8x896xf32>
    %65 = arith.divf %63, %64 : vector<8x896xf32>
    %c0_40 = arith.constant 0 : index
    %c0_41 = arith.constant 0 : index
    %66 = vector.load %arg15[%c0_40, %c0_41] : memref<8x896xf32, #tpu.memory_space<vmem>>, vector<8x896xf32>
    tpu.vector_store %arg15[%c0_40, %c0_41], %65 {strides = array<i32>} : memref<8x896xf32, #tpu.memory_space<vmem>>, vector<8x896xf32>,
    return
  }
  func.func @transform_0(%arg0: i32) -> (i32, i32) {
    %c0_i32 = arith.constant 0 : i32
    %c0_i32_0 = arith.constant 0 : i32
    return %arg0, %c0_i32 : i32, i32
  }
  func.func @transform_1(%arg0: i32) -> (i32, i32) {
    %c0_i32 = arith.constant 0 : i32
    %c0_i32_0 = arith.constant 0 : i32
    return %arg0, %c0_i32 : i32, i32
  }
  func.func @transform_2(%arg0: i32) -> (i32, i32) {
    %c0_i32 = arith.constant 0 : i32
    %c0_i32_0 = arith.constant 0 : i32
    %c0_i32_1 = arith.constant 0 : i32
    return %c0_i32, %c0_i32_0 : i32, i32
  }
  func.func @transform_3(%arg0: i32) -> (i32, i32) {
    %c0_i32 = arith.constant 0 : i32
    %c0_i32_0 = arith.constant 0 : i32
    %c0_i32_1 = arith.constant 0 : i32
    return %c0_i32, %c0_i32_0 : i32, i32
  }
  func.func @transform_4(%arg0: i32) -> (i32, i32) {
    %c0_i32 = arith.constant 0 : i32
    %c0_i32_0 = arith.constant 0 : i32
    %c0_i32_1 = arith.constant 0 : i32
    return %c0_i32, %c0_i32_0 : i32, i32
  }
  func.func @transform_5(%arg0: i32) -> (i32, i32) {
    %c0_i32 = arith.constant 0 : i32
    %c0_i32_0 = arith.constant 0 : i32
    %c0_i32_1 = arith.constant 0 : i32
    return %c0_i32, %c0_i32_0 : i32, i32
  }
  func.func @transform_6(%arg0: i32) -> (i32, i32) {
    %c0_i32 = arith.constant 0 : i32
    %c0_i32_0 = arith.constant 0 : i32
    %c0_i32_1 = arith.constant 0 : i32
    return %c0_i32, %c0_i32_0 : i32, i32
  }
  func.func @transform_7(%arg0: i32) -> (i32, i32) {
    %c0_i32 = arith.constant 0 : i32
    %c0_i32_0 = arith.constant 0 : i32
    %c0_i32_1 = arith.constant 0 : i32
    return %c0_i32, %c0_i32_0 : i32, i32
  }
  func.func @transform_8(%arg0: i32) -> (i32, i32) {
    %c0_i32 = arith.constant 0 : i32
    %c0_i32_0 = arith.constant 0 : i32
    %c0_i32_1 = arith.constant 0 : i32
    return %c0_i32, %c0_i32_0 : i32, i32
  }
  func.func @transform_9(%arg0: i32) -> (i32, i32) {
    %c0_i32 = arith.constant 0 : i32
    %c0_i32_0 = arith.constant 0 : i32
    %c0_i32_1 = arith.constant 0 : i32
    return %c0_i32, %c0_i32_0 : i32, i32
  }
  func.func @transform_10(%arg0: i32) -> (i32, i32) {
    %c0_i32 = arith.constant 0 : i32
    %c0_i32_0 = arith.constant 0 : i32
    %c0_i32_1 = arith.constant 0 : i32
    return %c0_i32, %c0_i32_0 : i32, i32
  }
  func.func @transform_11(%arg0: i32) -> (i32, i32) {
    %c0_i32 = arith.constant 0 : i32
    %c0_i32_0 = arith.constant 0 : i32
    %c0_i32_1 = arith.constant 0 : i32
    return %c0_i32, %c0_i32_0 : i32, i32
  }
  func.func @transform_12(%arg0: i32) -> (i32, i32) {
    %c0_i32 = arith.constant 0 : i32
    %c0_i32_0 = arith.constant 0 : i32
    %c0_i32_1 = arith.constant 0 : i32
    return %c0_i32, %c0_i32_0 : i32, i32
  }
  func.func @transform_13(%arg0: i32) -> (i32, i32) {
    %c0_i32 = arith.constant 0 : i32
    %c0_i32_0 = arith.constant 0 : i32
    %c0_i32_1 = arith.constant 0 : i32
    return %c0_i32, %c0_i32_0 : i32, i32
  }
  func.func @transform_14(%arg0: i32) -> (i32, i32) {
    %c0_i32 = arith.constant 0 : i32
    %c0_i32_0 = arith.constant 0 : i32
    return %arg0, %c0_i32 : i32, i32
  }
  func.func @transform_15(%arg0: i32) -> (i32, i32) {
    %c0_i32 = arith.constant 0 : i32
    %c0_i32_0 = arith.constant 0 : i32
    return %arg0, %c0_i32 : i32, i32
  }
}

</mosaic_0001>

<bundles_post_ra>
// kernel: _vae_forward_impl.1
= control target key start
LH: loop header
LB: loop body
LE: loop exit
PB: predicated region body
PF: predicated region fallthrough
CT: control target
= control target key end

     0   :  { %21 = vsyncpa [#allocation3], 0  ;;  %s8617_s0 = inlined_call_operand.vmem [shape: f32[8,896], index: 0, kind: input, shape index: {}]   ;;  %s8618_s1 = inlined_call_operand.vmem [shape: f32[8,2], index: 1, kind: input, shape index: {}]   ;;  %s8619_s2 = inlined_call_operand.hbm [shape: bf16[896,512], index: 2, kind: input, shape index: {}]   ;;  %s8620_s3 = inlined_call_operand.vmem [shape: f32[1,512], index: 3, kind: input, shape index: {}]   ;;  %s8621_s4 = inlined_call_operand.hbm [shape: bf16[512,512], index: 4, kind: input, shape index: {}]   ;;  %s8622_s5 = inlined_call_operand.vmem [shape: f32[1,512], index: 5, kind: input, shape index: {}]   ;;  %s8623_s6 = inlined_call_operand.vmem [shape: f32[512,128], index: 6, kind: input, shape index: {}]   ;;  %s8624_s7 = inlined_call_operand.vmem [shape: f32[1,128], index: 7, kind: input, shape index: {}]   ;;  %s8625_s8 = inlined_call_operand.vmem [shape: f32[2,512], index: 8, kind: input, shape index: {}]   ;;  %s8626_s9 = inlined_call_operand.vmem [shape: f32[1,512], index: 9, kind: input, shape index: {}]   ;;  %s8627_s10 = inlined_call_operand.hbm [shape: bf16[512,512], index: 10, kind: input, shape index: {}]   ;;  %s8628_s11 = inlined_call_operand.vmem [shape: f32[1,512], index: 11, kind: input, shape index: {}]   ;;  %s8629_s12 = inlined_call_operand.hbm [shape: bf16[512,896], index: 12, kind: input, shape index: {}]   ;;  %s8630_s13 = inlined_call_operand.vmem [shape: f32[1,896], index: 13, kind: input, shape index: {}]   ;;  %s8631_s14 = inlined_call_operand.hbm [shape: f32[8,896], index: 14, kind: output, shape index: {0}]   ;;  %s8632_s15 = inlined_call_operand.vmem [shape: f32[8,128], index: 15, kind: output, shape index: {1}]  }
   0x1   :  { %22 = vsyncpa [#allocation6], 0 }
   0x2   :  { %23 = vsyncpa [#allocation9], 0 }
   0x3   :  { %24 = vsyncpa [#allocation4], 0  ;;  %s8067_s18 = smov [#allocation5]   ;;  %s8068_s20 = smov [#allocation2]  }
   0x4   :  { %s48_s19 = sshll.u32 %s8067_s18, 4  ;;  %s34_s21 = sshll.u32 %s8068_s20, 4  ;;  %s49_s19 = int_to_ptr.vmem [resolvable:$true] %s48_s19  ;;  %s8159_s21 = int_to_ptr.vmem [resolvable:$true] %s34_s21 }
   0x5   :  { %s7949_s24 = scalar_lea.hbm %s8621_s4, 16384 }
   0x6   :  { %p7950_p0 = scmp.ne.s32.totalorder %s8621_s4, %s7949_s24  ;;  %p7953_p1 = scmp.lt.u32.totalorder %s7949_s24, %s8621_s4 }
   0x8   :  { %p7955_p2 = pnand %p7953_p1, %p7950_p0 }
   0xa   :  { %7958 = shalt.err (!%p7955_p2)
}
   0xb   :  { %s7959_s29 = scalar_lea.vmem %s49_s19, 16384  ;;  %p7964_p4 = scmp.lt.s32.totalorder %s49_s19, %s49_s19 }
   0xc   :  { %p7960_p3 = scmp.ne.s32.totalorder %s49_s19, %s7959_s29  ;;  %p7965_p5 = scmp.lt.s32.totalorder %s7959_s29, %s7959_s29 }
   0xe   :  { %p7966_p6 = por %p7965_p5, %p7964_p4 }
  0x10   :  { %p7967_p7 = pnand %p7966_p6, %p7960_p3 }
  0x12   :  { %7970 = shalt.err (!%p7967_p7)
}
  0x13   :  { %s8069_s30 = smov 256   ;;  %s8070_s16 = smov 16  }
  0x14   :  { %54 = dma.hbm_to_vmem [thread:$0]  %s8621_s4, 16384, %s49_s19, [#allocation6], %s8069_s30, %s8069_s30, %s8070_s16  }
  0x15   :  { %s7971_s23 = scalar_lea.hbm %s8619_s2, 28672 }
  0x16   :  { %p7972_p8 = scmp.ne.s32.totalorder %s8619_s2, %s7971_s23  ;;  %p7975_p9 = scmp.lt.u32.totalorder %s7971_s23, %s8619_s2 }
  0x18   :  { %p7977_p10 = pnand %p7975_p9, %p7972_p8 }
  0x1a   :  { %7980 = shalt.err (!%p7977_p10)
}
  0x1b   :  { %s7981_s28 = scalar_lea.vmem %s8159_s21, 28672  ;;  %p7986_p12 = scmp.lt.s32.totalorder %s8159_s21, %s8159_s21 }
  0x1c   :  { %p7982_p11 = scmp.ne.s32.totalorder %s8159_s21, %s7981_s28  ;;  %p7987_p13 = scmp.lt.s32.totalorder %s7981_s28, %s7981_s28 }
  0x1e   :  { %p7988_p0 = por %p7987_p13, %p7986_p12 }
  0x20   :  { %p7989_p1 = pnand %p7988_p0, %p7982_p11 }
  0x22   :  { %7992 = shalt.err (!%p7989_p1)
}
  0x23   :  { %40 = dma.hbm_to_vmem [thread:$0]  %s8619_s2, 28672, %s8159_s21, [#allocation3], %s8069_s30, %s8069_s30, %s8070_s16  }
  0x24   :  { %s8071_s29 = smov [#allocation7]   ;;  %s8072_s18 = smov [#allocation8]  }
  0x25   :  { %s70_s17 = sshll.u32 %s8071_s29, 4  ;;  %s84_s20 = sshll.u32 %s8072_s18, 4  ;;  %s71_s17 = int_to_ptr.vmem [resolvable:$true] %s70_s17  ;;  %s8196_s20 = int_to_ptr.vmem [resolvable:$true] %s84_s20 }
  0x26   :  { %s7993_s24 = scalar_lea.hbm %s8627_s10, 16384 }
  0x27   :  { %p7994_p2 = scmp.ne.s32.totalorder %s8627_s10, %s7993_s24  ;;  %p7997_p3 = scmp.lt.u32.totalorder %s7993_s24, %s8627_s10 }
  0x29   :  { %p7999_p4 = pnand %p7997_p3, %p7994_p2 }
  0x2b   :  { %8002 = shalt.err (!%p7999_p4)
}
  0x2c   :  { %s8003_s2 = scalar_lea.vmem %s71_s17, 16384  ;;  %p8008_p6 = scmp.lt.s32.totalorder %s71_s17, %s71_s17 }
  0x2d   :  { %p8004_p5 = scmp.ne.s32.totalorder %s71_s17, %s8003_s2  ;;  %p8009_p7 = scmp.lt.s32.totalorder %s8003_s2, %s8003_s2 }
  0x2f   :  { %p8010_p8 = por %p8009_p7, %p8008_p6 }
  0x31   :  { %p8011_p9 = pnand %p8010_p8, %p8004_p5 }
  0x33   :  { %8014 = shalt.err (!%p8011_p9)
}
  0x34   :  { %76 = dma.hbm_to_vmem [thread:$0]  %s8627_s10, 16384, %s71_s17, [#allocation6], %s8069_s30, %s8069_s30, %s8070_s16  }
  0x35   :  { %s8015_s18 = scalar_lea.hbm %s8629_s12, 28672 }
  0x36   :  { %p8016_p10 = scmp.ne.s32.totalorder %s8629_s12, %s8015_s18  ;;  %p8019_p11 = scmp.lt.u32.totalorder %s8015_s18, %s8629_s12 }
  0x38   :  { %p8021_p12 = pnand %p8019_p11, %p8016_p10 }
  0x3a   :  { %8024 = shalt.err (!%p8021_p12)
}
  0x3b   :  { %s8025_s26 = scalar_lea.vmem %s8196_s20, 28672  ;;  %p8030_p0 = scmp.lt.s32.totalorder %s8196_s20, %s8196_s20 }
  0x3c   :  { %p8026_p13 = scmp.ne.s32.totalorder %s8196_s20, %s8025_s26  ;;  %p8031_p1 = scmp.lt.s32.totalorder %s8025_s26, %s8025_s26 }
  0x3e   :  { %p8032_p2 = por %p8031_p1, %p8030_p0 }
  0x40   :  { %p8033_p3 = pnand %p8032_p2, %p8026_p13 }
  0x42   :  { %8036 = shalt.err (!%p8033_p3)
}
  0x43   :  { %s8073_s10 = smov 448   ;;  %s8074_s30 = smov 28  }
  0x44   :  { %90 = dma.hbm_to_vmem [thread:$0]  %s8629_s12, 28672, %s8196_s20, [#allocation9], %s8073_s10, %s8073_s10, %s8074_s30  }
  0x45   :  { %8059 = dma.done.wait [#allocation3], 28672  }
  0x46   :  { %8060 = vsyncadd [#allocation3], 4294938624 }
  0x47   :  { %8061 = dma.done.wait [#allocation6], 32768  }
  0x48   :  { %8062 = vsyncadd [#allocation6], 4294934528 }
  0x49   :  { %8063 = dma.done.wait [#allocation9], 28672  }
  0x4a   :  { %8064 = vsyncadd [#allocation9], 4294938624  ;;  %v8075_v0 = vmov 0   ;;  %v6879_v1 = vld [vmem:[#allocation2 + $0x4] ss:$16 sps:$4 sm:$0xff]   ;;  %v107_v49 = vld [vmem:[%s8617_s0 + $0x8] sm:$0xff] }
  0x4b   :  { %1641 = vmatprep.mubr.bf16.mxu1 %v8075_v0  ;;  %6876 = vset.pattern.permute.xlu0 %v8075_v0  ;;  %v6881_v2 = vld [vmem:[#allocation2 + $0x604] ss:$16 sps:$4 sm:$0xff]   ;;  %v6883_v3 = vld [vmem:[#allocation2] ss:$16 sps:$4 sm:$0xff]   ;;  %v6931_v35 = vld [vmem:[#allocation2 + $0xc] ss:$16 sps:$4 sm:$0xff]   ;;  %v114_v52 = vpack.c.bf16 %v107_v49, %v107_v49 }
  0x4c   :  { %1486 = vmatprep.subr.bf16.mxu0 %v6879_v1  ;;  %v6884_v4 = vld [vmem:[#allocation2 + $0x600] ss:$16 sps:$4 sm:$0xff]   ;;  %1609 = vmatprep.subr.bf16.mxu1 %v6881_v2  ;;  %v6885_v5 = vld [vmem:[#allocation2 + $0x24] ss:$16 sps:$4 sm:$0xff]   ;;  %v6929_v37 = vld [vmem:[#allocation2 + $0x8] ss:$16 sps:$4 sm:$0xff]  }
  0x4d   :  { %1487 = vmatpush1.bf16.msra.mxu0 %v6883_v3  ;;  %1610 = vmatpush1.bf16.msra.mxu1 %v6884_v4  ;;  %v6887_v6 = vld [vmem:[#allocation2 + $0x624] ss:$16 sps:$4 sm:$0xff]   ;;  %v6889_v7 = vld [vmem:[#allocation2 + $0x20] ss:$16 sps:$4 sm:$0xff]   ;;  %v6937_v40 = vld [vmem:[#allocation2 + $0x2c] ss:$16 sps:$4 sm:$0xff]  }
  0x4e   :  { %1488 = vmatprep.subr.bf16.mxu0 %v6885_v5  ;;  %v6890_v8 = vld [vmem:[#allocation2 + $0x620] ss:$16 sps:$4 sm:$0xff]   ;;  %1611 = vmatprep.subr.bf16.mxu1 %v6887_v6  ;;  %v6891_v9 = vld [vmem:[#allocation2 + $0x44] ss:$16 sps:$4 sm:$0xff]   ;;  %v6935_v41 = vld [vmem:[#allocation2 + $0x28] ss:$16 sps:$4 sm:$0xff]  }
  0x4f   :  { %v6893_v10 = vld [vmem:[#allocation2 + $0x644] ss:$16 sps:$4 sm:$0xff]   ;;  %v6895_v11 = vld [vmem:[#allocation2 + $0x40] ss:$16 sps:$4 sm:$0xff]   ;;  %v6943_v44 = vld [vmem:[#allocation2 + $0x4c] ss:$16 sps:$4 sm:$0xff]   ;;  %1518 = vmatprep.mubr.bf16.mxu0 %v114_v52 }
  0x50   :  { %v6896_v12 = vld [vmem:[#allocation2 + $0x640] ss:$16 sps:$4 sm:$0xff]   ;;  %v6897_v13 = vld [vmem:[#allocation2 + $0x64] ss:$16 sps:$4 sm:$0xff]   ;;  %v6941_v45 = vld [vmem:[#allocation2 + $0x48] ss:$16 sps:$4 sm:$0xff]  }
  0x51   :  { %1489 = vmatpush1.bf16.msra.mxu0 %v6889_v7  ;;  %1612 = vmatpush1.bf16.msra.mxu1 %v6890_v8  ;;  %v6899_v14 = vld [vmem:[#allocation2 + $0x664] ss:$16 sps:$4 sm:$0xff]   ;;  %v6901_v15 = vld [vmem:[#allocation2 + $0x60] ss:$16 sps:$4 sm:$0xff]   ;;  %v6949_v48 = vld [vmem:[#allocation2 + $0x6c] ss:$16 sps:$4 sm:$0xff]  }
  0x52   :  { %1490 = vmatprep.subr.bf16.mxu0 %v6891_v9  ;;  %1613 = vmatprep.subr.bf16.mxu1 %v6893_v10  ;;  %v6902_v16 = vld [vmem:[#allocation2 + $0x660] ss:$16 sps:$4 sm:$0xff]   ;;  %v6903_v17 = vld [vmem:[#allocation2 + $0x84] ss:$16 sps:$4 sm:$0xff]   ;;  %v6947_v50 = vld [vmem:[#allocation2 + $0x68] ss:$16 sps:$4 sm:$0xff]  }
  0x53   :  { %v6905_v18 = vld [vmem:[#allocation2 + $0x684] ss:$16 sps:$4 sm:$0xff]   ;;  %v6907_v19 = vld [vmem:[#allocation2 + $0x80] ss:$16 sps:$4 sm:$0xff]   ;;  %v6955_v54 = vld [vmem:[#allocation2 + $0x8c] ss:$16 sps:$4 sm:$0xff]  }
  0x54   :  { %v6908_v20 = vld [vmem:[#allocation2 + $0x680] ss:$16 sps:$4 sm:$0xff]   ;;  %v6909_v21 = vld [vmem:[#allocation2 + $0xa4] ss:$16 sps:$4 sm:$0xff]   ;;  %v6953_v55 = vld [vmem:[#allocation2 + $0x88] ss:$16 sps:$4 sm:$0xff]  }
  0x55   :  { %1491 = vmatpush1.bf16.msra.mxu0 %v6895_v11  ;;  %1614 = vmatpush1.bf16.msra.mxu1 %v6896_v12  ;;  %v6911_v22 = vld [vmem:[#allocation2 + $0x6a4] ss:$16 sps:$4 sm:$0xff]   ;;  %v6913_v23 = vld [vmem:[#allocation2 + $0xa0] ss:$16 sps:$4 sm:$0xff]   ;;  %v6961_v58 = vld [vmem:[#allocation2 + $0xac] ss:$16 sps:$4 sm:$0xff]  }
  0x56   :  { %1492 = vmatprep.subr.bf16.mxu0 %v6897_v13  ;;  %1615 = vmatprep.subr.bf16.mxu1 %v6899_v14  ;;  %v6914_v24 = vld [vmem:[#allocation2 + $0x6a0] ss:$16 sps:$4 sm:$0xff]   ;;  %v6915_v25 = vld [vmem:[#allocation2 + $0xc4] ss:$16 sps:$4 sm:$0xff]   ;;  %v6959_v59 = vld [vmem:[#allocation2 + $0xa8] ss:$16 sps:$4 sm:$0xff]  }
  0x57   :  { %v6917_v26 = vld [vmem:[#allocation2 + $0x6c4] ss:$16 sps:$4 sm:$0xff]   ;;  %v6919_v27 = vld [vmem:[#allocation2 + $0xc0] ss:$16 sps:$4 sm:$0xff]   ;;  %v6967_v62 = vld [vmem:[#allocation2 + $0xcc] ss:$16 sps:$4 sm:$0xff]  }
  0x58   :  { %v6920_v28 = vld [vmem:[#allocation2 + $0x6c0] ss:$16 sps:$4 sm:$0xff]   ;;  %v6921_v29 = vld [vmem:[#allocation2 + $0xe4] ss:$16 sps:$4 sm:$0xff]   ;;  %v6965_v63 = vld [vmem:[#allocation2 + $0xc8] ss:$16 sps:$4 sm:$0xff]  }
  0x59   :  { %1493 = vmatpush1.bf16.msra.mxu0 %v6901_v15  ;;  %1616 = vmatpush1.bf16.msra.mxu1 %v6902_v16  ;;  %v6923_v30 = vld [vmem:[#allocation2 + $0x6e4] ss:$16 sps:$4 sm:$0xff]   ;;  %v6925_v31 = vld [vmem:[#allocation2 + $0xe0] ss:$16 sps:$4 sm:$0xff]   ;;  %v6973_v3 = vld [vmem:[#allocation2 + $0xec] ss:$16 sps:$4 sm:$0xff]  }
  0x5a   :  { %1494 = vmatprep.subr.bf16.mxu0 %v6903_v17  ;;  %1617 = vmatprep.subr.bf16.mxu1 %v6905_v18  ;;  %v6926_v32 = vld [vmem:[#allocation2 + $0x6e0] ss:$16 sps:$4 sm:$0xff]   ;;  %v6927_v34 = vld [vmem:[#allocation2 + $0x104] ss:$16 sps:$4 sm:$0xff]   ;;  %v6971_v4 = vld [vmem:[#allocation2 + $0xe8] ss:$16 sps:$4 sm:$0xff]  }
  0x5b   :  { %v112_v33 = vld [vmem:[%s8617_s0 + $0x30] sm:$0xff]  ;;  %v106_v7 = vld [vmem:[%s8617_s0] sm:$0xff]  ;;  %v6980_v8 = vld [vmem:[#allocation2 + $0x10c] ss:$16 sps:$4 sm:$0xff]  }
  0x5c   :  { %v8235_v36 = vpack.c.bf16 %v112_v33, %v112_v33  ;;  %v6932_v38 = vld [vmem:[#allocation2 + $0x100] ss:$16 sps:$4 sm:$0xff]   ;;  %v6933_v39 = vld [vmem:[#allocation2 + $0x124] ss:$16 sps:$4 sm:$0xff]   ;;  %v8244_v10 = vpack.c.bf16 %v106_v7, %v106_v7  ;;  %v6978_v11 = vld [vmem:[#allocation2 + $0x108] ss:$16 sps:$4 sm:$0xff]  }
  0x5d   :  { %1495 = vmatpush1.bf16.msra.mxu0 %v6907_v19  ;;  %1618 = vmatpush1.bf16.msra.mxu1 %v6908_v20  ;;  %v6938_v42 = vld [vmem:[#allocation2 + $0x120] ss:$16 sps:$4 sm:$0xff]   ;;  %v6939_v43 = vld [vmem:[#allocation2 + $0x144] ss:$16 sps:$4 sm:$0xff]   ;;  %v6986_v13 = vld [vmem:[#allocation2 + $0x12c] ss:$16 sps:$4 sm:$0xff]  }
  0x5e   :  { %1496 = vmatprep.subr.bf16.mxu0 %v6909_v21  ;;  %1619 = vmatprep.subr.bf16.mxu1 %v6911_v22  ;;  %v6944_v46 = vld [vmem:[#allocation2 + $0x140] ss:$16 sps:$4 sm:$0xff]   ;;  %v6945_v47 = vld [vmem:[#allocation2 + $0x164] ss:$16 sps:$4 sm:$0xff]   ;;  %v6984_v15 = vld [vmem:[#allocation2 + $0x128] ss:$16 sps:$4 sm:$0xff]  }
  0x5f   :  { %v6950_v51 = vld [vmem:[#allocation2 + $0x160] ss:$16 sps:$4 sm:$0xff]   ;;  %v6951_v53 = vld [vmem:[#allocation2 + $0x184] ss:$16 sps:$4 sm:$0xff]   ;;  %v6992_v17 = vld [vmem:[#allocation2 + $0x14c] ss:$16 sps:$4 sm:$0xff]  }
  0x60   :  { %v6956_v56 = vld [vmem:[#allocation2 + $0x180] ss:$16 sps:$4 sm:$0xff]   ;;  %v6957_v57 = vld [vmem:[#allocation2 + $0x1a4] ss:$16 sps:$4 sm:$0xff]   ;;  %v6990_v19 = vld [vmem:[#allocation2 + $0x148] ss:$16 sps:$4 sm:$0xff]  }
  0x61   :  { %1497 = vmatpush1.bf16.msra.mxu0 %v6913_v23  ;;  %1620 = vmatpush1.bf16.msra.mxu1 %v6914_v24  ;;  %v6962_v60 = vld [vmem:[#allocation2 + $0x1a0] ss:$16 sps:$4 sm:$0xff]   ;;  %v6963_v61 = vld [vmem:[#allocation2 + $0x1c4] ss:$16 sps:$4 sm:$0xff]   ;;  %v6998_v21 = vld [vmem:[#allocation2 + $0x16c] ss:$16 sps:$4 sm:$0xff]  }
  0x62   :  { %1498 = vmatprep.subr.bf16.mxu0 %v6915_v25  ;;  %1621 = vmatprep.subr.bf16.mxu1 %v6917_v26  ;;  %v6968_v1 = vld [vmem:[#allocation2 + $0x1c0] ss:$16 sps:$4 sm:$0xff]   ;;  %v6969_v2 = vld [vmem:[#allocation2 + $0x1e4] ss:$16 sps:$4 sm:$0xff]   ;;  %v6996_v23 = vld [vmem:[#allocation2 + $0x168] ss:$16 sps:$4 sm:$0xff]  }
  0x63   :  { %v6974_v5 = vld [vmem:[#allocation2 + $0x1e0] ss:$16 sps:$4 sm:$0xff]   ;;  %v6977_v6 = vld [vmem:[#allocation2 + $0x204] ss:$16 sps:$4 sm:$0xff]   ;;  %v7004_v25 = vld [vmem:[#allocation2 + $0x18c] ss:$16 sps:$4 sm:$0xff]  }
  0x64   :  { %v6975_v9 = vld [vmem:[#allocation2 + $0x200] ss:$16 sps:$4 sm:$0xff]   ;;  %v6983_v12 = vld [vmem:[#allocation2 + $0x224] ss:$16 sps:$4 sm:$0xff]   ;;  %v7016_v33 = vld [vmem:[#allocation2 + $0x1cc] ss:$16 sps:$4 sm:$0xff]  }
  0x65   :  { %1499 = vmatpush1.bf16.msra.mxu0 %v6919_v27  ;;  %1622 = vmatpush1.bf16.msra.mxu1 %v6920_v28  ;;  %v6981_v14 = vld [vmem:[#allocation2 + $0x220] ss:$16 sps:$4 sm:$0xff]   ;;  %v6989_v16 = vld [vmem:[#allocation2 + $0x244] ss:$16 sps:$4 sm:$0xff]   ;;  %v7002_v27 = vld [vmem:[#allocation2 + $0x188] ss:$16 sps:$4 sm:$0xff]  }
  0x66   :  { %1500 = vmatprep.subr.bf16.mxu0 %v6921_v29  ;;  %1623 = vmatprep.subr.bf16.mxu1 %v6923_v30  ;;  %v6987_v18 = vld [vmem:[#allocation2 + $0x240] ss:$16 sps:$4 sm:$0xff]   ;;  %v6995_v20 = vld [vmem:[#allocation2 + $0x264] ss:$16 sps:$4 sm:$0xff]   ;;  %v7010_v29 = vld [vmem:[#allocation2 + $0x1ac] ss:$16 sps:$4 sm:$0xff]  }
  0x67   :  { %v6993_v22 = vld [vmem:[#allocation2 + $0x260] ss:$16 sps:$4 sm:$0xff]   ;;  %v7001_v24 = vld [vmem:[#allocation2 + $0x284] ss:$16 sps:$4 sm:$0xff]   ;;  %v7062_v7 = vld [vmem:[#allocation2 + $0x2c8] ss:$16 sps:$4 sm:$0xff]  }
  0x68   :  { %v6999_v26 = vld [vmem:[#allocation2 + $0x280] ss:$16 sps:$4 sm:$0xff]   ;;  %v7007_v28 = vld [vmem:[#allocation2 + $0x2a4] ss:$16 sps:$4 sm:$0xff]  }
  0x69   :  { %1501 = vmatpush1.bf16.msra.mxu0 %v6925_v31  ;;  %1624 = vmatpush1.bf16.msra.mxu1 %v6926_v32  ;;  %v7005_v30 = vld [vmem:[#allocation2 + $0x2a0] ss:$16 sps:$4 sm:$0xff]   ;;  %v7008_v31 = vld [vmem:[#allocation2 + $0x1a8] ss:$16 sps:$4 sm:$0xff]   ;;  %v7013_v32 = vld [vmem:[#allocation2 + $0x2c4] ss:$16 sps:$4 sm:$0xff]  }
  0x6a   :  { %1502 = vmatprep.subr.bf16.mxu0 %v6927_v34  ;;  %1650 = vmatprep.subr.bf16.mxu1 %v6931_v35  ;;  %v109_v34 = vld [vmem:[%s8617_s0 + $0x18] sm:$0xff]  ;;  %v7011_v35 = vld [vmem:[#allocation2 + $0x2c0] ss:$16 sps:$4 sm:$0xff]  }
  0x6b   :  { %v7029_v49 = vld [vmem:[#allocation2 + $0x320] ss:$16 sps:$4 sm:$0xff]  }
  0x6c   :  { %1642 = vmatmul.mubr.bf16.vlgmr.msra.gmra.mrb[0].mxu1 %v8235_v36 }
  0x6d   :  { %1503 = vmatpush1.bf16.msra.mxu0 %v6932_v38  ;;  %1651 = vmatpush1.bf16.msra.mxu1 %v6929_v37  ;;  %v116_v37 = vpack.c.bf16 %v109_v34, %v109_v34  ;;  %v7014_v38 = vld [vmem:[#allocation2 + $0x1c8] ss:$16 sps:$4 sm:$0xff]   ;;  %v7095_v34 = vld [vmem:[#allocation2 + $0x480] ss:$16 sps:$4 sm:$0xff]  }
  0x6e   :  { %1504 = vmatprep.subr.bf16.mxu0 %v6933_v39  ;;  %1652 = vmatprep.subr.bf16.mxu1 %v6937_v40  ;;  %v7019_v39 = vld [vmem:[#allocation2 + $0x2e4] ss:$16 sps:$4 sm:$0xff]   ;;  %v7022_v40 = vld [vmem:[#allocation2 + $0x1ec] ss:$16 sps:$4 sm:$0xff]  }
  0x6f   :  { %1682 = vmatprep.mubr.bf16.mxu1 %v114_v52  ;;  %v7040_v52 = vld [vmem:[#allocation2 + $0x24c] ss:$16 sps:$4 sm:$0xff]  }
  0x71   :  { %1505 = vmatpush1.bf16.msra.mxu0 %v6938_v42  ;;  %1653 = vmatpush1.bf16.msra.mxu1 %v6935_v41  ;;  %v7017_v41 = vld [vmem:[#allocation2 + $0x2e0] ss:$16 sps:$4 sm:$0xff]   ;;  %v7020_v42 = vld [vmem:[#allocation2 + $0x1e8] ss:$16 sps:$4 sm:$0xff]  }
  0x72   :  { %1506 = vmatprep.subr.bf16.mxu0 %v6939_v43  ;;  %1654 = vmatprep.subr.bf16.mxu1 %v6943_v44  ;;  %v7025_v43 = vld [vmem:[#allocation2 + $0x304] ss:$16 sps:$4 sm:$0xff]   ;;  %v7028_v44 = vld [vmem:[#allocation2 + $0x20c] ss:$16 sps:$4 sm:$0xff]  }
  0x75   :  { %1507 = vmatpush1.bf16.msra.mxu0 %v6944_v46  ;;  %1655 = vmatpush1.bf16.msra.mxu1 %v6941_v45  ;;  %v7023_v45 = vld [vmem:[#allocation2 + $0x300] ss:$16 sps:$4 sm:$0xff]   ;;  %v7026_v46 = vld [vmem:[#allocation2 + $0x208] ss:$16 sps:$4 sm:$0xff]  }
  0x76   :  { %1508 = vmatprep.subr.bf16.mxu0 %v6945_v47  ;;  %1656 = vmatprep.subr.bf16.mxu1 %v6949_v48  ;;  %v7031_v47 = vld [vmem:[#allocation2 + $0x324] ss:$16 sps:$4 sm:$0xff]   ;;  %v7034_v48 = vld [vmem:[#allocation2 + $0x22c] ss:$16 sps:$4 sm:$0xff]  }
  0x79   :  { %1509 = vmatpush1.bf16.msra.mxu0 %v6950_v51  ;;  %1657 = vmatpush1.bf16.msra.mxu1 %v6947_v50  ;;  %v7032_v50 = vld [vmem:[#allocation2 + $0x228] ss:$16 sps:$4 sm:$0xff]   ;;  %v7037_v51 = vld [vmem:[#allocation2 + $0x344] ss:$16 sps:$4 sm:$0xff]  }
  0x7a   :  { %1510 = vmatprep.subr.bf16.mxu0 %v6951_v53  ;;  %1658 = vmatprep.subr.bf16.mxu1 %v6955_v54  ;;  %v7035_v53 = vld [vmem:[#allocation2 + $0x340] ss:$16 sps:$4 sm:$0xff]   ;;  %v7038_v54 = vld [vmem:[#allocation2 + $0x248] ss:$16 sps:$4 sm:$0xff]  }
  0x7d   :  { %1511 = vmatpush1.bf16.msra.mxu0 %v6956_v56  ;;  %1659 = vmatpush1.bf16.msra.mxu1 %v6953_v55  ;;  %v7043_v55 = vld [vmem:[#allocation2 + $0x364] ss:$16 sps:$4 sm:$0xff]   ;;  %v7046_v56 = vld [vmem:[#allocation2 + $0x26c] ss:$16 sps:$4 sm:$0xff]  }
  0x7e   :  { %1512 = vmatprep.subr.bf16.mxu0 %v6957_v57  ;;  %1660 = vmatprep.subr.bf16.mxu1 %v6961_v58  ;;  %v7041_v57 = vld [vmem:[#allocation2 + $0x360] ss:$16 sps:$4 sm:$0xff]   ;;  %v7044_v58 = vld [vmem:[#allocation2 + $0x268] ss:$16 sps:$4 sm:$0xff]  }
  0x81   :  { %1513 = vmatpush1.bf16.msra.mxu0 %v6962_v60  ;;  %1661 = vmatpush1.bf16.msra.mxu1 %v6959_v59  ;;  %v7049_v59 = vld [vmem:[#allocation2 + $0x384] ss:$16 sps:$4 sm:$0xff]   ;;  %v7052_v60 = vld [vmem:[#allocation2 + $0x28c] ss:$16 sps:$4 sm:$0xff]  }
  0x82   :  { %1514 = vmatprep.subr.bf16.mxu0 %v6963_v61  ;;  %1662 = vmatprep.subr.bf16.mxu1 %v6967_v62  ;;  %v7047_v61 = vld [vmem:[#allocation2 + $0x380] ss:$16 sps:$4 sm:$0xff]   ;;  %v7050_v62 = vld [vmem:[#allocation2 + $0x288] ss:$16 sps:$4 sm:$0xff]  }
  0x85   :  { %1515 = vmatpush1.bf16.msra.mxu0 %v6968_v1  ;;  %1663 = vmatpush1.bf16.msra.mxu1 %v6965_v63  ;;  %v7055_v63 = vld [vmem:[#allocation2 + $0x3a4] ss:$16 sps:$4 sm:$0xff]   ;;  %v7058_v1 = vld [vmem:[#allocation2 + $0x2ac] ss:$16 sps:$4 sm:$0xff]  }
  0x86   :  { %1516 = vmatprep.subr.bf16.mxu0 %v6969_v2  ;;  %1664 = vmatprep.subr.bf16.mxu1 %v6973_v3  ;;  %v7053_v2 = vld [vmem:[#allocation2 + $0x3a0] ss:$16 sps:$4 sm:$0xff]   ;;  %v7056_v3 = vld [vmem:[#allocation2 + $0x2a8] ss:$16 sps:$4 sm:$0xff]  }
  0x89   :  { %1517 = vmatpush1.bf16.msra.mxu0 %v6974_v5  ;;  %1665 = vmatpush1.bf16.msra.mxu1 %v6971_v4  ;;  %v7061_v4 = vld [vmem:[#allocation2 + $0x3c4] ss:$16 sps:$4 sm:$0xff]   ;;  %v7064_v5 = vld [vmem:[#allocation2 + $0x2cc] ss:$16 sps:$4 sm:$0xff]  }
  0x8a   :  { %1527 = vmatprep.subr.bf16.mxu0 %v6977_v6  ;;  %1666 = vmatprep.subr.bf16.mxu1 %v6980_v8  ;;  %v7059_v6 = vld [vmem:[#allocation2 + $0x3c0] ss:$16 sps:$4 sm:$0xff]   ;;  %v7067_v8 = vld [vmem:[#allocation2 + $0x3e4] ss:$16 sps:$4 sm:$0xff]  }
  0x8c   :  { %1519 = vmatmul.mubr.bf16.vlgmr.msra.gmra.mrb[0].mxu0 %v8244_v10 }
  0x8d   :  { %1528 = vmatpush1.bf16.msra.mxu0 %v6975_v9  ;;  %1667 = vmatpush1.bf16.msra.mxu1 %v6978_v11  ;;  %v7070_v9 = vld [vmem:[#allocation2 + $0x2ec] ss:$16 sps:$4 sm:$0xff]   ;;  %v7068_v11 = vld [vmem:[#allocation2 + $0x2e8] ss:$16 sps:$4 sm:$0xff]  }
  0x8e   :  { %1529 = vmatprep.subr.bf16.mxu0 %v6983_v12  ;;  %1668 = vmatprep.subr.bf16.mxu1 %v6986_v13  ;;  %v108_v12 = vld [vmem:[%s8617_s0 + $0x10] sm:$0xff] }
  0x8f   :  { %1559 = vmatprep.mubr.bf16.mxu0 %v116_v37  ;;  %v7073_v13 = vld [vmem:[#allocation2 + $0x404] ss:$16 sps:$4 sm:$0xff]  }
  0x91   :  { %1530 = vmatpush1.bf16.msra.mxu0 %v6981_v14  ;;  %1669 = vmatpush1.bf16.msra.mxu1 %v6984_v15  ;;  %v7076_v14 = vld [vmem:[#allocation2 + $0x30c] ss:$16 sps:$4 sm:$0xff]   ;;  %v7071_v15 = vld [vmem:[#allocation2 + $0x400] ss:$16 sps:$4 sm:$0xff]  }
  0x92   :  { %1531 = vmatprep.subr.bf16.mxu0 %v6989_v16  ;;  %1670 = vmatprep.subr.bf16.mxu1 %v6992_v17  ;;  %v8254_v16 = vpack.c.bf16 %v108_v12, %v108_v12  ;;  %v7074_v17 = vld [vmem:[#allocation2 + $0x308] ss:$16 sps:$4 sm:$0xff]   ;;  %v7155_v12 = vld [vmem:[#allocation2 + $0x5c0] ss:$16 sps:$4 sm:$0xff]  }
  0x95   :  { %1532 = vmatpush1.bf16.msra.mxu0 %v6987_v18  ;;  %1671 = vmatpush1.bf16.msra.mxu1 %v6990_v19  ;;  %v7079_v18 = vld [vmem:[#allocation2 + $0x424] ss:$16 sps:$4 sm:$0xff]   ;;  %v7082_v19 = vld [vmem:[#allocation2 + $0x32c] ss:$16 sps:$4 sm:$0xff]  }
  0x96   :  { %1533 = vmatprep.subr.bf16.mxu0 %v6995_v20  ;;  %1672 = vmatprep.subr.bf16.mxu1 %v6998_v21  ;;  %v111_v20 = vld [vmem:[%s8617_s0 + $0x28] sm:$0xff] }
  0x97   :  { %v8259_v21 = vpack.c.bf16 %v111_v20, %v111_v20  ;;  %v7217_v20 = vld [vmem:[#allocation5 + $0x4] ss:$16 sps:$4 sm:$0xff]  }
  0x99   :  { %1534 = vmatpush1.bf16.msra.mxu0 %v6993_v22  ;;  %1673 = vmatpush1.bf16.msra.mxu1 %v6996_v23  ;;  %v7077_v22 = vld [vmem:[#allocation2 + $0x420] ss:$16 sps:$4 sm:$0xff]   ;;  %v7080_v23 = vld [vmem:[#allocation2 + $0x328] ss:$16 sps:$4 sm:$0xff]  }
  0x9a   :  { %1535 = vmatprep.subr.bf16.mxu0 %v7001_v24  ;;  %1674 = vmatprep.subr.bf16.mxu1 %v7004_v25  ;;  %v7085_v24 = vld [vmem:[#allocation2 + $0x444] ss:$16 sps:$4 sm:$0xff]   ;;  %v7088_v25 = vld [vmem:[#allocation2 + $0x34c] ss:$16 sps:$4 sm:$0xff]  }
  0x9d   :  { %1536 = vmatpush1.bf16.msra.mxu0 %v6999_v26  ;;  %1675 = vmatpush1.bf16.msra.mxu1 %v7002_v27  ;;  %v7083_v26 = vld [vmem:[#allocation2 + $0x440] ss:$16 sps:$4 sm:$0xff]   ;;  %v7086_v27 = vld [vmem:[#allocation2 + $0x348] ss:$16 sps:$4 sm:$0xff]  }
  0x9e   :  { %1537 = vmatprep.subr.bf16.mxu0 %v7007_v28  ;;  %1676 = vmatprep.subr.bf16.mxu1 %v7010_v29  ;;  %v7091_v28 = vld [vmem:[#allocation2 + $0x464] ss:$16 sps:$4 sm:$0xff]   ;;  %v7094_v29 = vld [vmem:[#allocation2 + $0x36c] ss:$16 sps:$4 sm:$0xff]  }
  0xa1   :  { %1538 = vmatpush1.bf16.msra.mxu0 %v7005_v30  ;;  %1677 = vmatpush1.bf16.msra.mxu1 %v7008_v31  ;;  %v7089_v30 = vld [vmem:[#allocation2 + $0x460] ss:$16 sps:$4 sm:$0xff]   ;;  %v7092_v31 = vld [vmem:[#allocation2 + $0x368] ss:$16 sps:$4 sm:$0xff]  }
  0xa2   :  { %1539 = vmatprep.subr.bf16.mxu0 %v7013_v32  ;;  %1678 = vmatprep.subr.bf16.mxu1 %v7016_v33  ;;  %v7097_v32 = vld [vmem:[#allocation2 + $0x484] ss:$16 sps:$4 sm:$0xff]   ;;  %v7100_v33 = vld [vmem:[#allocation2 + $0x38c] ss:$16 sps:$4 sm:$0xff]  }
  0xa5   :  { %1540 = vmatpush1.bf16.msra.mxu0 %v7011_v35  ;;  %1679 = vmatpush1.bf16.msra.mxu1 %v7014_v38  ;;  %v7098_v35 = vld [vmem:[#allocation2 + $0x388] ss:$16 sps:$4 sm:$0xff]   ;;  %v7106_v38 = vld [vmem:[#allocation2 + $0x3ac] ss:$16 sps:$4 sm:$0xff]  }
  0xa6   :  { %1541 = vmatprep.subr.bf16.mxu0 %v7019_v39  ;;  %1680 = vmatprep.subr.bf16.mxu1 %v7022_v40  ;;  %v7101_v39 = vld [vmem:[#allocation2 + $0x4a0] ss:$16 sps:$4 sm:$0xff]   ;;  %v7104_v40 = vld [vmem:[#allocation2 + $0x3a8] ss:$16 sps:$4 sm:$0xff]  }
  0xa9   :  { %1542 = vmatpush1.bf16.msra.mxu0 %v7017_v41  ;;  %1681 = vmatpush1.bf16.msra.mxu1 %v7020_v42  ;;  %v7109_v41 = vld [vmem:[#allocation2 + $0x4c4] ss:$16 sps:$4 sm:$0xff]   ;;  %v7112_v42 = vld [vmem:[#allocation2 + $0x3cc] ss:$16 sps:$4 sm:$0xff]  }
  0xaa   :  { %1543 = vmatprep.subr.bf16.mxu0 %v7025_v43  ;;  %1691 = vmatprep.subr.bf16.mxu1 %v7028_v44  ;;  %v7107_v43 = vld [vmem:[#allocation2 + $0x4c0] ss:$16 sps:$4 sm:$0xff]   ;;  %v7110_v44 = vld [vmem:[#allocation2 + $0x3c8] ss:$16 sps:$4 sm:$0xff]  }
  0xac   :  { %1683 = vmatmul.mubr.bf16.vlgmr.msra.gmra.mrb[4].mxu1 %v8244_v10  ;;  %v7065_v10 = vld [vmem:[#allocation2 + $0x3e0] ss:$16 sps:$4 sm:$0xff]  }
  0xad   :  { %1544 = vmatpush1.bf16.msra.mxu0 %v7023_v45  ;;  %1692 = vmatpush1.bf16.msra.mxu1 %v7026_v46  ;;  %v7115_v45 = vld [vmem:[#allocation2 + $0x4e4] ss:$16 sps:$4 sm:$0xff]   ;;  %v7118_v46 = vld [vmem:[#allocation2 + $0x3ec] ss:$16 sps:$4 sm:$0xff]  }
  0xae   :  { %1545 = vmatprep.subr.bf16.mxu0 %v7031_v47  ;;  %1693 = vmatprep.subr.bf16.mxu1 %v7034_v48  ;;  %v7113_v47 = vld [vmem:[#allocation2 + $0x4e0] ss:$16 sps:$4 sm:$0xff]   ;;  %v7116_v48 = vld [vmem:[#allocation2 + $0x3e8] ss:$16 sps:$4 sm:$0xff]  }
  0xaf   :  { %1723 = vmatprep.mubr.bf16.mxu1 %v116_v37  ;;  %v7103_v37 = vld [vmem:[#allocation2 + $0x4a4] ss:$16 sps:$4 sm:$0xff]  }
  0xb1   :  { %1546 = vmatpush1.bf16.msra.mxu0 %v7029_v49  ;;  %1694 = vmatpush1.bf16.msra.mxu1 %v7032_v50  ;;  %v7121_v49 = vld [vmem:[#allocation2 + $0x504] ss:$16 sps:$4 sm:$0xff]   ;;  %v7124_v50 = vld [vmem:[#allocation2 + $0x40c] ss:$16 sps:$4 sm:$0xff]  }
  0xb2   :  { %1547 = vmatprep.subr.bf16.mxu0 %v7037_v51  ;;  %1695 = vmatprep.subr.bf16.mxu1 %v7040_v52  ;;  %v7119_v51 = vld [vmem:[#allocation2 + $0x500] ss:$16 sps:$4 sm:$0xff]   ;;  %v7122_v52 = vld [vmem:[#allocation2 + $0x408] ss:$16 sps:$4 sm:$0xff]  }
  0xb5   :  { %1548 = vmatpush1.bf16.msra.mxu0 %v7035_v53  ;;  %1696 = vmatpush1.bf16.msra.mxu1 %v7038_v54  ;;  %v7127_v53 = vld [vmem:[#allocation2 + $0x524] ss:$16 sps:$4 sm:$0xff]   ;;  %v7130_v54 = vld [vmem:[#allocation2 + $0x42c] ss:$16 sps:$4 sm:$0xff]  }
  0xb6   :  { %1549 = vmatprep.subr.bf16.mxu0 %v7043_v55  ;;  %1697 = vmatprep.subr.bf16.mxu1 %v7046_v56  ;;  %v7125_v55 = vld [vmem:[#allocation2 + $0x520] ss:$16 sps:$4 sm:$0xff]   ;;  %v7128_v56 = vld [vmem:[#allocation2 + $0x428] ss:$16 sps:$4 sm:$0xff]  }
  0xb9   :  { %1550 = vmatpush1.bf16.msra.mxu0 %v7041_v57  ;;  %1698 = vmatpush1.bf16.msra.mxu1 %v7044_v58  ;;  %v7133_v57 = vld [vmem:[#allocation2 + $0x544] ss:$16 sps:$4 sm:$0xff]   ;;  %v7136_v58 = vld [vmem:[#allocation2 + $0x44c] ss:$16 sps:$4 sm:$0xff]  }
  0xba   :  { %1551 = vmatprep.subr.bf16.mxu0 %v7049_v59  ;;  %1699 = vmatprep.subr.bf16.mxu1 %v7052_v60  ;;  %v7131_v59 = vld [vmem:[#allocation2 + $0x540] ss:$16 sps:$4 sm:$0xff]   ;;  %v7134_v60 = vld [vmem:[#allocation2 + $0x448] ss:$16 sps:$4 sm:$0xff]  }
  0xbd   :  { %1552 = vmatpush1.bf16.msra.mxu0 %v7047_v61  ;;  %1700 = vmatpush1.bf16.msra.mxu1 %v7050_v62  ;;  %v7139_v61 = vld [vmem:[#allocation2 + $0x564] ss:$16 sps:$4 sm:$0xff]   ;;  %v7142_v62 = vld [vmem:[#allocation2 + $0x46c] ss:$16 sps:$4 sm:$0xff]  }
  0xbe   :  { %1553 = vmatprep.subr.bf16.mxu0 %v7055_v63  ;;  %1701 = vmatprep.subr.bf16.mxu1 %v7058_v1  ;;  %v7137_v63 = vld [vmem:[#allocation2 + $0x560] ss:$16 sps:$4 sm:$0xff]   ;;  %v7140_v1 = vld [vmem:[#allocation2 + $0x468] ss:$16 sps:$4 sm:$0xff]  }
  0xc1   :  { %1554 = vmatpush1.bf16.msra.mxu0 %v7053_v2  ;;  %1702 = vmatpush1.bf16.msra.mxu1 %v7056_v3  ;;  %v7145_v2 = vld [vmem:[#allocation2 + $0x584] ss:$16 sps:$4 sm:$0xff]   ;;  %v7148_v3 = vld [vmem:[#allocation2 + $0x48c] ss:$16 sps:$4 sm:$0xff]  }
  0xc2   :  { %1555 = vmatprep.subr.bf16.mxu0 %v7061_v4  ;;  %1703 = vmatprep.subr.bf16.mxu1 %v7064_v5  ;;  %v7143_v4 = vld [vmem:[#allocation2 + $0x580] ss:$16 sps:$4 sm:$0xff]   ;;  %v7146_v5 = vld [vmem:[#allocation2 + $0x488] ss:$16 sps:$4 sm:$0xff]  }
  0xc5   :  { %1556 = vmatpush1.bf16.msra.mxu0 %v7059_v6  ;;  %1704 = vmatpush1.bf16.msra.mxu1 %v7062_v7  ;;  %v7151_v6 = vld [vmem:[#allocation2 + $0x5a4] ss:$16 sps:$4 sm:$0xff]   ;;  %v7154_v7 = vld [vmem:[#allocation2 + $0x4ac] ss:$16 sps:$4 sm:$0xff]  }
  0xc6   :  { %1557 = vmatprep.subr.bf16.mxu0 %v7067_v8  ;;  %1705 = vmatprep.subr.bf16.mxu1 %v7070_v9  ;;  %v7149_v8 = vld [vmem:[#allocation2 + $0x5a0] ss:$16 sps:$4 sm:$0xff]   ;;  %v7152_v9 = vld [vmem:[#allocation2 + $0x4a8] ss:$16 sps:$4 sm:$0xff]  }
  0xc9   :  { %1558 = vmatpush1.bf16.msra.mxu0 %v7065_v10  ;;  %1706 = vmatpush1.bf16.msra.mxu1 %v7068_v11  ;;  %v7157_v10 = vld [vmem:[#allocation2 + $0x5c4] ss:$16 sps:$4 sm:$0xff]   ;;  %v7160_v11 = vld [vmem:[#allocation2 + $0x4cc] ss:$16 sps:$4 sm:$0xff]  }
  0xca   :  { %1568 = vmatprep.subr.bf16.mxu0 %v7073_v13  ;;  %1707 = vmatprep.subr.bf16.mxu1 %v7076_v14  ;;  %v7158_v13 = vld [vmem:[#allocation2 + $0x4c8] ss:$16 sps:$4 sm:$0xff]   ;;  %v7163_v14 = vld [vmem:[#allocation2 + $0x5e4] ss:$16 sps:$4 sm:$0xff]  }
  0xcc   :  { %1560 = vmatmul.mubr.bf16.vlgmr.msra.gmra.mrb[0].mxu0 %v8254_v16 }
  0xcd   :  { %1569 = vmatpush1.bf16.msra.mxu0 %v7071_v15  ;;  %1708 = vmatpush1.bf16.msra.mxu1 %v7074_v17  ;;  %v7166_v15 = vld [vmem:[#allocation2 + $0x4ec] ss:$16 sps:$4 sm:$0xff]   ;;  %v7164_v17 = vld [vmem:[#allocation2 + $0x4e8] ss:$16 sps:$4 sm:$0xff]  }
  0xce   :  { %1570 = vmatprep.subr.bf16.mxu0 %v7079_v18  ;;  %1709 = vmatprep.subr.bf16.mxu1 %v7082_v19  ;;  %v110_v18 = vld [vmem:[%s8617_s0 + $0x20] sm:$0xff]  ;;  %v7169_v19 = vld [vmem:[#allocation2 + $0x50c] ss:$16 sps:$4 sm:$0xff]  }
  0xcf   :  { %1600 = vmatprep.mubr.bf16.mxu0 %v8259_v21 }
  0xd1   :  { %1571 = vmatpush1.bf16.msra.mxu0 %v7077_v22  ;;  %1710 = vmatpush1.bf16.msra.mxu1 %v7080_v23  ;;  %v7215_v22 = vld [vmem:[#allocation5] ss:$16 sps:$4 sm:$0xff]   ;;  %v8268_v23 = vpack.c.bf16 %v110_v18, %v110_v18 }
  0xd2   :  { %1572 = vmatprep.subr.bf16.mxu0 %v7085_v24  ;;  %1711 = vmatprep.subr.bf16.mxu1 %v7088_v25  ;;  %v7172_v24 = vld [vmem:[#allocation2 + $0x52c] ss:$16 sps:$4 sm:$0xff]   ;;  %v7223_v25 = vld [vmem:[#allocation5 + $0x24] ss:$16 sps:$4 sm:$0xff]  }
  0xd5   :  { %1573 = vmatpush1.bf16.msra.mxu0 %v7083_v26  ;;  %1712 = vmatpush1.bf16.msra.mxu1 %v7086_v27  ;;  %v7170_v26 = vld [vmem:[#allocation2 + $0x528] ss:$16 sps:$4 sm:$0xff]   ;;  %v7221_v27 = vld [vmem:[#allocation5 + $0x20] ss:$16 sps:$4 sm:$0xff]  }
  0xd6   :  { %1574 = vmatprep.subr.bf16.mxu0 %v7091_v28  ;;  %1713 = vmatprep.subr.bf16.mxu1 %v7094_v29  ;;  %v7175_v28 = vld [vmem:[#allocation2 + $0x54c] ss:$16 sps:$4 sm:$0xff]   ;;  %v7229_v29 = vld [vmem:[#allocation5 + $0x44] ss:$16 sps:$4 sm:$0xff]  }
  0xd9   :  { %1575 = vmatpush1.bf16.msra.mxu0 %v7089_v30  ;;  %1714 = vmatpush1.bf16.msra.mxu1 %v7092_v31  ;;  %v7173_v30 = vld [vmem:[#allocation2 + $0x548] ss:$16 sps:$4 sm:$0xff]   ;;  %v7227_v31 = vld [vmem:[#allocation5 + $0x40] ss:$16 sps:$4 sm:$0xff]  }
  0xda   :  { %1576 = vmatprep.subr.bf16.mxu0 %v7097_v32  ;;  %1715 = vmatprep.subr.bf16.mxu1 %v7100_v33  ;;  %v7178_v32 = vld [vmem:[#allocation2 + $0x56c] ss:$16 sps:$4 sm:$0xff]   ;;  %v7235_v33 = vld [vmem:[#allocation5 + $0x64] ss:$16 sps:$4 sm:$0xff]  }
  0xdd   :  { %1577 = vmatpush1.bf16.msra.mxu0 %v7095_v34  ;;  %1716 = vmatpush1.bf16.msra.mxu1 %v7098_v35  ;;  %v7176_v34 = vld [vmem:[#allocation2 + $0x568] ss:$16 sps:$4 sm:$0xff]   ;;  %v7233_v35 = vld [vmem:[#allocation5 + $0x60] ss:$16 sps:$4 sm:$0xff]  }
  0xde   :  { %1578 = vmatprep.subr.bf16.mxu0 %v7103_v37  ;;  %1717 = vmatprep.subr.bf16.mxu1 %v7106_v38  ;;  %v7181_v37 = vld [vmem:[#allocation2 + $0x58c] ss:$16 sps:$4 sm:$0xff]   ;;  %v7241_v38 = vld [vmem:[#allocation5 + $0x84] ss:$16 sps:$4 sm:$0xff]  }
  0xe1   :  { %1579 = vmatpush1.bf16.msra.mxu0 %v7101_v39  ;;  %1718 = vmatpush1.bf16.msra.mxu1 %v7104_v40  ;;  %v7179_v39 = vld [vmem:[#allocation2 + $0x588] ss:$16 sps:$4 sm:$0xff]   ;;  %v7239_v40 = vld [vmem:[#allocation5 + $0x80] ss:$16 sps:$4 sm:$0xff]  }
  0xe2   :  { %1580 = vmatprep.subr.bf16.mxu0 %v7109_v41  ;;  %1719 = vmatprep.subr.bf16.mxu1 %v7112_v42  ;;  %v7184_v41 = vld [vmem:[#allocation2 + $0x5ac] ss:$16 sps:$4 sm:$0xff]   ;;  %v7247_v42 = vld [vmem:[#allocation5 + $0xa4] ss:$16 sps:$4 sm:$0xff]  }
  0xe5   :  { %1581 = vmatpush1.bf16.msra.mxu0 %v7107_v43  ;;  %1720 = vmatpush1.bf16.msra.mxu1 %v7110_v44  ;;  %v7182_v43 = vld [vmem:[#allocation2 + $0x5a8] ss:$16 sps:$4 sm:$0xff]   ;;  %v7245_v44 = vld [vmem:[#allocation5 + $0xa0] ss:$16 sps:$4 sm:$0xff]  }
  0xe6   :  { %1582 = vmatprep.subr.bf16.mxu0 %v7115_v45  ;;  %1721 = vmatprep.subr.bf16.mxu1 %v7118_v46  ;;  %v7187_v45 = vld [vmem:[#allocation2 + $0x5cc] ss:$16 sps:$4 sm:$0xff]   ;;  %v7253_v46 = vld [vmem:[#allocation5 + $0xc4] ss:$16 sps:$4 sm:$0xff]  }
  0xe9   :  { %1583 = vmatpush1.bf16.msra.mxu0 %v7113_v47  ;;  %1722 = vmatpush1.bf16.msra.mxu1 %v7116_v48  ;;  %v7185_v47 = vld [vmem:[#allocation2 + $0x5c8] ss:$16 sps:$4 sm:$0xff]   ;;  %v7251_v48 = vld [vmem:[#allocation5 + $0xc0] ss:$16 sps:$4 sm:$0xff]  }
  0xea   :  { %1584 = vmatprep.subr.bf16.mxu0 %v7121_v49  ;;  %1732 = vmatprep.subr.bf16.mxu1 %v7124_v50  ;;  %v7190_v49 = vld [vmem:[#allocation2 + $0x5ec] ss:$16 sps:$4 sm:$0xff]   ;;  %v7259_v50 = vld [vmem:[#allocation5 + $0xe4] ss:$16 sps:$4 sm:$0xff]  }
  0xec   :  { %1724 = vmatmul.mubr.bf16.vlgmr.msra.gmra.mrb[4].mxu1 %v8254_v16  ;;  %v7161_v16 = vld [vmem:[#allocation2 + $0x5e0] ss:$16 sps:$4 sm:$0xff]  }
  0xed   :  { %1585 = vmatpush1.bf16.msra.mxu0 %v7119_v51  ;;  %1733 = vmatpush1.bf16.msra.mxu1 %v7122_v52  ;;  %v7188_v51 = vld [vmem:[#allocation2 + $0x5e8] ss:$16 sps:$4 sm:$0xff]   ;;  %v7257_v52 = vld [vmem:[#allocation5 + $0xe0] ss:$16 sps:$4 sm:$0xff]  }
  0xee   :  { %1586 = vmatprep.subr.bf16.mxu0 %v7127_v53  ;;  %1734 = vmatprep.subr.bf16.mxu1 %v7130_v54  ;;  %v7193_v53 = vld [vmem:[#allocation2 + $0x60c] ss:$16 sps:$4 sm:$0xff]   ;;  %v7265_v54 = vld [vmem:[#allocation5 + $0x104] ss:$16 sps:$4 sm:$0xff]  }
  0xef   :  { %1764 = vmatprep.mubr.bf16.mxu1 %v8259_v21  ;;  %v7167_v21 = vld [vmem:[#allocation2 + $0x508] ss:$16 sps:$4 sm:$0xff]  }
  0xf1   :  { %1587 = vmatpush1.bf16.msra.mxu0 %v7125_v55  ;;  %1735 = vmatpush1.bf16.msra.mxu1 %v7128_v56  ;;  %v7191_v55 = vld [vmem:[#allocation2 + $0x608] ss:$16 sps:$4 sm:$0xff]   ;;  %v7196_v56 = vld [vmem:[#allocation2 + $0x62c] ss:$16 sps:$4 sm:$0xff]  }
  0xf2   :  { %1588 = vmatprep.subr.bf16.mxu0 %v7133_v57  ;;  %1736 = vmatprep.subr.bf16.mxu1 %v7136_v58  ;;  %v7263_v57 = vld [vmem:[#allocation5 + $0x100] ss:$16 sps:$4 sm:$0xff]   ;;  %v7271_v58 = vld [vmem:[#allocation5 + $0x124] ss:$16 sps:$4 sm:$0xff]  }
  0xf5   :  { %1589 = vmatpush1.bf16.msra.mxu0 %v7131_v59  ;;  %1737 = vmatpush1.bf16.msra.mxu1 %v7134_v60  ;;  %v7194_v59 = vld [vmem:[#allocation2 + $0x628] ss:$16 sps:$4 sm:$0xff]   ;;  %v7199_v60 = vld [vmem:[#allocation2 + $0x64c] ss:$16 sps:$4 sm:$0xff]  }
  0xf6   :  { %1590 = vmatprep.subr.bf16.mxu0 %v7139_v61  ;;  %1738 = vmatprep.subr.bf16.mxu1 %v7142_v62  ;;  %v7269_v61 = vld [vmem:[#allocation5 + $0x120] ss:$16 sps:$4 sm:$0xff]   ;;  %v7277_v62 = vld [vmem:[#allocation5 + $0x144] ss:$16 sps:$4 sm:$0xff]  }
  0xf9   :  { %1591 = vmatpush1.bf16.msra.mxu0 %v7137_v63  ;;  %1739 = vmatpush1.bf16.msra.mxu1 %v7140_v1  ;;  %v7197_v63 = vld [vmem:[#allocation2 + $0x648] ss:$16 sps:$4 sm:$0xff]   ;;  %v7202_v1 = vld [vmem:[#allocation2 + $0x66c] ss:$16 sps:$4 sm:$0xff]  }
  0xfa   :  { %1592 = vmatprep.subr.bf16.mxu0 %v7145_v2  ;;  %1740 = vmatprep.subr.bf16.mxu1 %v7148_v3  ;;  %v7275_v2 = vld [vmem:[#allocation5 + $0x140] ss:$16 sps:$4 sm:$0xff]   ;;  %v7283_v3 = vld [vmem:[#allocation5 + $0x164] ss:$16 sps:$4 sm:$0xff]  }
  0xfd   :  { %1593 = vmatpush1.bf16.msra.mxu0 %v7143_v4  ;;  %1741 = vmatpush1.bf16.msra.mxu1 %v7146_v5  ;;  %v7200_v4 = vld [vmem:[#allocation2 + $0x668] ss:$16 sps:$4 sm:$0xff]   ;;  %v7205_v5 = vld [vmem:[#allocation2 + $0x68c] ss:$16 sps:$4 sm:$0xff]  }
  0xfe   :  { %1594 = vmatprep.subr.bf16.mxu0 %v7151_v6  ;;  %1742 = vmatprep.subr.bf16.mxu1 %v7154_v7  ;;  %v7281_v6 = vld [vmem:[#allocation5 + $0x160] ss:$16 sps:$4 sm:$0xff]   ;;  %v7289_v7 = vld [vmem:[#allocation5 + $0x184] ss:$16 sps:$4 sm:$0xff]  }
 0x101   :  { %1595 = vmatpush1.bf16.msra.mxu0 %v7149_v8  ;;  %1743 = vmatpush1.bf16.msra.mxu1 %v7152_v9  ;;  %v7208_v8 = vld [vmem:[#allocation2 + $0x6ac] ss:$16 sps:$4 sm:$0xff]   ;;  %v7287_v9 = vld [vmem:[#allocation5 + $0x180] ss:$16 sps:$4 sm:$0xff]  }
 0x102   :  { %1596 = vmatprep.subr.bf16.mxu0 %v7157_v10  ;;  %1744 = vmatprep.subr.bf16.mxu1 %v7160_v11  ;;  %v7295_v10 = vld [vmem:[#allocation5 + $0x1a4] ss:$16 sps:$4 sm:$0xff]   ;;  %v7206_v11 = vld [vmem:[#allocation2 + $0x6a8] ss:$16 sps:$4 sm:$0xff]  }
 0x105   :  { %1597 = vmatpush1.bf16.msra.mxu0 %v7155_v12  ;;  %1745 = vmatpush1.bf16.msra.mxu1 %v7158_v13  ;;  %v7211_v12 = vld [vmem:[#allocation2 + $0x6cc] ss:$16 sps:$4 sm:$0xff]   ;;  %v7293_v13 = vld [vmem:[#allocation5 + $0x1a0] ss:$16 sps:$4 sm:$0xff]  }
 0x106   :  { %1598 = vmatprep.subr.bf16.mxu0 %v7163_v14  ;;  %1746 = vmatprep.subr.bf16.mxu1 %v7166_v15  ;;  %v7209_v15 = vld [vmem:[#allocation2 + $0x6c8] ss:$16 sps:$4 sm:$0xff]  }
 0x109   :  { %1599 = vmatpush1.bf16.msra.mxu0 %v7161_v16  ;;  %1747 = vmatpush1.bf16.msra.mxu1 %v7164_v17  ;;  %v7214_v17 = vld [vmem:[#allocation2 + $0x6ec] ss:$16 sps:$4 sm:$0xff]  }
 0x10a   :  { %1748 = vmatprep.subr.bf16.mxu1 %v7169_v19  ;;  %2612 = vmatprep.subr.bf16.mxu0 %v7217_v20  ;;  %v7212_v20 = vld [vmem:[#allocation2 + $0x6e8] ss:$16 sps:$4 sm:$0xff]  }
 0x10c   :  { %1601 = vmatmul.mubr.bf16.vlgmr.msra.gmra.mrb[0].mxu0 %v8268_v23 }
 0x10d   :  { %1749 = vmatpush1.bf16.msra.mxu1 %v7167_v21  ;;  %2613 = vmatpush1.bf16.msra.mxu0 %v7215_v22  ;;  %v7220_v21 = vld [vmem:[#allocation5 + $0xc] ss:$16 sps:$4 sm:$0xff]   ;;  %v7218_v22 = vld [vmem:[#allocation5 + $0x8] ss:$16 sps:$4 sm:$0xff]  }
 0x10e   :  { %1750 = vmatprep.subr.bf16.mxu1 %v7172_v24  ;;  %2614 = vmatprep.subr.bf16.mxu0 %v7223_v25  ;;  %v7224_v24 = vld [vmem:[#allocation5 + $0x28] ss:$16 sps:$4 sm:$0xff]   ;;  %v7232_v25 = vld [vmem:[#allocation5 + $0x4c] ss:$16 sps:$4 sm:$0xff]  }
 0x111   :  { %1751 = vmatpush1.bf16.msra.mxu1 %v7170_v26  ;;  %2615 = vmatpush1.bf16.msra.mxu0 %v7221_v27  ;;  %v7230_v26 = vld [vmem:[#allocation5 + $0x48] ss:$16 sps:$4 sm:$0xff]   ;;  %v7238_v27 = vld [vmem:[#allocation5 + $0x6c] ss:$16 sps:$4 sm:$0xff]  }
 0x112   :  { %1752 = vmatprep.subr.bf16.mxu1 %v7175_v28  ;;  %2616 = vmatprep.subr.bf16.mxu0 %v7229_v29  ;;  %v7236_v28 = vld [vmem:[#allocation5 + $0x68] ss:$16 sps:$4 sm:$0xff]   ;;  %v7244_v29 = vld [vmem:[#allocation5 + $0x8c] ss:$16 sps:$4 sm:$0xff]  }
 0x115   :  { %1753 = vmatpush1.bf16.msra.mxu1 %v7173_v30  ;;  %2617 = vmatpush1.bf16.msra.mxu0 %v7227_v31  ;;  %v7242_v30 = vld [vmem:[#allocation5 + $0x88] ss:$16 sps:$4 sm:$0xff]   ;;  %v7250_v31 = vld [vmem:[#allocation5 + $0xac] ss:$16 sps:$4 sm:$0xff]  }
 0x116   :  { %1754 = vmatprep.subr.bf16.mxu1 %v7178_v32  ;;  %2618 = vmatprep.subr.bf16.mxu0 %v7235_v33  ;;  %v7248_v32 = vld [vmem:[#allocation5 + $0xa8] ss:$16 sps:$4 sm:$0xff]   ;;  %v7256_v33 = vld [vmem:[#allocation5 + $0xcc] ss:$16 sps:$4 sm:$0xff]  }
 0x119   :  { %1755 = vmatpush1.bf16.msra.mxu1 %v7176_v34  ;;  %2619 = vmatpush1.bf16.msra.mxu0 %v7233_v35  ;;  %v7301_v34 = vld [vmem:[#allocation5 + $0x1c4] ss:$16 sps:$4 sm:$0xff]   ;;  %v7262_v35 = vld [vmem:[#allocation5 + $0xec] ss:$16 sps:$4 sm:$0xff]  }
 0x11a   :  { %1756 = vmatprep.subr.bf16.mxu1 %v7181_v37  ;;  %2620 = vmatprep.subr.bf16.mxu0 %v7241_v38  ;;  %v7299_v37 = vld [vmem:[#allocation5 + $0x1c0] ss:$16 sps:$4 sm:$0xff]   ;;  %v7260_v38 = vld [vmem:[#allocation5 + $0xe8] ss:$16 sps:$4 sm:$0xff]  }
 0x11d   :  { %1757 = vmatpush1.bf16.msra.mxu1 %v7179_v39  ;;  %2621 = vmatpush1.bf16.msra.mxu0 %v7239_v40  ;;  %v7307_v39 = vld [vmem:[#allocation5 + $0x1e4] ss:$16 sps:$4 sm:$0xff]   ;;  %v7268_v40 = vld [vmem:[#allocation5 + $0x10c] ss:$16 sps:$4 sm:$0xff]  }
 0x11e   :  { %1758 = vmatprep.subr.bf16.mxu1 %v7184_v41  ;;  %2622 = vmatprep.subr.bf16.mxu0 %v7247_v42  ;;  %v7305_v41 = vld [vmem:[#allocation5 + $0x1e0] ss:$16 sps:$4 sm:$0xff]   ;;  %v7313_v42 = vld [vmem:[#allocation5 + $0x204] ss:$16 sps:$4 sm:$0xff]  }
 0x121   :  { %1759 = vmatpush1.bf16.msra.mxu1 %v7182_v43  ;;  %2623 = vmatpush1.bf16.msra.mxu0 %v7245_v44  ;;  %v7266_v43 = vld [vmem:[#allocation5 + $0x108] ss:$16 sps:$4 sm:$0xff]   ;;  %v7274_v44 = vld [vmem:[#allocation5 + $0x12c] ss:$16 sps:$4 sm:$0xff]  }
 0x122   :  { %1760 = vmatprep.subr.bf16.mxu1 %v7187_v45  ;;  %2624 = vmatprep.subr.bf16.mxu0 %v7253_v46  ;;  %v7272_v45 = vld [vmem:[#allocation5 + $0x128] ss:$16 sps:$4 sm:$0xff]   ;;  %v7280_v46 = vld [vmem:[#allocation5 + $0x14c] ss:$16 sps:$4 sm:$0xff]  }
 0x125   :  { %1761 = vmatpush1.bf16.msra.mxu1 %v7185_v47  ;;  %2625 = vmatpush1.bf16.msra.mxu0 %v7251_v48  ;;  %v7278_v47 = vld [vmem:[#allocation5 + $0x148] ss:$16 sps:$4 sm:$0xff]   ;;  %v7286_v48 = vld [vmem:[#allocation5 + $0x16c] ss:$16 sps:$4 sm:$0xff]  }
 0x126   :  { %1762 = vmatprep.subr.bf16.mxu1 %v7190_v49  ;;  %2626 = vmatprep.subr.bf16.mxu0 %v7259_v50  ;;  %v7284_v49 = vld [vmem:[#allocation5 + $0x168] ss:$16 sps:$4 sm:$0xff]   ;;  %v7292_v50 = vld [vmem:[#allocation5 + $0x18c] ss:$16 sps:$4 sm:$0xff]  }
 0x129   :  { %1763 = vmatpush1.bf16.msra.mxu1 %v7188_v51  ;;  %2627 = vmatpush1.bf16.msra.mxu0 %v7257_v52  ;;  %v7290_v51 = vld [vmem:[#allocation5 + $0x188] ss:$16 sps:$4 sm:$0xff]   ;;  %v7298_v52 = vld [vmem:[#allocation5 + $0x1ac] ss:$16 sps:$4 sm:$0xff]  }
 0x12a   :  { %1773 = vmatprep.subr.bf16.mxu1 %v7193_v53  ;;  %2628 = vmatprep.subr.bf16.mxu0 %v7265_v54  ;;  %v7296_v53 = vld [vmem:[#allocation5 + $0x1a8] ss:$16 sps:$4 sm:$0xff]   ;;  %v7304_v54 = vld [vmem:[#allocation5 + $0x1cc] ss:$16 sps:$4 sm:$0xff]  }
 0x12c   :  { %1765 = vmatmul.mubr.bf16.vlgmr.msra.gmra.mrb[4].mxu1 %v8268_v23  ;;  %v7226_v23 = vld [vmem:[#allocation5 + $0x2c] ss:$16 sps:$4 sm:$0xff]  }
 0x12d   :  { %1774 = vmatpush1.bf16.msra.mxu1 %v7191_v55  ;;  %1805 = vmatprep.mubr.bf16.mxu1 %v8075_v0  ;;  %v7203_v0 = vld [vmem:[#allocation2 + $0x688] ss:$16 sps:$4 sm:$0xff]  }
 0x12e   :  { %1775 = vmatprep.subr.bf16.mxu1 %v7196_v56  ;;  %2629 = vmatpush1.bf16.msra.mxu0 %v7263_v57  ;;  %v7302_v55 = vld [vmem:[#allocation5 + $0x1c8] ss:$16 sps:$4 sm:$0xff]   ;;  %v7310_v56 = vld [vmem:[#allocation5 + $0x1ec] ss:$16 sps:$4 sm:$0xff]  }
 0x12f   :  { %2630 = vmatprep.subr.bf16.mxu0 %v7271_v58  ;;  %v7308_v57 = vld [vmem:[#allocation5 + $0x1e8] ss:$16 sps:$4 sm:$0xff]   ;;  %v7316_v58 = vld [vmem:[#allocation5 + $0x20c] ss:$16 sps:$4 sm:$0xff]  }
 0x131   :  { %1776 = vmatpush1.bf16.msra.mxu1 %v7194_v59  ;;  %v346_v59 = vlaneseq }
 0x132   :  { %1777 = vmatprep.subr.bf16.mxu1 %v7199_v60  ;;  %2631 = vmatpush1.bf16.msra.mxu0 %v7269_v61 }
 0x133   :  { %2632 = vmatprep.subr.bf16.mxu0 %v7277_v62  ;;  %v8278_v60 = vshrl.u32 %v346_v59, 7  ;;  %v8286_v62 = vld [vmem:[%s8620_s3] sm:$0xf]  ;;  %v7380_v59 = vld [vmem:[#allocation5 + $0x368] ss:$16 sps:$4 sm:$0xff]  }
 0x135   :  { %1778 = vmatpush1.bf16.msra.mxu1 %v7197_v63  ;;  %v8281_v61 = vsub.s32 0, %v8278_v60  ;;  %v8289_v63 = vsub.s32 1, %v8278_v60 }
 0x136   :  { %1779 = vmatprep.subr.bf16.mxu1 %v7202_v1  ;;  %2633 = vmatpush1.bf16.msra.mxu0 %v7275_v2 }
 0x137   :  { %2634 = vmatprep.subr.bf16.mxu0 %v7283_v3  ;;  %v349_v1 = vrot.slane %v8286_v62, %v8281_v61  ;;  %v353_v2 = vrot.slane %v8286_v62, %v8289_v63 }
 0x139   :  { %1780 = vmatpush1.bf16.msra.mxu1 %v7200_v4 }
 0x13a   :  { %1781 = vmatprep.subr.bf16.mxu1 %v7205_v5  ;;  %2635 = vmatpush1.bf16.msra.mxu0 %v7281_v6 }
 0x13b   :  { %2636 = vmatprep.subr.bf16.mxu0 %v7289_v7 }
 0x13d   :  { %1782 = vmatpush1.bf16.msra.mxu1 %v7203_v0 }
 0x13e   :  { %1783 = vmatprep.subr.bf16.mxu1 %v7208_v8  ;;  %2637 = vmatpush1.bf16.msra.mxu0 %v7287_v9 }
 0x13f   :  { %v8273_v14 = vpop.f32.mrb[0].mxu1  ;;  %2638 = vmatprep.subr.bf16.mxu0 %v7295_v10 }
 0x140   :  { %v8275_v16 = vpop.f32.mrb[1].mxu1 }
 0x141   :  { %v1647_v18 = vpop.f32.mrb[2].mxu1  ;;  %1784 = vmatpush1.bf16.msra.mxu1 %v7206_v11 }
 0x142   :  { %v1648_v19 = vpop.f32.mrb[3].mxu1  ;;  %1785 = vmatprep.subr.bf16.mxu1 %v7211_v12  ;;  %2639 = vmatpush1.bf16.msra.mxu0 %v7293_v13  ;;  %v7311_v13 = vld [vmem:[#allocation5 + $0x200] ss:$16 sps:$4 sm:$0xff]   ;;  %v7319_v18 = vld [vmem:[#allocation5 + $0x224] ss:$16 sps:$4 sm:$0xff]  }
 0x143   :  { %2640 = vmatprep.subr.bf16.mxu0 %v7301_v34  ;;  %v7322_v19 = vld [vmem:[#allocation5 + $0x22c] ss:$16 sps:$4 sm:$0xff]   ;;  %v7344_v34 = vld [vmem:[#allocation5 + $0x2a8] ss:$16 sps:$4 sm:$0xff]  }
 0x145   :  { %1786 = vmatpush1.bf16.msra.mxu1 %v7209_v15  ;;  %v7314_v15 = vld [vmem:[#allocation5 + $0x208] ss:$16 sps:$4 sm:$0xff]  }
 0x146   :  { %1787 = vmatprep.subr.bf16.mxu1 %v7214_v17  ;;  %2641 = vmatpush1.bf16.msra.mxu0 %v7299_v37  ;;  %v7352_v37 = vld [vmem:[#allocation5 + $0x2cc] ss:$16 sps:$4 sm:$0xff]  }
 0x147   :  { %2642 = vmatprep.subr.bf16.mxu0 %v7307_v39  ;;  %v7350_v39 = vld [vmem:[#allocation5 + $0x2c8] ss:$16 sps:$4 sm:$0xff]  }
 0x149   :  { %1788 = vmatpush1.bf16.msra.mxu1 %v7212_v20  ;;  %v7317_v20 = vld [vmem:[#allocation5 + $0x220] ss:$16 sps:$4 sm:$0xff]  }
 0x14a   :  { %2694 = vmatprep.subr.bf16.mxu1 %v7220_v21  ;;  %2643 = vmatpush1.bf16.msra.mxu0 %v7305_v41  ;;  %v7320_v21 = vld [vmem:[#allocation5 + $0x228] ss:$16 sps:$4 sm:$0xff]   ;;  %v7358_v41 = vld [vmem:[#allocation5 + $0x2ec] ss:$16 sps:$4 sm:$0xff]  }
 0x14b   :  { %2653 = vmatprep.subr.bf16.mxu0 %v7313_v42  ;;  %v7353_v42 = vld [vmem:[#allocation5 + $0x2e0] ss:$16 sps:$4 sm:$0xff]  }
 0x14c   :  { %1806 = vmatmul.mubr.bf16.vlgmr.msra.gmra.mrb[4].mxu1 %v8235_v36  ;;  %v7254_v36 = vld [vmem:[#allocation5 + $0xc8] ss:$16 sps:$4 sm:$0xff]  }
 0x14d   :  { %2695 = vmatpush1.bf16.msra.mxu1 %v7218_v22  ;;  %v7323_v22 = vld [vmem:[#allocation5 + $0x240] ss:$16 sps:$4 sm:$0xff]  }
 0x14e   :  { %2696 = vmatprep.subr.bf16.mxu1 %v7226_v23  ;;  %v7326_v23 = vld [vmem:[#allocation5 + $0x248] ss:$16 sps:$4 sm:$0xff]  }
 0x151   :  { %2697 = vmatpush1.bf16.msra.mxu1 %v7224_v24  ;;  %v7331_v24 = vld [vmem:[#allocation5 + $0x264] ss:$16 sps:$4 sm:$0xff]  }
 0x152   :  { %2698 = vmatprep.subr.bf16.mxu1 %v7232_v25  ;;  %v7334_v25 = vld [vmem:[#allocation5 + $0x26c] ss:$16 sps:$4 sm:$0xff]  }
 0x155   :  { %2699 = vmatpush1.bf16.msra.mxu1 %v7230_v26  ;;  %v7329_v26 = vld [vmem:[#allocation5 + $0x260] ss:$16 sps:$4 sm:$0xff]  }
 0x156   :  { %2700 = vmatprep.subr.bf16.mxu1 %v7238_v27  ;;  %v7332_v27 = vld [vmem:[#allocation5 + $0x268] ss:$16 sps:$4 sm:$0xff]  }
 0x159   :  { %2701 = vmatpush1.bf16.msra.mxu1 %v7236_v28  ;;  %v7337_v28 = vld [vmem:[#allocation5 + $0x284] ss:$16 sps:$4 sm:$0xff]  }
 0x15a   :  { %2702 = vmatprep.subr.bf16.mxu1 %v7244_v29  ;;  %v7340_v29 = vld [vmem:[#allocation5 + $0x28c] ss:$16 sps:$4 sm:$0xff]  }
 0x15d   :  { %2703 = vmatpush1.bf16.msra.mxu1 %v7242_v30  ;;  %v7335_v30 = vld [vmem:[#allocation5 + $0x280] ss:$16 sps:$4 sm:$0xff]  }
 0x15e   :  { %2704 = vmatprep.subr.bf16.mxu1 %v7250_v31  ;;  %v7338_v31 = vld [vmem:[#allocation5 + $0x288] ss:$16 sps:$4 sm:$0xff]  }
 0x161   :  { %2705 = vmatpush1.bf16.msra.mxu1 %v7248_v32  ;;  %v7343_v32 = vld [vmem:[#allocation5 + $0x2a4] ss:$16 sps:$4 sm:$0xff]  }
 0x162   :  { %2706 = vmatprep.subr.bf16.mxu1 %v7256_v33  ;;  %v7346_v33 = vld [vmem:[#allocation5 + $0x2ac] ss:$16 sps:$4 sm:$0xff]  }
 0x165   :  { %2707 = vmatpush1.bf16.msra.mxu1 %v7254_v36  ;;  %v7341_v36 = vld [vmem:[#allocation5 + $0x2a0] ss:$16 sps:$4 sm:$0xff]  }
 0x166   :  { %2708 = vmatprep.subr.bf16.mxu1 %v7262_v35  ;;  %v7349_v35 = vld [vmem:[#allocation5 + $0x2c4] ss:$16 sps:$4 sm:$0xff]  }
 0x169   :  { %2709 = vmatpush1.bf16.msra.mxu1 %v7260_v38  ;;  %v7347_v38 = vld [vmem:[#allocation5 + $0x2c0] ss:$16 sps:$4 sm:$0xff]  }
 0x16a   :  { %2710 = vmatprep.subr.bf16.mxu1 %v7268_v40  ;;  %v7355_v40 = vld [vmem:[#allocation5 + $0x2e4] ss:$16 sps:$4 sm:$0xff]  }
 0x16d   :  { %2711 = vmatpush1.bf16.msra.mxu1 %v7266_v43  ;;  %v7356_v43 = vld [vmem:[#allocation5 + $0x2e8] ss:$16 sps:$4 sm:$0xff]  }
 0x16e   :  { %2712 = vmatprep.subr.bf16.mxu1 %v7274_v44  ;;  %v7361_v44 = vld [vmem:[#allocation5 + $0x304] ss:$16 sps:$4 sm:$0xff]  }
 0x171   :  { %2713 = vmatpush1.bf16.msra.mxu1 %v7272_v45  ;;  %v7364_v45 = vld [vmem:[#allocation5 + $0x30c] ss:$16 sps:$4 sm:$0xff]  }
 0x172   :  { %2714 = vmatprep.subr.bf16.mxu1 %v7280_v46  ;;  %v7359_v46 = vld [vmem:[#allocation5 + $0x300] ss:$16 sps:$4 sm:$0xff]  }
 0x175   :  { %2715 = vmatpush1.bf16.msra.mxu1 %v7278_v47  ;;  %v7362_v47 = vld [vmem:[#allocation5 + $0x308] ss:$16 sps:$4 sm:$0xff]  }
 0x176   :  { %2716 = vmatprep.subr.bf16.mxu1 %v7286_v48  ;;  %v7367_v48 = vld [vmem:[#allocation5 + $0x324] ss:$16 sps:$4 sm:$0xff]  }
 0x179   :  { %2717 = vmatpush1.bf16.msra.mxu1 %v7284_v49  ;;  %v7370_v49 = vld [vmem:[#allocation5 + $0x32c] ss:$16 sps:$4 sm:$0xff]  }
 0x17a   :  { %2718 = vmatprep.subr.bf16.mxu1 %v7292_v50  ;;  %v7365_v50 = vld [vmem:[#allocation5 + $0x320] ss:$16 sps:$4 sm:$0xff]  }
 0x17d   :  { %2719 = vmatpush1.bf16.msra.mxu1 %v7290_v51  ;;  %v7368_v51 = vld [vmem:[#allocation5 + $0x328] ss:$16 sps:$4 sm:$0xff]  }
 0x17e   :  { %2720 = vmatprep.subr.bf16.mxu1 %v7298_v52  ;;  %v7373_v52 = vld [vmem:[#allocation5 + $0x344] ss:$16 sps:$4 sm:$0xff]  }
 0x181   :  { %2721 = vmatpush1.bf16.msra.mxu1 %v7296_v53  ;;  %v7376_v53 = vld [vmem:[#allocation5 + $0x34c] ss:$16 sps:$4 sm:$0xff]  }
 0x182   :  { %2722 = vmatprep.subr.bf16.mxu1 %v7304_v54  ;;  %v7371_v54 = vld [vmem:[#allocation5 + $0x340] ss:$16 sps:$4 sm:$0xff]  }
 0x185   :  { %2723 = vmatpush1.bf16.msra.mxu1 %v7302_v55  ;;  %v7374_v55 = vld [vmem:[#allocation5 + $0x348] ss:$16 sps:$4 sm:$0xff]  }
 0x186   :  { %2724 = vmatprep.subr.bf16.mxu1 %v7310_v56  ;;  %v7379_v56 = vld [vmem:[#allocation5 + $0x364] ss:$16 sps:$4 sm:$0xff]  }
 0x189   :  { %2725 = vmatpush1.bf16.msra.mxu1 %v7308_v57  ;;  %v7382_v57 = vld [vmem:[#allocation5 + $0x36c] ss:$16 sps:$4 sm:$0xff]  }
 0x18a   :  { %2735 = vmatprep.subr.bf16.mxu1 %v7316_v58  ;;  %v7377_v58 = vld [vmem:[#allocation5 + $0x360] ss:$16 sps:$4 sm:$0xff]  }
 0x1df   :  { %v1602_v3 = vpop.f32.mrb[0].mxu0 }
 0x1e0   :  { %v6796_v4 = vadd.f32 %v1602_v3, %v349_v1  ;;  %v1604_v5 = vpop.f32.mrb[1].mxu0  ;;  %v7385_v1 = vld [vmem:[#allocation5 + $0x384] ss:$16 sps:$4 sm:$0xff]   ;;  %v7383_v3 = vld [vmem:[#allocation5 + $0x380] ss:$16 sps:$4 sm:$0xff]  }
 0x1e1   :  { %v6798_v6 = vadd.f32 %v1604_v5, %v353_v2  ;;  %v1606_v7 = vpop.f32.mrb[2].mxu0  ;;  %v7388_v2 = vld [vmem:[#allocation5 + $0x38c] ss:$16 sps:$4 sm:$0xff]   ;;  %v7391_v5 = vld [vmem:[#allocation5 + $0x3a4] ss:$16 sps:$4 sm:$0xff]  }
 0x1e2   :  { %v6797_v0 = vadd.f32 %v6796_v4, %v8273_v14  ;;  %v1607_v8 = vpop.f32.mrb[3].mxu0  ;;  %v7325_v14 = vld [vmem:[#allocation5 + $0x244] ss:$16 sps:$4 sm:$0xff]   ;;  %v7386_v4 = vld [vmem:[#allocation5 + $0x388] ss:$16 sps:$4 sm:$0xff]   ;;  %v8298_v7 = vsub.s32 2, %v8278_v60 }
 0x1e3   :  { %v6799_v9 = vadd.f32 %v6798_v6, %v8275_v16  ;;  %v7328_v16 = vld [vmem:[#allocation5 + $0x24c] ss:$16 sps:$4 sm:$0xff]   ;;  %v7389_v8 = vld [vmem:[#allocation5 + $0x3a0] ss:$16 sps:$4 sm:$0xff]  }
 0x1e4   :  { %v1814_v10 = vmax.f32 %v6797_v0, 0.0  ;;  %v7394_v6 = vld [vmem:[#allocation5 + $0x3ac] ss:$16 sps:$4 sm:$0xff]   ;;  %v8301_v0 = vsub.s32 3, %v8278_v60 }
 0x1e5   :  { %v1815_v11 = vmax.f32 %v6799_v9, 0.0  ;;  %v7392_v9 = vld [vmem:[#allocation5 + $0x3a8] ss:$16 sps:$4 sm:$0xff]  }
 0x1e6   :  { %v1818_v17 = vpack.c.bf16 %v1814_v10, %v1814_v10  ;;  %v357_v10 = vrot.slane %v8286_v62, %v8298_v7 }
 0x1e7   :  { %v1819_v12 = vpack.c.bf16 %v1815_v11, %v1815_v11  ;;  %v7397_v11 = vld [vmem:[#allocation5 + $0x3c4] ss:$16 sps:$4 sm:$0xff]  }
 0x1e9   :  { %2644 = vmatprep.mubr.bf16.mxu0 %v1819_v12  ;;  %2726 = vmatprep.mubr.bf16.mxu1 %v1819_v12  ;;  %v7400_v12 = vld [vmem:[#allocation5 + $0x3cc] ss:$16 sps:$4 sm:$0xff]  }
 0x1ea   :  { %2645 = vmatmul.mubr.bf16.vlgmr.msra.gmra.mrb[4].mxu0 %v1818_v17  ;;  %2727 = vmatmul.mubr.bf16.vlgmr.msra.gmra.mrb[8].mxu1 %v1818_v17  ;;  %v7395_v17 = vld [vmem:[#allocation5 + $0x3c0] ss:$16 sps:$4 sm:$0xff]  }
 0x1eb   :  { %2654 = vmatpush1.bf16.msra.mxu0 %v7311_v13  ;;  %2736 = vmatpush1.bf16.msra.mxu1 %v7314_v15  ;;  %v361_v13 = vrot.slane %v8286_v62, %v8301_v0  ;;  %v2797_v62 = vld [vmem:[%s8623_s6 + $0x88] sm:$0xff] }
 0x1ec   :  { %2655 = vmatprep.subr.bf16.mxu0 %v7319_v18  ;;  %2737 = vmatprep.subr.bf16.mxu1 %v7322_v19  ;;  %v7398_v18 = vld [vmem:[#allocation5 + $0x3c8] ss:$16 sps:$4 sm:$0xff]  }
 0x1ef   :  { %2656 = vmatpush1.bf16.msra.mxu0 %v7317_v20  ;;  %2738 = vmatpush1.bf16.msra.mxu1 %v7320_v21  ;;  %v7403_v21 = vld [vmem:[#allocation5 + $0x3e4] ss:$16 sps:$4 sm:$0xff]  }
 0x1f0   :  { %2657 = vmatprep.subr.bf16.mxu0 %v7325_v14  ;;  %2739 = vmatprep.subr.bf16.mxu1 %v7328_v16  ;;  %v7406_v14 = vld [vmem:[#allocation5 + $0x3ec] ss:$16 sps:$4 sm:$0xff]  }
 0x1f3   :  { %2658 = vmatpush1.bf16.msra.mxu0 %v7323_v22  ;;  %2740 = vmatpush1.bf16.msra.mxu1 %v7326_v23  ;;  %v7401_v23 = vld [vmem:[#allocation5 + $0x3e0] ss:$16 sps:$4 sm:$0xff]  }
 0x1f4   :  { %2659 = vmatprep.subr.bf16.mxu0 %v7331_v24  ;;  %2741 = vmatprep.subr.bf16.mxu1 %v7334_v25  ;;  %v2796_v24 = vld [vmem:[%s8623_s6 + $0x80] sm:$0xff] }
 0x1f7   :  { %2660 = vmatpush1.bf16.msra.mxu0 %v7329_v26  ;;  %2742 = vmatpush1.bf16.msra.mxu1 %v7332_v27  ;;  %v2828_v26 = vld [vmem:[%s8623_s6 + $0x180] sm:$0xff]  ;;  %v2829_v27 = vld [vmem:[%s8623_s6 + $0x188] sm:$0xff] }
 0x1f8   :  { %2661 = vmatprep.subr.bf16.mxu0 %v7337_v28  ;;  %2743 = vmatprep.subr.bf16.mxu1 %v7340_v29  ;;  %v7404_v29 = vld [vmem:[#allocation5 + $0x3e8] ss:$16 sps:$4 sm:$0xff]  }
 0x1fb   :  { %2662 = vmatpush1.bf16.msra.mxu0 %v7335_v30  ;;  %2744 = vmatpush1.bf16.msra.mxu1 %v7338_v31  ;;  %v2780_v30 = vld [vmem:[%s8623_s6] sm:$0xff]  ;;  %v2781_v31 = vld [vmem:[%s8623_s6 + $0x8] sm:$0xff] }
 0x1fc   :  { %2663 = vmatprep.subr.bf16.mxu0 %v7343_v32  ;;  %2745 = vmatprep.subr.bf16.mxu1 %v7346_v33  ;;  %v2812_v33 = vld [vmem:[%s8623_s6 + $0x100] sm:$0xff] }
 0x1ff   :  { %2664 = vmatpush1.bf16.msra.mxu0 %v7341_v36  ;;  %2746 = vmatpush1.bf16.msra.mxu1 %v7344_v34  ;;  %v2813_v36 = vld [vmem:[%s8623_s6 + $0x108] sm:$0xff]  ;;  %v2798_v34 = vld [vmem:[%s8623_s6 + $0x90] sm:$0xff] }
 0x200   :  { %2665 = vmatprep.subr.bf16.mxu0 %v7349_v35  ;;  %2747 = vmatprep.subr.bf16.mxu1 %v7352_v37  ;;  %v6732_v37 = vpack.c.bf16 %v2797_v62, %v2796_v24  ;;  %v2789_v24 = vld [vmem:[%s8623_s6 + $0x48] sm:$0xff] }
 0x203   :  { %2666 = vmatpush1.bf16.msra.mxu0 %v7347_v38  ;;  %2748 = vmatpush1.bf16.msra.mxu1 %v7350_v39  ;;  %v6764_v38 = vpack.c.bf16 %v2829_v27, %v2828_v26  ;;  %v2799_v39 = vld [vmem:[%s8623_s6 + $0x98] sm:$0xff]  ;;  %v2820_v26 = vld [vmem:[%s8623_s6 + $0x140] sm:$0xff]  ;;  %v2821_v27 = vld [vmem:[%s8623_s6 + $0x148] sm:$0xff] }
 0x204   :  { %2667 = vmatprep.subr.bf16.mxu0 %v7355_v40  ;;  %2749 = vmatprep.subr.bf16.mxu1 %v7358_v41  ;;  %v2830_v40 = vld [vmem:[%s8623_s6 + $0x190] sm:$0xff]  ;;  %v2831_v41 = vld [vmem:[%s8623_s6 + $0x198] sm:$0xff] }
 0x207   :  { %2668 = vmatpush1.bf16.msra.mxu0 %v7353_v42  ;;  %2750 = vmatpush1.bf16.msra.mxu1 %v7356_v43  ;;  %v6734_v42 = vpack.c.bf16 %v2781_v31, %v2780_v30  ;;  %v6766_v43 = vpack.c.bf16 %v2813_v36, %v2812_v33  ;;  %v2838_v30 = vld [vmem:[%s8623_s6 + $0x1d0] sm:$0xff]  ;;  %v2839_v31 = vld [vmem:[%s8623_s6 + $0x1d8] sm:$0xff]  ;;  %v6782_v33 = vpack.c.bf16 %v2821_v27, %v2820_v26 }
 0x208   :  { %2669 = vmatprep.subr.bf16.mxu0 %v7361_v44  ;;  %2751 = vmatprep.subr.bf16.mxu1 %v7364_v45  ;;  %v2782_v44 = vld [vmem:[%s8623_s6 + $0x10] sm:$0xff]  ;;  %v2783_v45 = vld [vmem:[%s8623_s6 + $0x18] sm:$0xff] }
 0x209   :  { %v2790_v36 = vld [vmem:[%s8623_s6 + $0x50] sm:$0xff] }
 0x20b   :  { %2670 = vmatpush1.bf16.msra.mxu0 %v7359_v46  ;;  %2752 = vmatpush1.bf16.msra.mxu1 %v7362_v47  ;;  %v6736_v47 = vpack.c.bf16 %v2799_v39, %v2798_v34  ;;  %v2791_v34 = vld [vmem:[%s8623_s6 + $0x58] sm:$0xff] }
 0x20c   :  { %2671 = vmatprep.subr.bf16.mxu0 %v7367_v48  ;;  %2753 = vmatprep.subr.bf16.mxu1 %v7370_v49  ;;  %v6768_v48 = vpack.c.bf16 %v2831_v41, %v2830_v40  ;;  %v2814_v49 = vld [vmem:[%s8623_s6 + $0x110] sm:$0xff]  ;;  %v2823_v39 = vld [vmem:[%s8623_s6 + $0x158] sm:$0xff]  ;;  %v2808_v40 = vld [vmem:[%s8623_s6 + $0xe0] sm:$0xff] }
 0x20d   :  { %v2809_v41 = vld [vmem:[%s8623_s6 + $0xe8] sm:$0xff] }
 0x20f   :  { %2672 = vmatpush1.bf16.msra.mxu0 %v7365_v50  ;;  %2754 = vmatpush1.bf16.msra.mxu1 %v7368_v51  ;;  %v2815_v50 = vld [vmem:[%s8623_s6 + $0x118] sm:$0xff]  ;;  %v2800_v51 = vld [vmem:[%s8623_s6 + $0xa0] sm:$0xff] }
 0x210   :  { %2673 = vmatprep.subr.bf16.mxu0 %v7373_v52  ;;  %2755 = vmatprep.subr.bf16.mxu1 %v7376_v53  ;;  %v2801_v52 = vld [vmem:[%s8623_s6 + $0xa8] sm:$0xff]  ;;  %v2832_v53 = vld [vmem:[%s8623_s6 + $0x1a0] sm:$0xff] }
 0x213   :  { %2674 = vmatpush1.bf16.msra.mxu0 %v7371_v54  ;;  %2756 = vmatpush1.bf16.msra.mxu1 %v7374_v55  ;;  %v2833_v54 = vld [vmem:[%s8623_s6 + $0x1a8] sm:$0xff]  ;;  %v6738_v55 = vpack.c.bf16 %v2783_v45, %v2782_v44  ;;  %v6754_v44 = vpack.c.bf16 %v2791_v34, %v2790_v36 }
 0x214   :  { %2675 = vmatprep.subr.bf16.mxu0 %v7379_v56  ;;  %2757 = vmatprep.subr.bf16.mxu1 %v7382_v57  ;;  %v6770_v56 = vpack.c.bf16 %v2815_v50, %v2814_v49  ;;  %v2784_v57 = vld [vmem:[%s8623_s6 + $0x20] sm:$0xff]  ;;  %v2793_v49 = vld [vmem:[%s8623_s6 + $0x68] sm:$0xff] }
 0x215   :  { %v2824_v50 = vld [vmem:[%s8623_s6 + $0x160] sm:$0xff] }
 0x217   :  { %2676 = vmatpush1.bf16.msra.mxu0 %v7377_v58  ;;  %2758 = vmatpush1.bf16.msra.mxu1 %v7380_v59  ;;  %v2785_v58 = vld [vmem:[%s8623_s6 + $0x28] sm:$0xff]  ;;  %v6740_v59 = vpack.c.bf16 %v2801_v52, %v2800_v51 }
 0x218   :  { %2677 = vmatprep.subr.bf16.mxu0 %v7385_v1  ;;  %2759 = vmatprep.subr.bf16.mxu1 %v7388_v2  ;;  %v6772_v1 = vpack.c.bf16 %v2833_v54, %v2832_v53  ;;  %v2816_v2 = vld [vmem:[%s8623_s6 + $0x120] sm:$0xff]  ;;  %v2825_v52 = vld [vmem:[%s8623_s6 + $0x168] sm:$0xff]  ;;  %v2810_v54 = vld [vmem:[%s8623_s6 + $0xf0] sm:$0xff] }
 0x219   :  { %v6790_v53 = vpack.c.bf16 %v2825_v52, %v2824_v50  ;;  %v7419_v50 = vld [vmem:[#allocation7 + $0x40] ss:$16 sps:$4 sm:$0xff]   ;;  %v7422_v52 = vld [vmem:[#allocation7 + $0x48] ss:$16 sps:$4 sm:$0xff]  }
 0x21b   :  { %2678 = vmatpush1.bf16.msra.mxu0 %v7383_v3  ;;  %2760 = vmatpush1.bf16.msra.mxu1 %v7386_v4  ;;  %v2817_v3 = vld [vmem:[%s8623_s6 + $0x128] sm:$0xff]  ;;  %v2802_v4 = vld [vmem:[%s8623_s6 + $0xb0] sm:$0xff] }
 0x21c   :  { %2679 = vmatprep.subr.bf16.mxu0 %v7391_v5  ;;  %2761 = vmatprep.subr.bf16.mxu1 %v7394_v6  ;;  %v2803_v5 = vld [vmem:[%s8623_s6 + $0xb8] sm:$0xff]  ;;  %v2834_v6 = vld [vmem:[%s8623_s6 + $0x1b0] sm:$0xff] }
 0x21f   :  { %2680 = vmatpush1.bf16.msra.mxu0 %v7389_v8  ;;  %2762 = vmatpush1.bf16.msra.mxu1 %v7392_v9  ;;  %v1807_v15 = vpop.f32.mrb[4].mxu1  ;;  %v2835_v8 = vld [vmem:[%s8623_s6 + $0x1b8] sm:$0xff]  ;;  %v6742_v9 = vpack.c.bf16 %v2785_v58, %v2784_v57 }
 0x220   :  { %v6800_v19 = vadd.f32 %v1807_v15, %v357_v10  ;;  %v1809_v20 = vpop.f32.mrb[5].mxu1  ;;  %2681 = vmatprep.subr.bf16.mxu0 %v7397_v11  ;;  %2763 = vmatprep.subr.bf16.mxu1 %v7400_v12  ;;  %v6774_v10 = vpack.c.bf16 %v2817_v3, %v2816_v2  ;;  %v2786_v11 = vld [vmem:[%s8623_s6 + $0x30] sm:$0xff]  ;;  %v2787_v12 = vld [vmem:[%s8623_s6 + $0x38] sm:$0xff]  ;;  %v6776_v15 = vpack.c.bf16 %v2835_v8, %v2834_v6  ;;  %v1950_v8 = vld [vmem:[%s8622_s5] sm:$0xf] }
 0x221   :  { %v6801_v16 = vadd.f32 %v1809_v20, %v361_v13  ;;  %v1811_v22 = vpop.f32.mrb[6].mxu1  ;;  %v6744_v13 = vpack.c.bf16 %v2803_v5, %v2802_v4  ;;  %v2805_v20 = vld [vmem:[%s8623_s6 + $0xc8] sm:$0xff]  ;;  %v2843_v58 = vld [vmem:[%s8623_s6 + $0x1f8] sm:$0xff]  ;;  %v2826_v4 = vld [vmem:[%s8623_s6 + $0x170] sm:$0xff] }
 0x222   :  { %v1812_v25 = vpop.f32.mrb[7].mxu1  ;;  %v1816_v32 = vmax.f32 %v6800_v19, 0.0  ;;  %v2804_v19 = vld [vmem:[%s8623_s6 + $0xc0] sm:$0xff]  ;;  %v2827_v5 = vld [vmem:[%s8623_s6 + $0x178] sm:$0xff] }
 0x223   :  { %v1817_v28 = vmax.f32 %v6801_v16, 0.0  ;;  %2682 = vmatpush1.bf16.msra.mxu0 %v7395_v17  ;;  %2764 = vmatpush1.bf16.msra.mxu1 %v7398_v18  ;;  %v2818_v17 = vld [vmem:[%s8623_s6 + $0x130] sm:$0xff]  ;;  %v2819_v18 = vld [vmem:[%s8623_s6 + $0x138] sm:$0xff]  ;;  %v6746_v16 = vpack.c.bf16 %v2787_v12, %v2786_v11  ;;  %v6748_v25 = vpack.c.bf16 %v2805_v20, %v2804_v19  ;;  %v6794_v6 = vpack.c.bf16 %v2827_v5, %v2826_v4 }
 0x224   :  { %2683 = vmatprep.subr.bf16.mxu0 %v7403_v21  ;;  %2765 = vmatprep.subr.bf16.mxu1 %v7406_v14  ;;  %v1820_v46 = vpack.c.bf16 %v1816_v32, %v1816_v32  ;;  %v2836_v21 = vld [vmem:[%s8623_s6 + $0x1c0] sm:$0xff]  ;;  %v2837_v14 = vld [vmem:[%s8623_s6 + $0x1c8] sm:$0xff]  ;;  %v6778_v22 = vpack.c.bf16 %v2819_v18, %v2818_v17  ;;  %v1959_v11 = vrot.slane %v1950_v8, %v8289_v63 }
 0x225   :  { %v1821_v35 = vpack.c.bf16 %v1817_v28, %v1817_v28  ;;  %v6780_v62 = vpack.c.bf16 %v2837_v14, %v2836_v21  ;;  %v2806_v28 = vld [vmem:[%s8623_s6 + $0xd0] sm:$0xff]  ;;  %v1967_v12 = vrot.slane %v1950_v8, %v8301_v0  ;;  %v7440_v5 = vld [vmem:[#allocation7 + $0xa8] ss:$16 sps:$4 sm:$0xff]  }
 0x226   :  { %v7437_v4 = vld [vmem:[#allocation7 + $0xa0] ss:$16 sps:$4 sm:$0xff]  }
 0x227   :  { %2684 = vmatpush1.bf16.msra.mxu0 %v7401_v23  ;;  %2766 = vmatpush1.bf16.msra.mxu1 %v7404_v29  ;;  %v2788_v23 = vld [vmem:[%s8623_s6 + $0x40] sm:$0xff]  ;;  %v2807_v29 = vld [vmem:[%s8623_s6 + $0xd8] sm:$0xff] }
 0x228   :  { %2685 = vmatprep.mubr.bf16.mxu0 %v1821_v35  ;;  %2767 = vmatprep.mubr.bf16.mxu1 %v1821_v35  ;;  %v6750_v32 = vpack.c.bf16 %v2789_v24, %v2788_v23  ;;  %v6752_v35 = vpack.c.bf16 %v2807_v29, %v2806_v28 }
 0x229   :  { %6733 = vmatprep.subr.bf16.mxu0 %v6732_v37  ;;  %6765 = vmatprep.subr.bf16.mxu1 %v6764_v38  ;;  %v6784_v37 = vpack.c.bf16 %v2839_v31, %v2838_v30  ;;  %v2822_v38 = vld [vmem:[%s8623_s6 + $0x150] sm:$0xff]  ;;  %v6257_v30 = vld [vmem:[%s8624_s7] ss:$0 sm:$0xff]  ;;  %s8077_s7 = smov 126  }
 0x22a   :  { %2686 = vmatmul.mubr.bf16.vlgmr.msra.gmra.mrb[4].mxu0 %v1820_v46  ;;  %2768 = vmatmul.mubr.bf16.vlgmr.msra.gmra.mrb[8].mxu1 %v1820_v46  ;;  %v6786_v45 = vpack.c.bf16 %v2823_v39, %v2822_v38  ;;  %v6756_v46 = vpack.c.bf16 %v2809_v41, %v2808_v40  ;;  %v8076_v39 = vmov 1   ;;  %v7407_v40 = vld [vmem:[#allocation7] ss:$16 sps:$4 sm:$0xff]   ;;  %v7409_v41 = vld [vmem:[#allocation7 + $0x4] ss:$16 sps:$4 sm:$0xff]  }
 0x22b   :  { %6735 = vmatpush3.bf16.msra.mxu0 %v6734_v42  ;;  %6767 = vmatpush3.bf16.msra.mxu1 %v6766_v43  ;;  %v2840_v42 = vld [vmem:[%s8623_s6 + $0x1e0] sm:$0xff]  ;;  %v2841_v43 = vld [vmem:[%s8623_s6 + $0x1e8] sm:$0xff] }
 0x22c   :  { %6737 = vmatprep.subr.bf16.mxu0 %v6736_v47  ;;  %6769 = vmatprep.subr.bf16.mxu1 %v6768_v48  ;;  %v6788_v47 = vpack.c.bf16 %v2841_v43, %v2840_v42  ;;  %v2792_v48 = vld [vmem:[%s8623_s6 + $0x60] sm:$0xff]  ;;  %v7410_v42 = vld [vmem:[#allocation7 + $0x8] ss:$16 sps:$4 sm:$0xff]   ;;  %v7412_v43 = vld [vmem:[#allocation7 + $0xc] ss:$16 sps:$4 sm:$0xff]  }
 0x22d   :  { %v6758_v51 = vpack.c.bf16 %v2793_v49, %v2792_v48  ;;  %6877 = vset.pattern.permute.xlu1 %v8076_v39  ;;  %v7421_v48 = vld [vmem:[#allocation7 + $0x44] ss:$16 sps:$4 sm:$0xff]   ;;  %v7424_v49 = vld [vmem:[#allocation7 + $0x4c] ss:$16 sps:$4 sm:$0xff]  }
 0x22f   :  { %6739 = vmatpush3.bf16.msra.mxu0 %v6738_v55  ;;  %6771 = vmatpush3.bf16.msra.mxu1 %v6770_v56  ;;  %v2811_v55 = vld [vmem:[%s8623_s6 + $0xf8] sm:$0xff]  ;;  %v2842_v56 = vld [vmem:[%s8623_s6 + $0x1f0] sm:$0xff] }
 0x230   :  { %6741 = vmatprep.subr.bf16.mxu0 %v6740_v59  ;;  %6773 = vmatprep.subr.bf16.mxu1 %v6772_v1  ;;  %v6760_v57 = vpack.c.bf16 %v2811_v55, %v2810_v54  ;;  %v2794_v59 = vld [vmem:[%s8623_s6 + $0x70] sm:$0xff]  ;;  %v2795_v1 = vld [vmem:[%s8623_s6 + $0x78] sm:$0xff]  ;;  %v6792_v2 = vpack.c.bf16 %v2843_v58, %v2842_v56 }
 0x231   :  { %v6762_v3 = vpack.c.bf16 %v2795_v1, %v2794_v59  ;;  %v7430_v54 = vld [vmem:[#allocation7 + $0x6c] ss:$16 sps:$4 sm:$0xff]   ;;  %v7425_v55 = vld [vmem:[#allocation7 + $0x60] ss:$16 sps:$4 sm:$0xff]   ;;  %v7428_v56 = vld [vmem:[#allocation7 + $0x68] ss:$16 sps:$4 sm:$0xff]  }
 0x232   :  { %v7436_v58 = vld [vmem:[#allocation7 + $0x8c] ss:$16 sps:$4 sm:$0xff]   ;;  %v7431_v59 = vld [vmem:[#allocation7 + $0x80] ss:$16 sps:$4 sm:$0xff]   ;;  %v7434_v1 = vld [vmem:[#allocation7 + $0x88] ss:$16 sps:$4 sm:$0xff]  }
 0x233   :  { %6743 = vmatpush3.bf16.msra.mxu0 %v6742_v9  ;;  %6775 = vmatpush3.bf16.msra.mxu1 %v6774_v10  ;;  %v1955_v9 = vrot.slane %v1950_v8, %v8281_v61  ;;  %v1963_v10 = vrot.slane %v1950_v8, %v8298_v7  ;;  %v7448_v8 = vld [vmem:[#allocation7 + $0xcc] ss:$16 sps:$4 sm:$0xff]  }
 0x234   :  { %6745 = vmatprep.subr.bf16.mxu0 %v6744_v13  ;;  %6777 = vmatprep.subr.bf16.mxu1 %v6776_v15 }
 0x237   :  { %6747 = vmatpush3.bf16.msra.mxu0 %v6746_v16  ;;  %6779 = vmatpush3.bf16.msra.mxu1 %v6778_v22 }
 0x238   :  { %6749 = vmatprep.subr.bf16.mxu0 %v6748_v25  ;;  %6781 = vmatprep.subr.bf16.mxu1 %v6780_v62 }
 0x23b   :  { %6751 = vmatpush3.bf16.msra.mxu0 %v6750_v32  ;;  %6783 = vmatpush3.bf16.msra.mxu1 %v6782_v33 }
 0x23c   :  { %6753 = vmatprep.subr.bf16.mxu0 %v6752_v35  ;;  %6785 = vmatprep.subr.bf16.mxu1 %v6784_v37 }
 0x23f   :  { %6755 = vmatpush3.bf16.msra.mxu0 %v6754_v44  ;;  %6787 = vmatpush3.bf16.msra.mxu1 %v6786_v45  ;;  %v7415_v44 = vld [vmem:[#allocation7 + $0x24] ss:$16 sps:$4 sm:$0xff]   ;;  %v7418_v45 = vld [vmem:[#allocation7 + $0x2c] ss:$16 sps:$4 sm:$0xff]  }
 0x240   :  { %6757 = vmatprep.subr.bf16.mxu0 %v6756_v46  ;;  %6789 = vmatprep.subr.bf16.mxu1 %v6788_v47  ;;  %v7413_v46 = vld [vmem:[#allocation7 + $0x20] ss:$16 sps:$4 sm:$0xff]   ;;  %v7416_v47 = vld [vmem:[#allocation7 + $0x28] ss:$16 sps:$4 sm:$0xff]  }
 0x243   :  { %6759 = vmatpush3.bf16.msra.mxu0 %v6758_v51  ;;  %6791 = vmatpush3.bf16.msra.mxu1 %v6790_v53  ;;  %v7427_v53 = vld [vmem:[#allocation7 + $0x64] ss:$16 sps:$4 sm:$0xff]  }
 0x244   :  { %6761 = vmatprep.subr.bf16.mxu0 %v6760_v57  ;;  %6793 = vmatprep.subr.bf16.mxu1 %v6792_v2  ;;  %v7433_v57 = vld [vmem:[#allocation7 + $0x84] ss:$16 sps:$4 sm:$0xff]  }
 0x245   :  { %v7439_v2 = vld [vmem:[#allocation7 + $0xa4] ss:$16 sps:$4 sm:$0xff]  }
 0x247   :  { %6763 = vmatpush3.bf16.msra.mxu0 %v6762_v3  ;;  %6795 = vmatpush3.bf16.msra.mxu1 %v6794_v6  ;;  %v7442_v3 = vld [vmem:[#allocation7 + $0xac] ss:$16 sps:$4 sm:$0xff]   ;;  %v7445_v6 = vld [vmem:[#allocation7 + $0xc4] ss:$16 sps:$4 sm:$0xff]  }
 0x248   :  { %3892 = vmatprep.subr.bf16.mxu0 %v7409_v41  ;;  %3974 = vmatprep.subr.bf16.mxu1 %v7412_v43 }
 0x2fd   :  { %v2687_v13 = vpop.f32.mrb[4].mxu0  ;;  %v2769_v15 = vpop.f32.mrb[8].mxu1 }
 0x2fe   :  { %v6802_v17 = vadd.f32 %v2687_v13, %v1955_v9  ;;  %v6804_v18 = vadd.f32 %v2769_v15, %v1963_v10  ;;  %v2689_v19 = vpop.f32.mrb[5].mxu0  ;;  %v2771_v20 = vpop.f32.mrb[9].mxu1  ;;  %v7443_v9 = vld [vmem:[#allocation7 + $0xc0] ss:$16 sps:$4 sm:$0xff]   ;;  %v7446_v10 = vld [vmem:[#allocation7 + $0xc8] ss:$16 sps:$4 sm:$0xff]  }
 0x2ff   :  { %v6803_v21 = vadd.f32 %v2689_v19, %v1959_v11  ;;  %v6805_v14 = vadd.f32 %v2771_v20, %v1967_v12  ;;  %v2691_v16 = vpop.f32.mrb[6].mxu0  ;;  %v2773_v22 = vpop.f32.mrb[10].mxu1  ;;  %v7451_v11 = vld [vmem:[#allocation7 + $0xe4] ss:$16 sps:$4 sm:$0xff]   ;;  %v7454_v12 = vld [vmem:[#allocation7 + $0xec] ss:$16 sps:$4 sm:$0xff]  }
 0x300   :  { %v2692_v23 = vpop.f32.mrb[7].mxu0  ;;  %v2774_v24 = vpop.f32.mrb[11].mxu1  ;;  %v2776_v26 = vmax.f32 %v6802_v17, 0.0  ;;  %v2778_v27 = vmax.f32 %v6804_v18, 0.0  ;;  %v7449_v13 = vld [vmem:[#allocation7 + $0xe0] ss:$16 sps:$4 sm:$0xff]  }
 0x301   :  { %v2777_v25 = vmax.f32 %v6803_v21, 0.0  ;;  %v2779_v62 = vmax.f32 %v6805_v14, 0.0  ;;  %v7452_v15 = vld [vmem:[#allocation7 + $0xe8] ss:$16 sps:$4 sm:$0xff]   ;;  %v7457_v17 = vld [vmem:[#allocation7 + $0x104] ss:$16 sps:$4 sm:$0xff]  }
 0x302   :  { %v7460_v18 = vld [vmem:[#allocation7 + $0x10c] ss:$16 sps:$4 sm:$0xff]   ;;  %v7455_v19 = vld [vmem:[#allocation7 + $0x100] ss:$16 sps:$4 sm:$0xff]   ;;  %v7458_v20 = vld [vmem:[#allocation7 + $0x108] ss:$16 sps:$4 sm:$0xff]  }
 0x303   :  { %2915 = vmatprep.mubr.f32.mxu0 %v2777_v25  ;;  %2985 = vmatprep.mubr.f32.mxu1 %v2779_v62  ;;  %v7463_v21 = vld [vmem:[#allocation7 + $0x124] ss:$16 sps:$4 sm:$0xff]   ;;  %v7466_v14 = vld [vmem:[#allocation7 + $0x12c] ss:$16 sps:$4 sm:$0xff]   ;;  %v7461_v16 = vld [vmem:[#allocation7 + $0x120] ss:$16 sps:$4 sm:$0xff]  }
 0x304   :  { %2916 = vmatmul.mubr.f32.vlgmr.msra.gmra.mrb[8].mxu0 %v2776_v26  ;;  %2986 = vmatmul.mubr.f32.vlgmr.msra.gmra.mrb[12].mxu1 %v2778_v27  ;;  %v7464_v22 = vld [vmem:[#allocation7 + $0x128] ss:$16 sps:$4 sm:$0xff]   ;;  %v7469_v23 = vld [vmem:[#allocation7 + $0x144] ss:$16 sps:$4 sm:$0xff]   ;;  %v7472_v24 = vld [vmem:[#allocation7 + $0x14c] ss:$16 sps:$4 sm:$0xff]  }
 0x305   :  { %3893 = vmatpush1.bf16.msra.mxu0 %v7407_v40  ;;  %3975 = vmatpush1.bf16.msra.mxu1 %v7410_v42  ;;  %v7467_v25 = vld [vmem:[#allocation7 + $0x140] ss:$16 sps:$4 sm:$0xff]   ;;  %v7470_v62 = vld [vmem:[#allocation7 + $0x148] ss:$16 sps:$4 sm:$0xff]   ;;  %v7475_v26 = vld [vmem:[#allocation7 + $0x164] ss:$16 sps:$4 sm:$0xff]  }
 0x306   :  { %3894 = vmatprep.subr.bf16.mxu0 %v7415_v44  ;;  %3976 = vmatprep.subr.bf16.mxu1 %v7418_v45  ;;  %v7478_v27 = vld [vmem:[#allocation7 + $0x16c] ss:$16 sps:$4 sm:$0xff]   ;;  %v2992_v40 = vld [vmem:[%s8618_s1] sm:$0xff] }
 0x307   :  { %v7493_v44 = vld [vmem:[#allocation7 + $0x1c4] ss:$16 sps:$4 sm:$0xff]   ;;  %v7496_v45 = vld [vmem:[#allocation7 + $0x1cc] ss:$16 sps:$4 sm:$0xff]  }
 0x309   :  { %3895 = vmatpush1.bf16.msra.mxu0 %v7413_v46  ;;  %3977 = vmatpush1.bf16.msra.mxu1 %v7416_v47  ;;  %v7491_v46 = vld [vmem:[#allocation7 + $0x1c0] ss:$16 sps:$4 sm:$0xff]   ;;  %v7494_v47 = vld [vmem:[#allocation7 + $0x1c8] ss:$16 sps:$4 sm:$0xff]  }
 0x30a   :  { %3896 = vmatprep.subr.bf16.mxu0 %v7421_v48  ;;  %3978 = vmatprep.subr.bf16.mxu1 %v7424_v49  ;;  %v7497_v48 = vld [vmem:[#allocation7 + $0x1e0] ss:$16 sps:$4 sm:$0xff]   ;;  %v7499_v49 = vld [vmem:[#allocation7 + $0x1e4] ss:$16 sps:$4 sm:$0xff]  }
 0x30d   :  { %3897 = vmatpush1.bf16.msra.mxu0 %v7419_v50  ;;  %3979 = vmatpush1.bf16.msra.mxu1 %v7422_v52  ;;  %v7500_v50 = vld [vmem:[#allocation7 + $0x1e8] ss:$16 sps:$4 sm:$0xff]   ;;  %v7508_v52 = vld [vmem:[#allocation7 + $0x20c] ss:$16 sps:$4 sm:$0xff]  }
 0x30e   :  { %3898 = vmatprep.subr.bf16.mxu0 %v7427_v53  ;;  %3980 = vmatprep.subr.bf16.mxu1 %v7430_v54  ;;  %v6258_v53 = vld [vmem:[%s8625_s8 + $0x1] ss:$2 sm:$0xf]  ;;  %v3003_v54 = vld [vmem:[%s8625_s8] ss:$2 sm:$0xf] }
 0x311   :  { %3899 = vmatpush1.bf16.msra.mxu0 %v7425_v55  ;;  %3981 = vmatpush1.bf16.msra.mxu1 %v7428_v56  ;;  %v3077_v55 = vrot.slane %v6258_v53, %v8298_v7  ;;  %v3013_v56 = vrot.slane %v3003_v54, %v8281_v61 }
 0x312   :  { %3900 = vmatprep.subr.bf16.mxu0 %v7433_v57  ;;  %3982 = vmatprep.subr.bf16.mxu1 %v7436_v58  ;;  %v3017_v57 = vrot.slane %v3003_v54, %v8289_v63  ;;  %v3021_v58 = vrot.slane %v3003_v54, %v8298_v7 }
 0x315   :  { %3901 = vmatpush1.bf16.msra.mxu0 %v7431_v59  ;;  %3983 = vmatpush1.bf16.msra.mxu1 %v7434_v1  ;;  %v3025_v59 = vrot.slane %v3003_v54, %v8301_v0  ;;  %v3069_v1 = vrot.slane %v6258_v53, %v8281_v61  ;;  %v7536_v54 = vld [vmem:[#allocation7 + $0x2a8] ss:$16 sps:$4 sm:$0xff]  }
 0x316   :  { %3902 = vmatprep.subr.bf16.mxu0 %v7439_v2  ;;  %3984 = vmatprep.subr.bf16.mxu1 %v7442_v3  ;;  %v3073_v2 = vrot.slane %v6258_v53, %v8289_v63  ;;  %v3081_v3 = vrot.slane %v6258_v53, %v8301_v0  ;;  %v7533_v53 = vld [vmem:[#allocation7 + $0x2a0] ss:$16 sps:$4 sm:$0xff]  }
 0x319   :  { %3903 = vmatpush1.bf16.msra.mxu0 %v7437_v4  ;;  %3985 = vmatpush1.bf16.msra.mxu1 %v7440_v5 }
 0x31a   :  { %3904 = vmatprep.subr.bf16.mxu0 %v7445_v6  ;;  %3986 = vmatprep.subr.bf16.mxu1 %v7448_v8 }
 0x31d   :  { %3905 = vmatpush1.bf16.msra.mxu0 %v7443_v9  ;;  %3987 = vmatpush1.bf16.msra.mxu1 %v7446_v10 }
 0x31e   :  { %3906 = vmatprep.subr.bf16.mxu0 %v7451_v11  ;;  %3988 = vmatprep.subr.bf16.mxu1 %v7454_v12 }
 0x321   :  { %3907 = vmatpush1.bf16.msra.mxu0 %v7449_v13  ;;  %3989 = vmatpush1.bf16.msra.mxu1 %v7452_v15 }
 0x322   :  { %3908 = vmatprep.subr.bf16.mxu0 %v7457_v17  ;;  %3990 = vmatprep.subr.bf16.mxu1 %v7460_v18 }
 0x325   :  { %3909 = vmatpush1.bf16.msra.mxu0 %v7455_v19  ;;  %3991 = vmatpush1.bf16.msra.mxu1 %v7458_v20 }
 0x326   :  { %3910 = vmatprep.subr.bf16.mxu0 %v7463_v21  ;;  %3992 = vmatprep.subr.bf16.mxu1 %v7466_v14 }
 0x329   :  { %3911 = vmatpush1.bf16.msra.mxu0 %v7461_v16  ;;  %3993 = vmatpush1.bf16.msra.mxu1 %v7464_v22 }
 0x32a   :  { %3912 = vmatprep.subr.bf16.mxu0 %v7469_v23  ;;  %3994 = vmatprep.subr.bf16.mxu1 %v7472_v24 }
 0x32d   :  { %3913 = vmatpush1.bf16.msra.mxu0 %v7467_v25  ;;  %3995 = vmatpush1.bf16.msra.mxu1 %v7470_v62 }
 0x32e   :  { %3914 = vmatprep.subr.bf16.mxu0 %v7475_v26  ;;  %3996 = vmatprep.subr.bf16.mxu1 %v7478_v27 }
 0x3d7   :  { %v6650_v28 = vpop.f32.mrb[8].mxu0  ;;  %v6685_v29 = vpop.f32.mrb[12].mxu1 }
 0x3d8   :  { %v6651_v31 = vpop.f32.mrb[9].mxu0  ;;  %v6686_v32 = vpop.f32.mrb[13].mxu1 }
 0x3d9   :  { %v6652_v33 = vadd.f32 %v6651_v31, %v6650_v28  ;;  %v6687_v36 = vadd.f32 %v6686_v32, %v6685_v29  ;;  %v7473_v28 = vld [vmem:[#allocation7 + $0x160] ss:$16 sps:$4 sm:$0xff]   ;;  %v7476_v29 = vld [vmem:[#allocation7 + $0x168] ss:$16 sps:$4 sm:$0xff]   ;;  %v7484_v31 = vld [vmem:[#allocation7 + $0x18c] ss:$16 sps:$4 sm:$0xff]  }
 0x3da   :  { %3915 = vmatpush1.bf16.msra.mxu0 %v7473_v28  ;;  %v7479_v32 = vld [vmem:[#allocation7 + $0x180] ss:$16 sps:$4 sm:$0xff]   ;;  %3997 = vmatpush1.bf16.msra.mxu1 %v7476_v29 }
 0x3db   :  { %v2918_v34 = vadd.f32 %v6652_v33, %v6257_v30  ;;  %v7481_v30 = vld [vmem:[#allocation7 + $0x184] ss:$16 sps:$4 sm:$0xff]   ;;  %v7482_v33 = vld [vmem:[#allocation7 + $0x188] ss:$16 sps:$4 sm:$0xff]   ;;  %3998 = vmatprep.subr.bf16.mxu1 %v7484_v31 }
 0x3dc   :  { %3916 = vmatprep.subr.bf16.mxu0 %v7481_v30  ;;  %v7503_v30 = vld [vmem:[#allocation7 + $0x200] ss:$16 sps:$4 sm:$0xff]   ;;  %v7506_v31 = vld [vmem:[#allocation7 + $0x208] ss:$16 sps:$4 sm:$0xff]  }
 0x3dd   :  { %v8509_v35 = vadd.f32 %v6687_v36, %v2918_v34  ;;  %v7487_v36 = vld [vmem:[#allocation7 + $0x1a4] ss:$16 sps:$4 sm:$0xff]   ;;  %v7490_v34 = vld [vmem:[#allocation7 + $0x1ac] ss:$16 sps:$4 sm:$0xff]  }
 0x3de   :  { %3917 = vmatpush1.bf16.msra.mxu0 %v7479_v32  ;;  %3999 = vmatpush1.bf16.msra.mxu1 %v7482_v33  ;;  %v7511_v33 = vld [vmem:[#allocation7 + $0x224] ss:$16 sps:$4 sm:$0xff]  }
 0x3df   :  { %2991 = vst [vmem:[%s8632_s15] sm:$0xff] %v8509_v35  ;;  %v2993_v37 = vmul.f32 0.5, %v8509_v35  ;;  %3918 = vmatprep.subr.bf16.mxu0 %v7487_v36  ;;  %4000 = vmatprep.subr.bf16.mxu1 %v7490_v34  ;;  %v7514_v36 = vld [vmem:[#allocation7 + $0x22c] ss:$16 sps:$4 sm:$0xff]  }
 0x3e1   :  { %v2994_v38 = vmul.f32 1.442695, %v2993_v37  ;;  %v7485_v37 = vld [vmem:[#allocation7 + $0x1a0] ss:$16 sps:$4 sm:$0xff]  }
 0x3e2   :  { %3919 = vmatpush1.bf16.msra.mxu0 %v7485_v37  ;;  %v7509_v37 = vld [vmem:[#allocation7 + $0x220] ss:$16 sps:$4 sm:$0xff]  }
 0x3e3   :  { %7919 = vpow2.f32 %v2994_v38  ;;  %v7488_v38 = vld [vmem:[#allocation7 + $0x1a8] ss:$16 sps:$4 sm:$0xff]   ;;  %3920 = vmatprep.subr.bf16.mxu0 %v7493_v44  ;;  %v7523_v44 = vld [vmem:[#allocation7 + $0x264] ss:$16 sps:$4 sm:$0xff]  }
 0x3e4   :  { %4001 = vmatpush1.bf16.msra.mxu1 %v7488_v38  ;;  %v7512_v38 = vld [vmem:[#allocation7 + $0x228] ss:$16 sps:$4 sm:$0xff]  }
 0x3e5   :  { %4002 = vmatprep.subr.bf16.mxu1 %v7496_v45  ;;  %v7526_v45 = vld [vmem:[#allocation7 + $0x26c] ss:$16 sps:$4 sm:$0xff]  }
 0x3e6   :  { %3921 = vmatpush1.bf16.msra.mxu0 %v7491_v46  ;;  %v7521_v46 = vld [vmem:[#allocation7 + $0x260] ss:$16 sps:$4 sm:$0xff]  }
 0x3e7   :  { %3922 = vmatprep.subr.bf16.mxu0 %v7499_v49  ;;  %v7532_v49 = vld [vmem:[#allocation7 + $0x28c] ss:$16 sps:$4 sm:$0xff]  }
 0x3e8   :  { %4003 = vmatpush1.bf16.msra.mxu1 %v7494_v47  ;;  %v7524_v47 = vld [vmem:[#allocation7 + $0x268] ss:$16 sps:$4 sm:$0xff]  }
 0x3ea   :  { %3923 = vmatpush1.bf16.msra.mxu0 %v7497_v48  ;;  %v7529_v48 = vld [vmem:[#allocation7 + $0x284] ss:$16 sps:$4 sm:$0xff]  }
 0x3ed   :  { %v7920_v51 = vpop.eup %7919 }
 0x3ee   :  { %2997 = vrot.lane.b32.xlu0 %v7920_v51, %s8077_s7  ;;  %v7502_v51 = vld [vmem:[#allocation7 + $0x1ec] ss:$16 sps:$4 sm:$0xff]  }
 0x3ef   :  { %4004 = vmatprep.subr.bf16.mxu1 %v7502_v51  ;;  %v7530_v51 = vld [vmem:[#allocation7 + $0x288] ss:$16 sps:$4 sm:$0xff]  }
 0x3f0   :  { %4005 = vmatpush1.bf16.msra.mxu1 %v7500_v50  ;;  %v7527_v50 = vld [vmem:[#allocation7 + $0x280] ss:$16 sps:$4 sm:$0xff]  }
 0x3f1   :  { %4015 = vmatprep.subr.bf16.mxu1 %v7508_v52  ;;  %v7538_v52 = vld [vmem:[#allocation7 + $0x2ac] ss:$16 sps:$4 sm:$0xff]  }
 0x460   :  { %v2998_v41 = vpop.permute.xlu0 %2997 }
 0x461   :  { %v3000_v42 = vmul.f32 %v2998_v41, %v2992_v40  ;;  %v7517_v40 = vld [vmem:[#allocation7 + $0x244] ss:$16 sps:$4 sm:$0xff]   ;;  %v7520_v41 = vld [vmem:[#allocation7 + $0x24c] ss:$16 sps:$4 sm:$0xff]  }
 0x463   :  { %v3001_v43 = vadd.f32 %v3000_v42, %v8509_v35  ;;  %v7505_v35 = vld [vmem:[#allocation7 + $0x204] ss:$16 sps:$4 sm:$0xff]   ;;  %v7515_v42 = vld [vmem:[#allocation7 + $0x240] ss:$16 sps:$4 sm:$0xff]  }
 0x464   :  { %3933 = vmatprep.subr.bf16.mxu0 %v7505_v35  ;;  %v7535_v35 = vld [vmem:[#allocation7 + $0x2a4] ss:$16 sps:$4 sm:$0xff]  }
 0x465   :  { %3062 = vperm.xlu1 %6877, %v3001_v43   ;;  %3006 = vperm.xlu0 %6876, %v3001_v43   ;;  %v7518_v43 = vld [vmem:[#allocation7 + $0x248] ss:$16 sps:$4 sm:$0xff]  }
 0x469   :  { %6878 = vset.pattern.permute.xlu0 %v8076_v39  ;;  %v3002_v39 = vld [vmem:[%s8626_s9] sm:$0xf] }
 0x46a   :  { %v3038_v5 = vrot.slane %v3002_v39, %v8281_v61  ;;  %v3042_v6 = vrot.slane %v3002_v39, %v8289_v63  ;;  %v3046_v8 = vrot.slane %v3002_v39, %v8298_v7  ;;  %v3050_v9 = vrot.slane %v3002_v39, %v8301_v0  ;;  %v7544_v39 = vld [vmem:[#allocation7 + $0x2cc] ss:$16 sps:$4 sm:$0xff]  }
 0x4e4   :  { %v3063_v4 = vpop.permute.xlu1 %3062  ;;  %v3007_v10 = vpop.permute.xlu0 %3006 }
 0x4e5   :  { %v3088_v11 = vmul.f32 %v3077_v55, %v3063_v4  ;;  %v3030_v12 = vmul.f32 %v3013_v56, %v3007_v10  ;;  %v3031_v13 = vmul.f32 %v3017_v57, %v3007_v10  ;;  %v3032_v15 = vmul.f32 %v3021_v58, %v3007_v10  ;;  %v7541_v55 = vld [vmem:[#allocation7 + $0x2c4] ss:$16 sps:$4 sm:$0xff]   ;;  %v7539_v56 = vld [vmem:[#allocation7 + $0x2c0] ss:$16 sps:$4 sm:$0xff]   ;;  %v7542_v57 = vld [vmem:[#allocation7 + $0x2c8] ss:$16 sps:$4 sm:$0xff]  }
 0x4e6   :  { %v3033_v17 = vmul.f32 %v3025_v59, %v3007_v10  ;;  %v3086_v18 = vmul.f32 %v3069_v1, %v3063_v4  ;;  %v3087_v19 = vmul.f32 %v3073_v2, %v3063_v4  ;;  %v3089_v20 = vmul.f32 %v3081_v3, %v3063_v4  ;;  %v7547_v58 = vld [vmem:[#allocation7 + $0x2e4] ss:$16 sps:$4 sm:$0xff]   ;;  %v7550_v59 = vld [vmem:[#allocation7 + $0x2ec] ss:$16 sps:$4 sm:$0xff]   ;;  %v7545_v1 = vld [vmem:[#allocation7 + $0x2e0] ss:$16 sps:$4 sm:$0xff]  }
 0x4e7   :  { %v3055_v21 = vadd.f32 %v3038_v5, %v3030_v12  ;;  %v3056_v14 = vadd.f32 %v3042_v6, %v3031_v13  ;;  %v3057_v16 = vadd.f32 %v3046_v8, %v3032_v15  ;;  %v7548_v2 = vld [vmem:[#allocation7 + $0x2e8] ss:$16 sps:$4 sm:$0xff]   ;;  %v7553_v3 = vld [vmem:[#allocation7 + $0x304] ss:$16 sps:$4 sm:$0xff]   ;;  %v7556_v4 = vld [vmem:[#allocation7 + $0x30c] ss:$16 sps:$4 sm:$0xff]  }
 0x4e8   :  { %v3058_v22 = vadd.f32 %v3050_v9, %v3033_v17  ;;  %v7551_v5 = vld [vmem:[#allocation7 + $0x300] ss:$16 sps:$4 sm:$0xff]   ;;  %v7554_v6 = vld [vmem:[#allocation7 + $0x308] ss:$16 sps:$4 sm:$0xff]   ;;  %v7559_v8 = vld [vmem:[#allocation7 + $0x324] ss:$16 sps:$4 sm:$0xff]  }
 0x4e9   :  { %v3090_v23 = vadd.f32 %v3086_v18, %v3055_v21  ;;  %v8543_v24 = vadd.f32 %v3088_v11, %v3057_v16  ;;  %v3091_v25 = vadd.f32 %v3087_v19, %v3056_v14  ;;  %v7562_v9 = vld [vmem:[#allocation7 + $0x32c] ss:$16 sps:$4 sm:$0xff]   ;;  %v7557_v10 = vld [vmem:[#allocation7 + $0x320] ss:$16 sps:$4 sm:$0xff]   ;;  %v7560_v11 = vld [vmem:[#allocation7 + $0x328] ss:$16 sps:$4 sm:$0xff]  }
 0x4ea   :  { %v3093_v62 = vadd.f32 %v3089_v20, %v3058_v22  ;;  %v7565_v12 = vld [vmem:[#allocation7 + $0x344] ss:$16 sps:$4 sm:$0xff]   ;;  %v7568_v13 = vld [vmem:[#allocation7 + $0x34c] ss:$16 sps:$4 sm:$0xff]   ;;  %v7563_v15 = vld [vmem:[#allocation7 + $0x340] ss:$16 sps:$4 sm:$0xff]  }
 0x4eb   :  { %v3095_v26 = vmax.f32 %v3091_v25, 0.0  ;;  %v3094_v27 = vmax.f32 %v3090_v23, 0.0  ;;  %v7566_v17 = vld [vmem:[#allocation7 + $0x348] ss:$16 sps:$4 sm:$0xff]   ;;  %v7571_v18 = vld [vmem:[#allocation7 + $0x364] ss:$16 sps:$4 sm:$0xff]  }
 0x4ec   :  { %v3097_v28 = vmax.f32 %v3093_v62, 0.0  ;;  %v7574_v19 = vld [vmem:[#allocation7 + $0x36c] ss:$16 sps:$4 sm:$0xff]   ;;  %v7569_v20 = vld [vmem:[#allocation7 + $0x360] ss:$16 sps:$4 sm:$0xff]  }
 0x4ed   :  { %v3099_v29 = vpack.c.bf16 %v3095_v26, %v3095_v26  ;;  %v3098_v32 = vpack.c.bf16 %v3094_v27, %v3094_v27  ;;  %v7572_v21 = vld [vmem:[#allocation7 + $0x368] ss:$16 sps:$4 sm:$0xff]   ;;  %v7577_v14 = vld [vmem:[#allocation7 + $0x384] ss:$16 sps:$4 sm:$0xff]   ;;  %v7580_v16 = vld [vmem:[#allocation7 + $0x38c] ss:$16 sps:$4 sm:$0xff]  }
 0x4ee   :  { %v3101_v34 = vpack.c.bf16 %v3097_v28, %v3097_v28  ;;  %v7575_v22 = vld [vmem:[#allocation7 + $0x380] ss:$16 sps:$4 sm:$0xff]   ;;  %v7578_v23 = vld [vmem:[#allocation7 + $0x388] ss:$16 sps:$4 sm:$0xff]   ;;  %v7583_v25 = vld [vmem:[#allocation7 + $0x3a4] ss:$16 sps:$4 sm:$0xff]  }
 0x4ef   :  { %3924 = vmatprep.mubr.bf16.mxu0 %v3099_v29  ;;  %4006 = vmatprep.mubr.bf16.mxu1 %v3099_v29  ;;  %v7586_v62 = vld [vmem:[#allocation7 + $0x3ac] ss:$16 sps:$4 sm:$0xff]   ;;  %v7581_v26 = vld [vmem:[#allocation7 + $0x3a0] ss:$16 sps:$4 sm:$0xff]   ;;  %v7584_v27 = vld [vmem:[#allocation7 + $0x3a8] ss:$16 sps:$4 sm:$0xff]  }
 0x4f0   :  { %3925 = vmatmul.mubr.bf16.vlgmr.msra.gmra.mrb[12].mxu0 %v3098_v32  ;;  %4007 = vmatmul.mubr.bf16.vlgmr.msra.gmra.mrb[16].mxu1 %v3098_v32  ;;  %v7589_v28 = vld [vmem:[#allocation7 + $0x3c4] ss:$16 sps:$4 sm:$0xff]   ;;  %v7592_v29 = vld [vmem:[#allocation7 + $0x3cc] ss:$16 sps:$4 sm:$0xff]  }
 0x4f1   :  { %3934 = vmatpush1.bf16.msra.mxu0 %v7503_v30  ;;  %4016 = vmatpush1.bf16.msra.mxu1 %v7506_v31  ;;  %v7587_v30 = vld [vmem:[#allocation7 + $0x3c0] ss:$16 sps:$4 sm:$0xff]   ;;  %v7590_v31 = vld [vmem:[#allocation7 + $0x3c8] ss:$16 sps:$4 sm:$0xff]   ;;  %v7595_v32 = vld [vmem:[#allocation7 + $0x3e4] ss:$16 sps:$4 sm:$0xff]  }
 0x4f2   :  { %3965 = vmatprep.mubr.bf16.mxu0 %v3101_v34  ;;  %4047 = vmatprep.mubr.bf16.mxu1 %v3101_v34  ;;  %v7596_v34 = vld [vmem:[#allocation7 + $0x3e8] ss:$16 sps:$4 sm:$0xff]  }
 0x4f3   :  { %3935 = vmatprep.subr.bf16.mxu0 %v7511_v33  ;;  %4017 = vmatprep.subr.bf16.mxu1 %v7514_v36  ;;  %v7598_v33 = vld [vmem:[#allocation7 + $0x3ec] ss:$16 sps:$4 sm:$0xff]   ;;  %v7593_v36 = vld [vmem:[#allocation7 + $0x3e0] ss:$16 sps:$4 sm:$0xff]  }
 0x4f5   :  { %3936 = vmatpush1.bf16.msra.mxu0 %v7509_v37  ;;  %4018 = vmatpush1.bf16.msra.mxu1 %v7512_v38  ;;  %v3096_v37 = vmax.f32 %v8543_v24, 0.0  ;;  %v7601_v38 = vld [vmem:[#allocation8 + $0x4] ss:$28 sps:$4 sm:$0xff]   ;;  %v7613_v24 = vld [vmem:[#allocation8 + $0x74] ss:$28 sps:$4 sm:$0xff]  }
 0x4f6   :  { %3937 = vmatprep.subr.bf16.mxu0 %v7517_v40  ;;  %4019 = vmatprep.subr.bf16.mxu1 %v7520_v41  ;;  %v7604_v40 = vld [vmem:[#allocation8 + $0xc] ss:$28 sps:$4 sm:$0xff]   ;;  %v7599_v41 = vld [vmem:[#allocation8] ss:$28 sps:$4 sm:$0xff]  }
 0x4f9   :  { %3938 = vmatpush1.bf16.msra.mxu0 %v7515_v42  ;;  %4020 = vmatpush1.bf16.msra.mxu1 %v7518_v43  ;;  %v7602_v42 = vld [vmem:[#allocation8 + $0x8] ss:$28 sps:$4 sm:$0xff]   ;;  %v3100_v43 = vpack.c.bf16 %v3096_v37, %v3096_v37  ;;  %v7688_v37 = vld [vmem:[#allocation8 + $0x31c] ss:$28 sps:$4 sm:$0xff]  }
 0x4fa   :  { %3939 = vmatprep.subr.bf16.mxu0 %v7523_v44  ;;  %4021 = vmatprep.subr.bf16.mxu1 %v7526_v45  ;;  %v7607_v44 = vld [vmem:[#allocation8 + $0x3c] ss:$28 sps:$4 sm:$0xff]   ;;  %v7610_v45 = vld [vmem:[#allocation8 + $0x44] ss:$28 sps:$4 sm:$0xff]  }
 0x4fd   :  { %3940 = vmatpush1.bf16.msra.mxu0 %v7521_v46  ;;  %4022 = vmatpush1.bf16.msra.mxu1 %v7524_v47  ;;  %v7605_v46 = vld [vmem:[#allocation8 + $0x38] ss:$28 sps:$4 sm:$0xff]   ;;  %v7608_v47 = vld [vmem:[#allocation8 + $0x40] ss:$28 sps:$4 sm:$0xff]  }
 0x4fe   :  { %3941 = vmatprep.subr.bf16.mxu0 %v7529_v48  ;;  %4023 = vmatprep.subr.bf16.mxu1 %v7532_v49  ;;  %v7616_v48 = vld [vmem:[#allocation8 + $0x7c] ss:$28 sps:$4 sm:$0xff]   ;;  %v7611_v49 = vld [vmem:[#allocation8 + $0x70] ss:$28 sps:$4 sm:$0xff]  }
 0x501   :  { %3942 = vmatpush1.bf16.msra.mxu0 %v7527_v50  ;;  %4024 = vmatpush1.bf16.msra.mxu1 %v7530_v51  ;;  %v7614_v50 = vld [vmem:[#allocation8 + $0x78] ss:$28 sps:$4 sm:$0xff]   ;;  %v7619_v51 = vld [vmem:[#allocation8 + $0xac] ss:$28 sps:$4 sm:$0xff]  }
 0x502   :  { %3943 = vmatprep.subr.bf16.mxu0 %v7535_v35  ;;  %4025 = vmatprep.subr.bf16.mxu1 %v7538_v52  ;;  %v7622_v35 = vld [vmem:[#allocation8 + $0xb4] ss:$28 sps:$4 sm:$0xff]   ;;  %v7617_v52 = vld [vmem:[#allocation8 + $0xa8] ss:$28 sps:$4 sm:$0xff]  }
 0x505   :  { %3944 = vmatpush1.bf16.msra.mxu0 %v7533_v53  ;;  %4026 = vmatpush1.bf16.msra.mxu1 %v7536_v54  ;;  %v7620_v53 = vld [vmem:[#allocation8 + $0xb0] ss:$28 sps:$4 sm:$0xff]   ;;  %v7625_v54 = vld [vmem:[#allocation8 + $0xe4] ss:$28 sps:$4 sm:$0xff]  }
 0x506   :  { %3945 = vmatprep.subr.bf16.mxu0 %v7541_v55  ;;  %4027 = vmatprep.subr.bf16.mxu1 %v7544_v39  ;;  %v7628_v55 = vld [vmem:[#allocation8 + $0xec] ss:$28 sps:$4 sm:$0xff]   ;;  %v7623_v39 = vld [vmem:[#allocation8 + $0xe0] ss:$28 sps:$4 sm:$0xff]  }
 0x509   :  { %3946 = vmatpush1.bf16.msra.mxu0 %v7539_v56  ;;  %4028 = vmatpush1.bf16.msra.mxu1 %v7542_v57  ;;  %v7626_v56 = vld [vmem:[#allocation8 + $0xe8] ss:$28 sps:$4 sm:$0xff]   ;;  %v7631_v57 = vld [vmem:[#allocation8 + $0x11c] ss:$28 sps:$4 sm:$0xff]  }
 0x50a   :  { %3947 = vmatprep.subr.bf16.mxu0 %v7547_v58  ;;  %4029 = vmatprep.subr.bf16.mxu1 %v7550_v59  ;;  %v7634_v58 = vld [vmem:[#allocation8 + $0x124] ss:$28 sps:$4 sm:$0xff]   ;;  %v7629_v59 = vld [vmem:[#allocation8 + $0x118] ss:$28 sps:$4 sm:$0xff]  }
 0x50d   :  { %3948 = vmatpush1.bf16.msra.mxu0 %v7545_v1  ;;  %4030 = vmatpush1.bf16.msra.mxu1 %v7548_v2  ;;  %v7632_v1 = vld [vmem:[#allocation8 + $0x120] ss:$28 sps:$4 sm:$0xff]   ;;  %v7637_v2 = vld [vmem:[#allocation8 + $0x154] ss:$28 sps:$4 sm:$0xff]  }
 0x50e   :  { %3949 = vmatprep.subr.bf16.mxu0 %v7553_v3  ;;  %4031 = vmatprep.subr.bf16.mxu1 %v7556_v4  ;;  %v7640_v3 = vld [vmem:[#allocation8 + $0x15c] ss:$28 sps:$4 sm:$0xff]   ;;  %v7635_v4 = vld [vmem:[#allocation8 + $0x150] ss:$28 sps:$4 sm:$0xff]  }
 0x511   :  { %3950 = vmatpush1.bf16.msra.mxu0 %v7551_v5  ;;  %4032 = vmatpush1.bf16.msra.mxu1 %v7554_v6  ;;  %v7638_v5 = vld [vmem:[#allocation8 + $0x158] ss:$28 sps:$4 sm:$0xff]   ;;  %v7643_v6 = vld [vmem:[#allocation8 + $0x18c] ss:$28 sps:$4 sm:$0xff]  }
 0x512   :  { %3951 = vmatprep.subr.bf16.mxu0 %v7559_v8  ;;  %4033 = vmatprep.subr.bf16.mxu1 %v7562_v9  ;;  %v7646_v8 = vld [vmem:[#allocation8 + $0x194] ss:$28 sps:$4 sm:$0xff]   ;;  %v7641_v9 = vld [vmem:[#allocation8 + $0x188] ss:$28 sps:$4 sm:$0xff]  }
 0x515   :  { %3952 = vmatpush1.bf16.msra.mxu0 %v7557_v10  ;;  %4034 = vmatpush1.bf16.msra.mxu1 %v7560_v11  ;;  %v7644_v10 = vld [vmem:[#allocation8 + $0x190] ss:$28 sps:$4 sm:$0xff]   ;;  %v7649_v11 = vld [vmem:[#allocation8 + $0x1c4] ss:$28 sps:$4 sm:$0xff]  }
 0x516   :  { %3953 = vmatprep.subr.bf16.mxu0 %v7565_v12  ;;  %4035 = vmatprep.subr.bf16.mxu1 %v7568_v13  ;;  %v7652_v12 = vld [vmem:[#allocation8 + $0x1cc] ss:$28 sps:$4 sm:$0xff]   ;;  %v7647_v13 = vld [vmem:[#allocation8 + $0x1c0] ss:$28 sps:$4 sm:$0xff]  }
 0x519   :  { %3954 = vmatpush1.bf16.msra.mxu0 %v7563_v15  ;;  %4036 = vmatpush1.bf16.msra.mxu1 %v7566_v17  ;;  %v7650_v15 = vld [vmem:[#allocation8 + $0x1c8] ss:$28 sps:$4 sm:$0xff]   ;;  %v7655_v17 = vld [vmem:[#allocation8 + $0x1fc] ss:$28 sps:$4 sm:$0xff]  }
 0x51a   :  { %3955 = vmatprep.subr.bf16.mxu0 %v7571_v18  ;;  %4037 = vmatprep.subr.bf16.mxu1 %v7574_v19  ;;  %v7658_v18 = vld [vmem:[#allocation8 + $0x204] ss:$28 sps:$4 sm:$0xff]   ;;  %v7653_v19 = vld [vmem:[#allocation8 + $0x1f8] ss:$28 sps:$4 sm:$0xff]  }
 0x51d   :  { %3956 = vmatpush1.bf16.msra.mxu0 %v7569_v20  ;;  %4038 = vmatpush1.bf16.msra.mxu1 %v7572_v21  ;;  %v7656_v20 = vld [vmem:[#allocation8 + $0x200] ss:$28 sps:$4 sm:$0xff]   ;;  %v7661_v21 = vld [vmem:[#allocation8 + $0x234] ss:$28 sps:$4 sm:$0xff]  }
 0x51e   :  { %3957 = vmatprep.subr.bf16.mxu0 %v7577_v14  ;;  %4039 = vmatprep.subr.bf16.mxu1 %v7580_v16  ;;  %v7664_v14 = vld [vmem:[#allocation8 + $0x23c] ss:$28 sps:$4 sm:$0xff]   ;;  %v7659_v16 = vld [vmem:[#allocation8 + $0x230] ss:$28 sps:$4 sm:$0xff]  }
 0x521   :  { %3958 = vmatpush1.bf16.msra.mxu0 %v7575_v22  ;;  %4040 = vmatpush1.bf16.msra.mxu1 %v7578_v23  ;;  %v7662_v22 = vld [vmem:[#allocation8 + $0x238] ss:$28 sps:$4 sm:$0xff]   ;;  %v7667_v23 = vld [vmem:[#allocation8 + $0x26c] ss:$28 sps:$4 sm:$0xff]  }
 0x522   :  { %3959 = vmatprep.subr.bf16.mxu0 %v7583_v25  ;;  %4041 = vmatprep.subr.bf16.mxu1 %v7586_v62  ;;  %v7670_v25 = vld [vmem:[#allocation8 + $0x274] ss:$28 sps:$4 sm:$0xff]   ;;  %v7665_v62 = vld [vmem:[#allocation8 + $0x268] ss:$28 sps:$4 sm:$0xff]  }
 0x525   :  { %3960 = vmatpush1.bf16.msra.mxu0 %v7581_v26  ;;  %4042 = vmatpush1.bf16.msra.mxu1 %v7584_v27  ;;  %v7668_v26 = vld [vmem:[#allocation8 + $0x270] ss:$28 sps:$4 sm:$0xff]   ;;  %v7673_v27 = vld [vmem:[#allocation8 + $0x2a4] ss:$28 sps:$4 sm:$0xff]  }
 0x526   :  { %3961 = vmatprep.subr.bf16.mxu0 %v7589_v28  ;;  %4043 = vmatprep.subr.bf16.mxu1 %v7592_v29  ;;  %v7676_v28 = vld [vmem:[#allocation8 + $0x2ac] ss:$28 sps:$4 sm:$0xff]   ;;  %v7671_v29 = vld [vmem:[#allocation8 + $0x2a0] ss:$28 sps:$4 sm:$0xff]  }
 0x529   :  { %3962 = vmatpush1.bf16.msra.mxu0 %v7587_v30  ;;  %4044 = vmatpush1.bf16.msra.mxu1 %v7590_v31  ;;  %v7674_v30 = vld [vmem:[#allocation8 + $0x2a8] ss:$28 sps:$4 sm:$0xff]   ;;  %v7679_v31 = vld [vmem:[#allocation8 + $0x2dc] ss:$28 sps:$4 sm:$0xff]  }
 0x52a   :  { %3963 = vmatprep.subr.bf16.mxu0 %v7595_v32  ;;  %4045 = vmatprep.subr.bf16.mxu1 %v7598_v33  ;;  %v7682_v32 = vld [vmem:[#allocation8 + $0x2e4] ss:$28 sps:$4 sm:$0xff]   ;;  %v7677_v33 = vld [vmem:[#allocation8 + $0x2d8] ss:$28 sps:$4 sm:$0xff]  }
 0x52d   :  { %3964 = vmatpush1.bf16.msra.mxu0 %v7593_v36  ;;  %4046 = vmatpush1.bf16.msra.mxu1 %v7596_v34  ;;  %v7680_v36 = vld [vmem:[#allocation8 + $0x2e0] ss:$28 sps:$4 sm:$0xff]   ;;  %v7685_v34 = vld [vmem:[#allocation8 + $0x314] ss:$28 sps:$4 sm:$0xff]  }
 0x52e   :  { %5509 = vmatprep.subr.bf16.mxu0 %v7601_v38  ;;  %5591 = vmatprep.subr.bf16.mxu1 %v7604_v40  ;;  %v7683_v38 = vld [vmem:[#allocation8 + $0x310] ss:$28 sps:$4 sm:$0xff]   ;;  %v7686_v40 = vld [vmem:[#allocation8 + $0x318] ss:$28 sps:$4 sm:$0xff]  }
 0x530   :  { %3966 = vmatmul.mubr.bf16.vlgmr.msra.gmra.mrb[12].mxu0 %v3100_v43  ;;  %4048 = vmatmul.mubr.bf16.vlgmr.msra.gmra.mrb[16].mxu1 %v3100_v43  ;;  %v7689_v43 = vld [vmem:[#allocation8 + $0x348] ss:$28 sps:$4 sm:$0xff]  }
 0x531   :  { %5510 = vmatpush1.bf16.msra.mxu0 %v7599_v41  ;;  %5592 = vmatpush1.bf16.msra.mxu1 %v7602_v42  ;;  %v7691_v41 = vld [vmem:[#allocation8 + $0x34c] ss:$28 sps:$4 sm:$0xff]   ;;  %v7694_v42 = vld [vmem:[#allocation8 + $0x354] ss:$28 sps:$4 sm:$0xff]  }
 0x532   :  { %5511 = vmatprep.subr.bf16.mxu0 %v7607_v44  ;;  %5593 = vmatprep.subr.bf16.mxu1 %v7610_v45  ;;  %v7692_v44 = vld [vmem:[#allocation8 + $0x350] ss:$28 sps:$4 sm:$0xff]   ;;  %v7697_v45 = vld [vmem:[#allocation8 + $0x384] ss:$28 sps:$4 sm:$0xff]  }
 0x535   :  { %5512 = vmatpush1.bf16.msra.mxu0 %v7605_v46  ;;  %5594 = vmatpush1.bf16.msra.mxu1 %v7608_v47  ;;  %v7700_v46 = vld [vmem:[#allocation8 + $0x38c] ss:$28 sps:$4 sm:$0xff]   ;;  %v8549_v47 = vld [vmem:[%s8628_s11] sm:$0xf] }
 0x536   :  { %5513 = vmatprep.subr.bf16.mxu0 %v7613_v24  ;;  %5595 = vmatprep.subr.bf16.mxu1 %v7616_v48  ;;  %v3235_v24 = vrot.slane %v8549_v47, %v8281_v61  ;;  %v3239_v48 = vrot.slane %v8549_v47, %v8289_v63 }
 0x539   :  { %5514 = vmatpush1.bf16.msra.mxu0 %v7611_v49  ;;  %5596 = vmatpush1.bf16.msra.mxu1 %v7614_v50  ;;  %v3247_v49 = vrot.slane %v8549_v47, %v8301_v0 }
 0x53a   :  { %5515 = vmatprep.subr.bf16.mxu0 %v7619_v51  ;;  %5597 = vmatprep.subr.bf16.mxu1 %v7622_v35 }
 0x53d   :  { %5516 = vmatpush1.bf16.msra.mxu0 %v7617_v52  ;;  %5598 = vmatpush1.bf16.msra.mxu1 %v7620_v53 }
 0x53e   :  { %5517 = vmatprep.subr.bf16.mxu0 %v7625_v54  ;;  %5599 = vmatprep.subr.bf16.mxu1 %v7628_v55 }
 0x541   :  { %5518 = vmatpush1.bf16.msra.mxu0 %v7623_v39  ;;  %5600 = vmatpush1.bf16.msra.mxu1 %v7626_v56 }
 0x542   :  { %5519 = vmatprep.subr.bf16.mxu0 %v7631_v57  ;;  %5601 = vmatprep.subr.bf16.mxu1 %v7634_v58 }
 0x545   :  { %5520 = vmatpush1.bf16.msra.mxu0 %v7629_v59  ;;  %5602 = vmatpush1.bf16.msra.mxu1 %v7632_v1 }
 0x546   :  { %5521 = vmatprep.subr.bf16.mxu0 %v7637_v2  ;;  %5603 = vmatprep.subr.bf16.mxu1 %v7640_v3 }
 0x549   :  { %5522 = vmatpush1.bf16.msra.mxu0 %v7635_v4  ;;  %5604 = vmatpush1.bf16.msra.mxu1 %v7638_v5  ;;  %v7695_v4 = vld [vmem:[#allocation8 + $0x380] ss:$28 sps:$4 sm:$0xff]   ;;  %v7698_v5 = vld [vmem:[#allocation8 + $0x388] ss:$28 sps:$4 sm:$0xff]  }
 0x54a   :  { %5523 = vmatprep.subr.bf16.mxu0 %v7643_v6  ;;  %5605 = vmatprep.subr.bf16.mxu1 %v7646_v8  ;;  %v7703_v8 = vld [vmem:[#allocation8 + $0x3bc] ss:$28 sps:$4 sm:$0xff]  }
 0x54d   :  { %5524 = vmatpush1.bf16.msra.mxu0 %v7641_v9  ;;  %5606 = vmatpush1.bf16.msra.mxu1 %v7644_v10  ;;  %v7706_v9 = vld [vmem:[#allocation8 + $0x3c4] ss:$28 sps:$4 sm:$0xff]  }
 0x54e   :  { %5525 = vmatprep.subr.bf16.mxu0 %v7649_v11  ;;  %5607 = vmatprep.subr.bf16.mxu1 %v7652_v12  ;;  %v7701_v11 = vld [vmem:[#allocation8 + $0x3b8] ss:$28 sps:$4 sm:$0xff]   ;;  %v7704_v12 = vld [vmem:[#allocation8 + $0x3c0] ss:$28 sps:$4 sm:$0xff]  }
 0x551   :  { %5526 = vmatpush1.bf16.msra.mxu0 %v7647_v13  ;;  %5608 = vmatpush1.bf16.msra.mxu1 %v7650_v15  ;;  %v7709_v13 = vld [vmem:[#allocation8 + $0x3f4] ss:$28 sps:$4 sm:$0xff]   ;;  %v7712_v15 = vld [vmem:[#allocation8 + $0x3fc] ss:$28 sps:$4 sm:$0xff]  }
 0x552   :  { %5527 = vmatprep.subr.bf16.mxu0 %v7655_v17  ;;  %5609 = vmatprep.subr.bf16.mxu1 %v7658_v18  ;;  %v7707_v17 = vld [vmem:[#allocation8 + $0x3f0] ss:$28 sps:$4 sm:$0xff]   ;;  %v7710_v18 = vld [vmem:[#allocation8 + $0x3f8] ss:$28 sps:$4 sm:$0xff]  }
 0x555   :  { %5528 = vmatpush1.bf16.msra.mxu0 %v7653_v19  ;;  %5610 = vmatpush1.bf16.msra.mxu1 %v7656_v20  ;;  %v7715_v19 = vld [vmem:[#allocation8 + $0x42c] ss:$28 sps:$4 sm:$0xff]   ;;  %v7718_v20 = vld [vmem:[#allocation8 + $0x434] ss:$28 sps:$4 sm:$0xff]  }
 0x556   :  { %5529 = vmatprep.subr.bf16.mxu0 %v7661_v21  ;;  %5611 = vmatprep.subr.bf16.mxu1 %v7664_v14  ;;  %v7713_v21 = vld [vmem:[#allocation8 + $0x428] ss:$28 sps:$4 sm:$0xff]   ;;  %v7716_v14 = vld [vmem:[#allocation8 + $0x430] ss:$28 sps:$4 sm:$0xff]  }
 0x559   :  { %5530 = vmatpush1.bf16.msra.mxu0 %v7659_v16  ;;  %5612 = vmatpush1.bf16.msra.mxu1 %v7662_v22  ;;  %v7721_v16 = vld [vmem:[#allocation8 + $0x464] ss:$28 sps:$4 sm:$0xff]   ;;  %v7724_v22 = vld [vmem:[#allocation8 + $0x46c] ss:$28 sps:$4 sm:$0xff]  }
 0x55a   :  { %5531 = vmatprep.subr.bf16.mxu0 %v7667_v23  ;;  %5613 = vmatprep.subr.bf16.mxu1 %v7670_v25  ;;  %v7719_v23 = vld [vmem:[#allocation8 + $0x460] ss:$28 sps:$4 sm:$0xff]   ;;  %v7722_v25 = vld [vmem:[#allocation8 + $0x468] ss:$28 sps:$4 sm:$0xff]  }
 0x55d   :  { %5532 = vmatpush1.bf16.msra.mxu0 %v7665_v62  ;;  %5614 = vmatpush1.bf16.msra.mxu1 %v7668_v26  ;;  %v7727_v62 = vld [vmem:[#allocation8 + $0x49c] ss:$28 sps:$4 sm:$0xff]   ;;  %v7730_v26 = vld [vmem:[#allocation8 + $0x4a4] ss:$28 sps:$4 sm:$0xff]  }
 0x55e   :  { %5533 = vmatprep.subr.bf16.mxu0 %v7673_v27  ;;  %5615 = vmatprep.subr.bf16.mxu1 %v7676_v28  ;;  %v7725_v27 = vld [vmem:[#allocation8 + $0x498] ss:$28 sps:$4 sm:$0xff]   ;;  %v7728_v28 = vld [vmem:[#allocation8 + $0x4a0] ss:$28 sps:$4 sm:$0xff]  }
 0x561   :  { %5534 = vmatpush1.bf16.msra.mxu0 %v7671_v29  ;;  %5616 = vmatpush1.bf16.msra.mxu1 %v7674_v30  ;;  %v7733_v29 = vld [vmem:[#allocation8 + $0x4d4] ss:$28 sps:$4 sm:$0xff]   ;;  %v7736_v30 = vld [vmem:[#allocation8 + $0x4dc] ss:$28 sps:$4 sm:$0xff]  }
 0x562   :  { %5535 = vmatprep.subr.bf16.mxu0 %v7679_v31  ;;  %5617 = vmatprep.subr.bf16.mxu1 %v7682_v32  ;;  %v7731_v31 = vld [vmem:[#allocation8 + $0x4d0] ss:$28 sps:$4 sm:$0xff]   ;;  %v7734_v32 = vld [vmem:[#allocation8 + $0x4d8] ss:$28 sps:$4 sm:$0xff]  }
 0x565   :  { %5536 = vmatpush1.bf16.msra.mxu0 %v7677_v33  ;;  %5618 = vmatpush1.bf16.msra.mxu1 %v7680_v36  ;;  %v7739_v33 = vld [vmem:[#allocation8 + $0x50c] ss:$28 sps:$4 sm:$0xff]   ;;  %v7742_v36 = vld [vmem:[#allocation8 + $0x514] ss:$28 sps:$4 sm:$0xff]  }
 0x566   :  { %5537 = vmatprep.subr.bf16.mxu0 %v7685_v34  ;;  %5619 = vmatprep.subr.bf16.mxu1 %v7688_v37  ;;  %v7737_v34 = vld [vmem:[#allocation8 + $0x508] ss:$28 sps:$4 sm:$0xff]   ;;  %v7740_v37 = vld [vmem:[#allocation8 + $0x510] ss:$28 sps:$4 sm:$0xff]  }
 0x569   :  { %5538 = vmatpush1.bf16.msra.mxu0 %v7683_v38  ;;  %5620 = vmatpush1.bf16.msra.mxu1 %v7686_v40  ;;  %v7745_v38 = vld [vmem:[#allocation8 + $0x544] ss:$28 sps:$4 sm:$0xff]   ;;  %v7748_v40 = vld [vmem:[#allocation8 + $0x54c] ss:$28 sps:$4 sm:$0xff]  }
 0x56a   :  { %5539 = vmatprep.subr.bf16.mxu0 %v7691_v41  ;;  %5621 = vmatprep.subr.bf16.mxu1 %v7694_v42  ;;  %v7743_v41 = vld [vmem:[#allocation8 + $0x540] ss:$28 sps:$4 sm:$0xff]   ;;  %v7746_v42 = vld [vmem:[#allocation8 + $0x548] ss:$28 sps:$4 sm:$0xff]  }
 0x56d   :  { %5540 = vmatpush1.bf16.msra.mxu0 %v7689_v43  ;;  %5622 = vmatpush1.bf16.msra.mxu1 %v7692_v44  ;;  %v7751_v43 = vld [vmem:[#allocation8 + $0x57c] ss:$28 sps:$4 sm:$0xff]   ;;  %v7754_v44 = vld [vmem:[#allocation8 + $0x584] ss:$28 sps:$4 sm:$0xff]  }
 0x56e   :  { %5550 = vmatprep.subr.bf16.mxu0 %v7697_v45  ;;  %5632 = vmatprep.subr.bf16.mxu1 %v7700_v46  ;;  %v7749_v45 = vld [vmem:[#allocation8 + $0x578] ss:$28 sps:$4 sm:$0xff]   ;;  %v7752_v46 = vld [vmem:[#allocation8 + $0x580] ss:$28 sps:$4 sm:$0xff]  }
 0x603   :  { %v3967_v50 = vpop.f32.mrb[12].mxu0  ;;  %v8557_v51 = vpop.f32.mrb[16].mxu1 }
 0x604   :  { %v6806_v35 = vadd.f32 %v3967_v50, %v3235_v24  ;;  %v3969_v52 = vpop.f32.mrb[13].mxu0  ;;  %v4051_v53 = vpop.f32.mrb[17].mxu1  ;;  %v7757_v24 = vld [vmem:[#allocation8 + $0x5b4] ss:$28 sps:$4 sm:$0xff]  }
 0x605   :  { %v6807_v54 = vadd.f32 %v3969_v52, %v3239_v48  ;;  %v6809_v55 = vadd.f32 %v4051_v53, %v3247_v49  ;;  %v3971_v39 = vpop.f32.mrb[14].mxu0  ;;  %v4053_v56 = vpop.f32.mrb[18].mxu1  ;;  %v7760_v48 = vld [vmem:[#allocation8 + $0x5bc] ss:$28 sps:$4 sm:$0xff]   ;;  %v7755_v49 = vld [vmem:[#allocation8 + $0x5b0] ss:$28 sps:$4 sm:$0xff]  }
 0x606   :  { %v4056_v57 = vmax.f32 %v6806_v35, 0.0  ;;  %v3972_v58 = vpop.f32.mrb[15].mxu0  ;;  %v4054_v59 = vpop.f32.mrb[19].mxu1  ;;  %v7758_v50 = vld [vmem:[#allocation8 + $0x5b8] ss:$28 sps:$4 sm:$0xff]  }
 0x607   :  { %v4057_v1 = vmax.f32 %v6807_v54, 0.0  ;;  %v4059_v2 = vmax.f32 %v6809_v55, 0.0  ;;  %v7763_v35 = vld [vmem:[#allocation8 + $0x5ec] ss:$28 sps:$4 sm:$0xff]   ;;  %v7766_v52 = vld [vmem:[#allocation8 + $0x5f4] ss:$28 sps:$4 sm:$0xff]  }
 0x608   :  { %v8561_v6 = vpack.c.bf16 %v4056_v57, %v4056_v57  ;;  %v7761_v53 = vld [vmem:[#allocation8 + $0x5e8] ss:$28 sps:$4 sm:$0xff]   ;;  %v7764_v54 = vld [vmem:[#allocation8 + $0x5f0] ss:$28 sps:$4 sm:$0xff]   ;;  %v7767_v56 = vld [vmem:[#allocation8 + $0x620] ss:$28 sps:$4 sm:$0xff]  }
 0x609   :  { %v8559_v3 = vpack.c.bf16 %v4057_v1, %v4057_v1  ;;  %v8565_v10 = vpack.c.bf16 %v4059_v2, %v4059_v2  ;;  %v7769_v55 = vld [vmem:[#allocation8 + $0x624] ss:$28 sps:$4 sm:$0xff]   ;;  %v7772_v39 = vld [vmem:[#allocation8 + $0x62c] ss:$28 sps:$4 sm:$0xff]   ;;  %v7775_v58 = vld [vmem:[#allocation8 + $0x65c] ss:$28 sps:$4 sm:$0xff]  }
 0x60a   :  { %v7770_v57 = vld [vmem:[#allocation8 + $0x628] ss:$28 sps:$4 sm:$0xff]   ;;  %v7773_v1 = vld [vmem:[#allocation8 + $0x658] ss:$28 sps:$4 sm:$0xff]   ;;  %v7776_v2 = vld [vmem:[#allocation8 + $0x660] ss:$28 sps:$4 sm:$0xff]  }
 0x60b   :  { %5541 = vmatprep.mubr.bf16.mxu0 %v8559_v3  ;;  %5623 = vmatprep.mubr.bf16.mxu1 %v8559_v3  ;;  %v7778_v59 = vld [vmem:[#allocation8 + $0x664] ss:$28 sps:$4 sm:$0xff]  }
 0x60c   :  { %5542 = vmatmul.mubr.bf16.vlgmr.msra.gmra.mrb[16].mxu0 %v8561_v6  ;;  %5624 = vmatmul.mubr.bf16.vlgmr.msra.gmra.mrb[20].mxu1 %v8561_v6 }
 0x60d   :  { %5551 = vmatpush1.bf16.msra.mxu0 %v7695_v4  ;;  %5633 = vmatpush1.bf16.msra.mxu1 %v7698_v5  ;;  %v3243_v4 = vrot.slane %v8549_v47, %v8298_v7  ;;  %v7781_v5 = vld [vmem:[#allocation8 + $0x694] ss:$28 sps:$4 sm:$0xff]  }
 0x60e   :  { %5582 = vmatprep.mubr.bf16.mxu0 %v8565_v10  ;;  %5664 = vmatprep.mubr.bf16.mxu1 %v8565_v10  ;;  %v7793_v47 = vld [vmem:[#allocation8 + $0x14] ss:$28 sps:$4 sm:$0xff]  }
 0x60f   :  { %5552 = vmatprep.subr.bf16.mxu0 %v7703_v8  ;;  %5634 = vmatprep.subr.bf16.mxu1 %v7706_v9  ;;  %v7784_v8 = vld [vmem:[#allocation8 + $0x69c] ss:$28 sps:$4 sm:$0xff]   ;;  %v7779_v9 = vld [vmem:[#allocation8 + $0x690] ss:$28 sps:$4 sm:$0xff]  }
 0x611   :  { %5553 = vmatpush1.bf16.msra.mxu0 %v7701_v11  ;;  %5635 = vmatpush1.bf16.msra.mxu1 %v7704_v12  ;;  %v7782_v11 = vld [vmem:[#allocation8 + $0x698] ss:$28 sps:$4 sm:$0xff]   ;;  %v6808_v12 = vadd.f32 %v8557_v51, %v3243_v4  ;;  %v7849_v4 = vld [vmem:[#allocation8 + $0x600] ss:$28 sps:$4 sm:$0xff]  }
 0x612   :  { %5554 = vmatprep.subr.bf16.mxu0 %v7709_v13  ;;  %5636 = vmatprep.subr.bf16.mxu1 %v7712_v15  ;;  %v7787_v13 = vld [vmem:[#allocation8 + $0x6cc] ss:$28 sps:$4 sm:$0xff]   ;;  %v7790_v15 = vld [vmem:[#allocation8 + $0x6d4] ss:$28 sps:$4 sm:$0xff]  }
 0x613   :  { %v7795_v51 = vld [vmem:[#allocation8 + $0x18] ss:$28 sps:$4 sm:$0xff]  }
 0x615   :  { %5555 = vmatpush1.bf16.msra.mxu0 %v7707_v17  ;;  %5637 = vmatpush1.bf16.msra.mxu1 %v7710_v18  ;;  %v7785_v17 = vld [vmem:[#allocation8 + $0x6c8] ss:$28 sps:$4 sm:$0xff]   ;;  %v7788_v18 = vld [vmem:[#allocation8 + $0x6d0] ss:$28 sps:$4 sm:$0xff]  }
 0x616   :  { %5556 = vmatprep.subr.bf16.mxu0 %v7715_v19  ;;  %5638 = vmatprep.subr.bf16.mxu1 %v7718_v20  ;;  %v4058_v19 = vmax.f32 %v6808_v12, 0.0  ;;  %v7794_v20 = vld [vmem:[#allocation8 + $0x1d8] ss:$28 sps:$4 sm:$0xff]   ;;  %v7851_v12 = vld [vmem:[#allocation8 + $0x2b0] ss:$28 sps:$4 sm:$0xff]  }
 0x619   :  { %5557 = vmatpush1.bf16.msra.mxu0 %v7713_v21  ;;  %5639 = vmatpush1.bf16.msra.mxu1 %v7716_v14  ;;  %v7791_v21 = vld [vmem:[#allocation8 + $0x10] ss:$28 sps:$4 sm:$0xff]   ;;  %v8574_v14 = vpack.c.bf16 %v4058_v19, %v4058_v19 }
 0x61a   :  { %5558 = vmatprep.subr.bf16.mxu0 %v7721_v16  ;;  %5640 = vmatprep.subr.bf16.mxu1 %v7724_v22  ;;  %v7798_v16 = vld [vmem:[#allocation8 + $0x4c] ss:$28 sps:$4 sm:$0xff]  }
 0x61b   :  { %v7799_v22 = vld [vmem:[#allocation8 + $0x210] ss:$28 sps:$4 sm:$0xff]  }
 0x61c   :  { %v7860_v19 = vld [vmem:[#allocation8 + $0x4b0] ss:$28 sps:$4 sm:$0xff]  }
 0x61d   :  { %5559 = vmatpush1.bf16.msra.mxu0 %v7719_v23  ;;  %5641 = vmatpush1.bf16.msra.mxu1 %v7722_v25  ;;  %v7796_v23 = vld [vmem:[#allocation8 + $0x48] ss:$28 sps:$4 sm:$0xff]   ;;  %v7800_v25 = vld [vmem:[#allocation8 + $0x50] ss:$28 sps:$4 sm:$0xff]  }
 0x61e   :  { %5560 = vmatprep.subr.bf16.mxu0 %v7727_v62  ;;  %5642 = vmatprep.subr.bf16.mxu1 %v7730_v26  ;;  %v7803_v62 = vld [vmem:[#allocation8 + $0x84] ss:$28 sps:$4 sm:$0xff]  }
 0x61f   :  { %v7804_v26 = vld [vmem:[#allocation8 + $0x248] ss:$28 sps:$4 sm:$0xff]  }
 0x621   :  { %5561 = vmatpush1.bf16.msra.mxu0 %v7725_v27  ;;  %5643 = vmatpush1.bf16.msra.mxu1 %v7728_v28  ;;  %v7801_v27 = vld [vmem:[#allocation8 + $0x80] ss:$28 sps:$4 sm:$0xff]   ;;  %v7805_v28 = vld [vmem:[#allocation8 + $0x88] ss:$28 sps:$4 sm:$0xff]  }
 0x622   :  { %5562 = vmatprep.subr.bf16.mxu0 %v7733_v29  ;;  %5644 = vmatprep.subr.bf16.mxu1 %v7736_v30  ;;  %v7808_v29 = vld [vmem:[#allocation8 + $0xbc] ss:$28 sps:$4 sm:$0xff]  }
 0x623   :  { %v7809_v30 = vld [vmem:[#allocation8 + $0x280] ss:$28 sps:$4 sm:$0xff]  }
 0x625   :  { %5563 = vmatpush1.bf16.msra.mxu0 %v7731_v31  ;;  %5645 = vmatpush1.bf16.msra.mxu1 %v7734_v32  ;;  %v7806_v31 = vld [vmem:[#allocation8 + $0xb8] ss:$28 sps:$4 sm:$0xff]   ;;  %v7810_v32 = vld [vmem:[#allocation8 + $0xc0] ss:$28 sps:$4 sm:$0xff]  }
 0x626   :  { %5564 = vmatprep.subr.bf16.mxu0 %v7739_v33  ;;  %5646 = vmatprep.subr.bf16.mxu1 %v7742_v36  ;;  %v7813_v33 = vld [vmem:[#allocation8 + $0xf4] ss:$28 sps:$4 sm:$0xff]  }
 0x627   :  { %v7811_v36 = vld [vmem:[#allocation8 + $0xf0] ss:$28 sps:$4 sm:$0xff]  }
 0x629   :  { %5565 = vmatpush1.bf16.msra.mxu0 %v7737_v34  ;;  %5647 = vmatpush1.bf16.msra.mxu1 %v7740_v37  ;;  %v7815_v34 = vld [vmem:[#allocation8 + $0xf8] ss:$28 sps:$4 sm:$0xff]   ;;  %v7818_v37 = vld [vmem:[#allocation8 + $0x12c] ss:$28 sps:$4 sm:$0xff]  }
 0x62a   :  { %5566 = vmatprep.subr.bf16.mxu0 %v7745_v38  ;;  %5648 = vmatprep.subr.bf16.mxu1 %v7748_v40  ;;  %v7819_v38 = vld [vmem:[#allocation8 + $0x2f0] ss:$28 sps:$4 sm:$0xff]   ;;  %v7816_v40 = vld [vmem:[#allocation8 + $0x128] ss:$28 sps:$4 sm:$0xff]  }
 0x62d   :  { %5567 = vmatpush1.bf16.msra.mxu0 %v7743_v41  ;;  %5649 = vmatpush1.bf16.msra.mxu1 %v7746_v42  ;;  %v7820_v41 = vld [vmem:[#allocation8 + $0x130] ss:$28 sps:$4 sm:$0xff]   ;;  %v7823_v42 = vld [vmem:[#allocation8 + $0x164] ss:$28 sps:$4 sm:$0xff]  }
 0x62e   :  { %5568 = vmatprep.subr.bf16.mxu0 %v7751_v43  ;;  %5650 = vmatprep.subr.bf16.mxu1 %v7754_v44  ;;  %v7824_v43 = vld [vmem:[#allocation8 + $0x328] ss:$28 sps:$4 sm:$0xff]   ;;  %v7821_v44 = vld [vmem:[#allocation8 + $0x160] ss:$28 sps:$4 sm:$0xff]  }
 0x631   :  { %5569 = vmatpush1.bf16.msra.mxu0 %v7749_v45  ;;  %5651 = vmatpush1.bf16.msra.mxu1 %v7752_v46  ;;  %v7825_v45 = vld [vmem:[#allocation8 + $0x168] ss:$28 sps:$4 sm:$0xff]   ;;  %v7828_v46 = vld [vmem:[#allocation8 + $0x19c] ss:$28 sps:$4 sm:$0xff]  }
 0x632   :  { %5570 = vmatprep.subr.bf16.mxu0 %v7757_v24  ;;  %5652 = vmatprep.subr.bf16.mxu1 %v7760_v48  ;;  %v7829_v24 = vld [vmem:[#allocation8 + $0x360] ss:$28 sps:$4 sm:$0xff]   ;;  %v7826_v48 = vld [vmem:[#allocation8 + $0x198] ss:$28 sps:$4 sm:$0xff]  }
 0x635   :  { %5571 = vmatpush1.bf16.msra.mxu0 %v7755_v49  ;;  %5653 = vmatpush1.bf16.msra.mxu1 %v7758_v50  ;;  %v7830_v49 = vld [vmem:[#allocation8 + $0x1a0] ss:$28 sps:$4 sm:$0xff]   ;;  %v7833_v50 = vld [vmem:[#allocation8 + $0x1d4] ss:$28 sps:$4 sm:$0xff]  }
 0x636   :  { %5572 = vmatprep.subr.bf16.mxu0 %v7763_v35  ;;  %5654 = vmatprep.subr.bf16.mxu1 %v7766_v52  ;;  %v7834_v35 = vld [vmem:[#allocation8 + $0x558] ss:$28 sps:$4 sm:$0xff]   ;;  %v7831_v52 = vld [vmem:[#allocation8 + $0x1d0] ss:$28 sps:$4 sm:$0xff]  }
 0x639   :  { %5573 = vmatpush1.bf16.msra.mxu0 %v7761_v53  ;;  %5655 = vmatpush1.bf16.msra.mxu1 %v7764_v54  ;;  %v7835_v53 = vld [vmem:[#allocation8 + $0x398] ss:$28 sps:$4 sm:$0xff]   ;;  %v7838_v54 = vld [vmem:[#allocation8 + $0x20c] ss:$28 sps:$4 sm:$0xff]  }
 0x63a   :  { %5574 = vmatprep.subr.bf16.mxu0 %v7769_v55  ;;  %5656 = vmatprep.subr.bf16.mxu1 %v7772_v39  ;;  %v7839_v55 = vld [vmem:[#allocation8 + $0x590] ss:$28 sps:$4 sm:$0xff]   ;;  %v7836_v39 = vld [vmem:[#allocation8 + $0x208] ss:$28 sps:$4 sm:$0xff]  }
 0x63d   :  { %5575 = vmatpush1.bf16.msra.mxu0 %v7767_v56  ;;  %5657 = vmatpush1.bf16.msra.mxu1 %v7770_v57  ;;  %v7840_v56 = vld [vmem:[#allocation8 + $0x3d0] ss:$28 sps:$4 sm:$0xff]   ;;  %v7843_v57 = vld [vmem:[#allocation8 + $0x244] ss:$28 sps:$4 sm:$0xff]  }
 0x63e   :  { %5576 = vmatprep.subr.bf16.mxu0 %v7775_v58  ;;  %5658 = vmatprep.subr.bf16.mxu1 %v7778_v59  ;;  %v7844_v58 = vld [vmem:[#allocation8 + $0x5c8] ss:$28 sps:$4 sm:$0xff]   ;;  %v7841_v59 = vld [vmem:[#allocation8 + $0x240] ss:$28 sps:$4 sm:$0xff]  }
 0x641   :  { %5577 = vmatpush1.bf16.msra.mxu0 %v7773_v1  ;;  %5659 = vmatpush1.bf16.msra.mxu1 %v7776_v2  ;;  %v7845_v1 = vld [vmem:[#allocation8 + $0x408] ss:$28 sps:$4 sm:$0xff]   ;;  %v7848_v2 = vld [vmem:[#allocation8 + $0x27c] ss:$28 sps:$4 sm:$0xff]  }
 0x642   :  { %5578 = vmatprep.subr.bf16.mxu0 %v7781_v5  ;;  %5660 = vmatprep.subr.bf16.mxu1 %v7784_v8  ;;  %v7846_v5 = vld [vmem:[#allocation8 + $0x278] ss:$28 sps:$4 sm:$0xff]   ;;  %v7850_v8 = vld [vmem:[#allocation8 + $0x440] ss:$28 sps:$4 sm:$0xff]  }
 0x645   :  { %5579 = vmatpush1.bf16.msra.mxu0 %v7779_v9  ;;  %5661 = vmatpush1.bf16.msra.mxu1 %v7782_v11  ;;  %v7853_v9 = vld [vmem:[#allocation8 + $0x2b4] ss:$28 sps:$4 sm:$0xff]  }
 0x646   :  { %5580 = vmatprep.subr.bf16.mxu0 %v7787_v13  ;;  %5662 = vmatprep.subr.bf16.mxu1 %v7790_v15  ;;  %v7854_v11 = vld [vmem:[#allocation8 + $0x638] ss:$28 sps:$4 sm:$0xff]   ;;  %v7858_v15 = vld [vmem:[#allocation8 + $0x2ec] ss:$28 sps:$4 sm:$0xff]  }
 0x647   :  { %v7855_v13 = vld [vmem:[#allocation8 + $0x478] ss:$28 sps:$4 sm:$0xff]  }
 0x649   :  { %5581 = vmatpush1.bf16.msra.mxu0 %v7785_v17  ;;  %5663 = vmatpush1.bf16.msra.mxu1 %v7788_v18  ;;  %v7859_v17 = vld [vmem:[#allocation8 + $0x670] ss:$28 sps:$4 sm:$0xff]   ;;  %v7856_v18 = vld [vmem:[#allocation8 + $0x2e8] ss:$28 sps:$4 sm:$0xff]  }
 0x64a   :  { %5673 = vmatprep.subr.bf16.mxu0 %v7793_v47  ;;  %6688 = vmatprep.subr.bf16.mxu1 %v7794_v20  ;;  %v7863_v47 = vld [vmem:[#allocation8 + $0x324] ss:$28 sps:$4 sm:$0xff]  }
 0x64b   :  { %v7864_v20 = vld [vmem:[#allocation8 + $0x6a8] ss:$28 sps:$4 sm:$0xff]  }
 0x64c   :  { %5583 = vmatmul.mubr.bf16.vlgmr.msra.gmra.mrb[16].mxu0 %v8574_v14  ;;  %5665 = vmatmul.mubr.bf16.vlgmr.msra.gmra.mrb[20].mxu1 %v8574_v14 }
 0x64d   :  { %5674 = vmatpush1.bf16.msra.mxu0 %v7791_v21  ;;  %5705 = vmatprep.mubr.bf16.mxu0 %v8559_v3  ;;  %v7861_v21 = vld [vmem:[#allocation8 + $0x320] ss:$28 sps:$4 sm:$0xff]  }
 0x64e   :  { %6689 = vmatpush3.bf16.msra.mxu1 %v7795_v51  ;;  %5787 = vmatprep.mubr.bf16.mxu1 %v8559_v3  ;;  %v7814_v3 = vld [vmem:[#allocation8 + $0x2b8] ss:$28 sps:$4 sm:$0xff]   ;;  %v7865_v51 = vld [vmem:[#allocation8 + $0x4e8] ss:$28 sps:$4 sm:$0xff]  }
 0x64f   :  { %5675 = vmatprep.subr.bf16.mxu0 %v7798_v16  ;;  %6690 = vmatprep.subr.bf16.mxu1 %v7799_v22  ;;  %v7868_v16 = vld [vmem:[#allocation8 + $0x35c] ss:$28 sps:$4 sm:$0xff]  }
 0x650   :  { %v7869_v22 = vld [vmem:[#allocation8 + $0x6e0] ss:$28 sps:$4 sm:$0xff]  }
 0x651   :  { %5676 = vmatpush1.bf16.msra.mxu0 %v7796_v23  ;;  %v7866_v23 = vld [vmem:[#allocation8 + $0x358] ss:$28 sps:$4 sm:$0xff]  }
 0x652   :  { %6691 = vmatpush3.bf16.msra.mxu1 %v7800_v25  ;;  %5677 = vmatprep.subr.bf16.mxu0 %v7803_v62  ;;  %v7870_v25 = vld [vmem:[#allocation8 + $0x520] ss:$28 sps:$4 sm:$0xff]   ;;  %v7873_v62 = vld [vmem:[#allocation8 + $0x394] ss:$28 sps:$4 sm:$0xff]  }
 0x653   :  { %6692 = vmatprep.subr.bf16.mxu1 %v7804_v26  ;;  %v7871_v26 = vld [vmem:[#allocation8 + $0x390] ss:$28 sps:$4 sm:$0xff]  }
 0x655   :  { %5678 = vmatpush1.bf16.msra.mxu0 %v7801_v27  ;;  %v7876_v27 = vld [vmem:[#allocation8 + $0x3cc] ss:$28 sps:$4 sm:$0xff]  }
 0x656   :  { %6693 = vmatpush3.bf16.msra.mxu1 %v7805_v28  ;;  %5679 = vmatprep.subr.bf16.mxu0 %v7808_v29  ;;  %v7874_v28 = vld [vmem:[#allocation8 + $0x3c8] ss:$28 sps:$4 sm:$0xff]  }
 0x657   :  { %6694 = vmatprep.subr.bf16.mxu1 %v7809_v30  ;;  %v7879_v29 = vld [vmem:[#allocation8 + $0x404] ss:$28 sps:$4 sm:$0xff]  }
 0x658   :  { %v7877_v30 = vld [vmem:[#allocation8 + $0x400] ss:$28 sps:$4 sm:$0xff]  }
 0x659   :  { %5680 = vmatpush1.bf16.msra.mxu0 %v7806_v31  ;;  %v7882_v31 = vld [vmem:[#allocation8 + $0x43c] ss:$28 sps:$4 sm:$0xff]  }
 0x65a   :  { %6695 = vmatpush3.bf16.msra.mxu1 %v7810_v32  ;;  %5681 = vmatprep.subr.bf16.mxu0 %v7813_v33  ;;  %v7880_v32 = vld [vmem:[#allocation8 + $0x438] ss:$28 sps:$4 sm:$0xff]  }
 0x65b   :  { %6696 = vmatprep.subr.bf16.mxu1 %v7814_v3  ;;  %v7885_v33 = vld [vmem:[#allocation8 + $0x474] ss:$28 sps:$4 sm:$0xff]  }
 0x65c   :  { %v7883_v3 = vld [vmem:[#allocation8 + $0x470] ss:$28 sps:$4 sm:$0xff]  }
 0x65d   :  { %5682 = vmatpush1.bf16.msra.mxu0 %v7811_v36  ;;  %v7886_v36 = vld [vmem:[#allocation8 + $0x4a8] ss:$28 sps:$4 sm:$0xff]  }
 0x65e   :  { %6697 = vmatpush3.bf16.msra.mxu1 %v7815_v34  ;;  %5683 = vmatprep.subr.bf16.mxu0 %v7818_v37  ;;  %v7891_v34 = vld [vmem:[#allocation8 + $0x4e4] ss:$28 sps:$4 sm:$0xff]   ;;  %v7894_v37 = vld [vmem:[#allocation8 + $0x51c] ss:$28 sps:$4 sm:$0xff]  }
 0x65f   :  { %6698 = vmatprep.subr.bf16.mxu1 %v7819_v38  ;;  %v7892_v38 = vld [vmem:[#allocation8 + $0x518] ss:$28 sps:$4 sm:$0xff]  }
 0x661   :  { %5684 = vmatpush1.bf16.msra.mxu0 %v7816_v40  ;;  %v7897_v40 = vld [vmem:[#allocation8 + $0x554] ss:$28 sps:$4 sm:$0xff]  }
 0x662   :  { %6699 = vmatpush3.bf16.msra.mxu1 %v7820_v41  ;;  %5685 = vmatprep.subr.bf16.mxu0 %v7823_v42  ;;  %v7895_v41 = vld [vmem:[#allocation8 + $0x550] ss:$28 sps:$4 sm:$0xff]  }
 0x663   :  { %6700 = vmatprep.subr.bf16.mxu1 %v7824_v43  ;;  %v7900_v42 = vld [vmem:[#allocation8 + $0x58c] ss:$28 sps:$4 sm:$0xff]  }
 0x664   :  { %v7898_v43 = vld [vmem:[#allocation8 + $0x588] ss:$28 sps:$4 sm:$0xff]  }
 0x665   :  { %5686 = vmatpush1.bf16.msra.mxu0 %v7821_v44  ;;  %v7903_v44 = vld [vmem:[#allocation8 + $0x5c4] ss:$28 sps:$4 sm:$0xff]  }
 0x666   :  { %6701 = vmatpush3.bf16.msra.mxu1 %v7825_v45  ;;  %5687 = vmatprep.subr.bf16.mxu0 %v7828_v46  ;;  %v7901_v45 = vld [vmem:[#allocation8 + $0x5c0] ss:$28 sps:$4 sm:$0xff]  }
 0x667   :  { %6702 = vmatprep.subr.bf16.mxu1 %v7829_v24  ;;  %v7906_v46 = vld [vmem:[#allocation8 + $0x5fc] ss:$28 sps:$4 sm:$0xff]  }
 0x668   :  { %v7904_v24 = vld [vmem:[#allocation8 + $0x5f8] ss:$28 sps:$4 sm:$0xff]  }
 0x669   :  { %5688 = vmatpush1.bf16.msra.mxu0 %v7826_v48  ;;  %v7909_v48 = vld [vmem:[#allocation8 + $0x634] ss:$28 sps:$4 sm:$0xff]  }
 0x66a   :  { %6703 = vmatpush3.bf16.msra.mxu1 %v7830_v49  ;;  %5689 = vmatprep.subr.bf16.mxu0 %v7833_v50  ;;  %v7907_v49 = vld [vmem:[#allocation8 + $0x630] ss:$28 sps:$4 sm:$0xff]  }
 0x66b   :  { %6710 = vmatprep.subr.bf16.mxu1 %v7834_v35  ;;  %v7912_v50 = vld [vmem:[#allocation8 + $0x66c] ss:$28 sps:$4 sm:$0xff]  }
 0x66c   :  { %v7910_v35 = vld [vmem:[#allocation8 + $0x668] ss:$28 sps:$4 sm:$0xff]  }
 0x66d   :  { %5788 = vmatmul.mubr.bf16.vlgmr.msra.gmra.mrb[24].mxu1 %v8561_v6  ;;  %5690 = vmatpush1.bf16.msra.mxu0 %v7831_v52  ;;  %v7915_v52 = vld [vmem:[#allocation8 + $0x6a4] ss:$28 sps:$4 sm:$0xff]  }
 0x66e   :  { %6711 = vmatpush3.bf16.msra.mxu1 %v7835_v53  ;;  %5827 = vmatprep.mubr.bf16.mxu1 %v8565_v10  ;;  %v7913_v53 = vld [vmem:[#allocation8 + $0x6a0] ss:$28 sps:$4 sm:$0xff]  }
 0x66f   :  { %5691 = vmatprep.subr.bf16.mxu0 %v7838_v54  ;;  %6712 = vmatprep.subr.bf16.mxu1 %v7839_v55  ;;  %v7918_v54 = vld [vmem:[#allocation8 + $0x6dc] ss:$28 sps:$4 sm:$0xff]  }
 0x670   :  { %v7916_v55 = vld [vmem:[#allocation8 + $0x6d8] ss:$28 sps:$4 sm:$0xff]  }
 0x671   :  { %5692 = vmatpush1.bf16.msra.mxu0 %v7836_v39  ;;  %v8589_v39 = vld [vmem:[%s8630_s13] sm:$0xff]  ;;  %s8078_s13 = smov [#allocation10]  }
 0x672   :  { %6713 = vmatpush3.bf16.msra.mxu1 %v7840_v56  ;;  %5693 = vmatprep.subr.bf16.mxu0 %v7843_v57  ;;  %v4325_v56 = vrot.slane %v8589_v39, %v8281_v61  ;;  %v4333_v57 = vrot.slane %v8589_v39, %v8298_v7  ;;  %s5890_s29 = sshll.u32 %s8078_s13, 4  ;;  %s5891_s29 = int_to_ptr.vmem [resolvable:$true] %s5890_s29 }
 0x673   :  { %6714 = vmatprep.subr.bf16.mxu1 %v7844_v58  ;;  %v4329_v58 = vrot.slane %v8589_v39, %v8289_v63  ;;  %s8037_s18 = scalar_lea.vmem %s5891_s29, 896  ;;  %p8042_p5 = scmp.lt.s32.totalorder %s5891_s29, %s5891_s29 }
 0x674   :  { %p8038_p4 = scmp.ne.s32.totalorder %s5891_s29, %s8037_s18  ;;  %p8043_p6 = scmp.lt.s32.totalorder %s8037_s18, %s8037_s18 }
 0x675   :  { %5694 = vmatpush1.bf16.msra.mxu0 %v7841_v59  ;;  %v4337_v59 = vrot.slane %v8589_v39, %v8301_v0 }
 0x676   :  { %6715 = vmatpush3.bf16.msra.mxu1 %v7845_v1  ;;  %5695 = vmatprep.subr.bf16.mxu0 %v7848_v2  ;;  %p8044_p7 = por %p8043_p6, %p8042_p5 }
 0x677   :  { %6716 = vmatprep.subr.bf16.mxu1 %v7849_v4 }
 0x678   :  { %p8045_p8 = pnand %p8044_p7, %p8038_p4 }
 0x679   :  { %5696 = vmatpush1.bf16.msra.mxu0 %v7846_v5 }
 0x67a   :  { %6717 = vmatpush3.bf16.msra.mxu1 %v7850_v8  ;;  %5697 = vmatprep.subr.bf16.mxu0 %v7853_v9 }
 0x67b   :  { %6718 = vmatprep.subr.bf16.mxu1 %v7854_v11 }
 0x67d   :  { %5698 = vmatpush1.bf16.msra.mxu0 %v7851_v12 }
 0x67e   :  { %6719 = vmatpush3.bf16.msra.mxu1 %v7855_v13  ;;  %5699 = vmatprep.subr.bf16.mxu0 %v7858_v15 }
 0x67f   :  { %6720 = vmatprep.subr.bf16.mxu1 %v7859_v17 }
 0x681   :  { %5700 = vmatpush1.bf16.msra.mxu0 %v7856_v18 }
 0x682   :  { %6721 = vmatpush3.bf16.msra.mxu1 %v7860_v19  ;;  %5701 = vmatprep.subr.bf16.mxu0 %v7863_v47 }
 0x683   :  { %6722 = vmatprep.subr.bf16.mxu1 %v7864_v20 }
 0x685   :  { %5702 = vmatpush1.bf16.msra.mxu0 %v7861_v21 }
 0x686   :  { %6723 = vmatpush3.bf16.msra.mxu1 %v7865_v51  ;;  %5703 = vmatprep.subr.bf16.mxu0 %v7868_v16 }
 0x687   :  { %6724 = vmatprep.subr.bf16.mxu1 %v7869_v22 }
 0x689   :  { %5704 = vmatpush1.bf16.msra.mxu0 %v7866_v23 }
 0x68a   :  { %6725 = vmatpush3.bf16.msra.mxu1 %v7870_v25  ;;  %5714 = vmatprep.subr.bf16.mxu0 %v7873_v62 }
 0x68c   :  { %5706 = vmatmul.mubr.bf16.vlgmr.msra.gmra.mrb[20].mxu0 %v8561_v6  ;;  %v7888_v6 = vld [vmem:[#allocation8 + $0x4ac] ss:$28 sps:$4 sm:$0xff]  }
 0x68d   :  { %5828 = vmatmul.mubr.bf16.vlgmr.msra.gmra.mrb[28].mxu1 %v8574_v14  ;;  %5715 = vmatpush1.bf16.msra.mxu0 %v7871_v26 }
 0x68e   :  { %5746 = vmatprep.mubr.bf16.mxu0 %v8565_v10  ;;  %5716 = vmatprep.subr.bf16.mxu0 %v7876_v27  ;;  %v7889_v10 = vld [vmem:[#allocation8 + $0x4e0] ss:$28 sps:$4 sm:$0xff]  }
 0x691   :  { %5717 = vmatpush1.bf16.msra.mxu0 %v7874_v28 }
 0x692   :  { %5718 = vmatprep.subr.bf16.mxu0 %v7879_v29 }
 0x695   :  { %5719 = vmatpush1.bf16.msra.mxu0 %v7877_v30 }
 0x696   :  { %5720 = vmatprep.subr.bf16.mxu0 %v7882_v31 }
 0x699   :  { %5721 = vmatpush1.bf16.msra.mxu0 %v7880_v32  ;;  %v4348_v32 = vsub.s32 6, %v8278_v60 }
 0x69a   :  { %5722 = vmatprep.subr.bf16.mxu0 %v7885_v33 }
 0x69b   :  { %v4349_v33 = vrot.slane %v8589_v39, %v4348_v32 }
 0x69d   :  { %5723 = vmatpush1.bf16.msra.mxu0 %v7883_v3 }
 0x69e   :  { %5724 = vmatprep.subr.bf16.mxu0 %v7888_v6 }
 0x6a1   :  { %5725 = vmatpush1.bf16.msra.mxu0 %v7886_v36 }
 0x6a2   :  { %5726 = vmatprep.subr.bf16.mxu0 %v7891_v34 }
 0x6a5   :  { %5727 = vmatpush1.bf16.msra.mxu0 %v7889_v10 }
 0x6a6   :  { %5728 = vmatprep.subr.bf16.mxu0 %v7894_v37 }
 0x6a9   :  { %5729 = vmatpush1.bf16.msra.mxu0 %v7892_v38 }
 0x6aa   :  { %5730 = vmatprep.subr.bf16.mxu0 %v7897_v40 }
 0x6ad   :  { %5731 = vmatpush1.bf16.msra.mxu0 %v7895_v41 }
 0x6ae   :  { %5732 = vmatprep.subr.bf16.mxu0 %v7900_v42 }
 0x6b1   :  { %5733 = vmatpush1.bf16.msra.mxu0 %v7898_v43 }
 0x6b2   :  { %5734 = vmatprep.subr.bf16.mxu0 %v7903_v44  ;;  %v4340_v44 = vsub.s32 4, %v8278_v60 }
 0x6b5   :  { %5735 = vmatpush1.bf16.msra.mxu0 %v7901_v45  ;;  %v4344_v45 = vsub.s32 5, %v8278_v60 }
 0x6b6   :  { %5736 = vmatprep.subr.bf16.mxu0 %v7906_v46  ;;  %v4341_v46 = vrot.slane %v8589_v39, %v4340_v44 }
 0x6b9   :  { %5737 = vmatpush1.bf16.msra.mxu0 %v7904_v24  ;;  %v4345_v24 = vrot.slane %v8589_v39, %v4344_v45 }
 0x6ba   :  { %5738 = vmatprep.subr.bf16.mxu0 %v7909_v48 }
 0x6bd   :  { %5739 = vmatpush1.bf16.msra.mxu0 %v7907_v49 }
 0x6be   :  { %5740 = vmatprep.subr.bf16.mxu0 %v7912_v50 }
 0x6c1   :  { %5741 = vmatpush1.bf16.msra.mxu0 %v7910_v35 }
 0x6c2   :  { %5742 = vmatprep.subr.bf16.mxu0 %v7915_v52 }
 0x6c5   :  { %5743 = vmatpush1.bf16.msra.mxu0 %v7913_v53 }
 0x6c6   :  { %5744 = vmatprep.subr.bf16.mxu0 %v7918_v54 }
 0x6c9   :  { %5745 = vmatpush1.bf16.msra.mxu0 %v7916_v55 }
 0x6cc   :  { %5747 = vmatmul.mubr.bf16.vlgmr.msra.gmra.mrb[20].mxu0 %v8574_v14 }
 0x71f   :  { %v5584_v1 = vpop.f32.mrb[16].mxu0  ;;  %v5666_v2 = vpop.f32.mrb[20].mxu1 }
 0x720   :  { %v6810_v14 = vadd.f32 %v5584_v1, %v4325_v56  ;;  %v6812_v4 = vadd.f32 %v5666_v2, %v4333_v57  ;;  %v5586_v5 = vpop.f32.mrb[17].mxu0  ;;  %v5668_v8 = vpop.f32.mrb[21].mxu1 }
 0x721   :  { %v6811_v9 = vadd.f32 %v5586_v5, %v4329_v58  ;;  %v6813_v11 = vadd.f32 %v5668_v8, %v4337_v59  ;;  %v5588_v12 = vpop.f32.mrb[18].mxu0  ;;  %v5670_v13 = vpop.f32.mrb[22].mxu1 }
 0x722   :  { %v6611_v61 = vmul.f32 -1.442695, %v6810_v14  ;;  %v6613_v15 = vmul.f32 -1.442695, %v6812_v4  ;;  %v5589_v17 = vpop.f32.mrb[19].mxu0  ;;  %v5671_v7 = vpop.f32.mrb[23].mxu1 }
 0x723   :  { %v6612_v18 = vmul.f32 -1.442695, %v6811_v9  ;;  %v6614_v19 = vmul.f32 -1.442695, %v6813_v11 }
 0x724   :  { %7921 = vpow2.f32 %v6611_v61 }
 0x725   :  { %7923 = vpow2.f32 %v6613_v15 }
 0x726   :  { %7925 = vpow2.f32 %v6612_v18 }
 0x727   :  { %7927 = vpow2.f32 %v6614_v19 }
 0x72e   :  { %v7922_v63 = vpop.eup %7921 }
 0x72f   :  { %v7924_v0 = vpop.eup %7923  ;;  %v5856_v47 = vadd.f32 1.0, %v7922_v63 }
 0x730   :  { %v7926_v20 = vpop.eup %7925  ;;  %v5858_v21 = vadd.f32 1.0, %v7924_v0 }
 0x731   :  { %v7928_v51 = vpop.eup %7927  ;;  %7929 = vrcp.f32 %v5856_v47  ;;  %v5857_v16 = vadd.f32 1.0, %v7926_v20 }
 0x732   :  { %7931 = vrcp.f32 %v5858_v21  ;;  %v5859_v22 = vadd.f32 1.0, %v7928_v51 }
 0x733   :  { %7933 = vrcp.f32 %v5857_v16 }
 0x734   :  { %7935 = vrcp.f32 %v5859_v22 }
 0x73b   :  { %v7930_v23 = vpop.eup %7929 }
 0x73c   :  { %v7932_v25 = vpop.eup %7931  ;;  %5877 = vst [vmem:[#allocation10] sm:$0xff] %v7930_v23 }
 0x73d   :  { %v7934_v62 = vpop.eup %7933  ;;  %5879 = vst [vmem:[#allocation10 + $0x10] sm:$0xff] %v7932_v25 }
 0x73e   :  { %v7936_v26 = vpop.eup %7935  ;;  %5878 = vst [vmem:[#allocation10 + $0x8] sm:$0xff] %v7934_v62 }
 0x73f   :  { %5880 = vst [vmem:[#allocation10 + $0x18] sm:$0xff] %v7936_v26 }
 0x740   :  { %v6704_v27 = vpop.f32.mrb[24].mxu1 }
 0x741   :  { %v6705_v28 = vpop.f32.mrb[25].mxu1 }
 0x742   :  { %v6706_v29 = vadd.f32 %v6705_v28, %v6704_v27  ;;  %v6707_v30 = vpop.f32.mrb[26].mxu1 }
 0x743   :  { %v6708_v31 = vpop.f32.mrb[27].mxu1 }
 0x744   :  { %v5790_v36 = vadd.f32 %v6706_v29, %v4349_v33 }
 0x760   :  { %v6726_v3 = vpop.f32.mrb[28].mxu1 }
 0x761   :  { %v6727_v6 = vpop.f32.mrb[29].mxu1 }
 0x762   :  { %v6728_v34 = vadd.f32 %v6727_v6, %v6726_v3  ;;  %v6729_v10 = vpop.f32.mrb[30].mxu1 }
 0x763   :  { %v6730_v37 = vpop.f32.mrb[31].mxu1 }
 0x764   :  { %v5830_v38 = vadd.f32 %v6728_v34, %v5790_v36 }
 0x766   :  { %v6617_v40 = vmul.f32 -1.442695, %v5830_v38 }
 0x768   :  { %7937 = vpow2.f32 %v6617_v40 }
 0x772   :  { %v7938_v41 = vpop.eup %7937 }
 0x773   :  { %v5862_v42 = vadd.f32 1.0, %v7938_v41 }
 0x775   :  { %7939 = vrcp.f32 %v5862_v42 }
 0x77f   :  { %v7940_v43 = vpop.eup %7939 }
 0x780   :  { %5883 = vst [vmem:[#allocation10 + $0x30] sm:$0xff] %v7940_v43 }
 0x79f   :  { %v5748_v48 = vpop.f32.mrb[20].mxu0 }
 0x7a0   :  { %v6814_v49 = vadd.f32 %v5748_v48, %v4341_v46  ;;  %v5750_v50 = vpop.f32.mrb[21].mxu0 }
 0x7a1   :  { %v6815_v35 = vadd.f32 %v5750_v50, %v4345_v24  ;;  %v5752_v52 = vpop.f32.mrb[22].mxu0 }
 0x7a2   :  { %v6615_v53 = vmul.f32 -1.442695, %v6814_v49  ;;  %v5753_v54 = vpop.f32.mrb[23].mxu0 }
 0x7a3   :  { %v6616_v55 = vmul.f32 -1.442695, %v6815_v35 }
 0x7a4   :  { %7941 = vpow2.f32 %v6615_v53 }
 0x7a5   :  { %7943 = vpow2.f32 %v6616_v55 }
 0x7ae   :  { %v7942_v56 = vpop.eup %7941 }
 0x7af   :  { %v7944_v57 = vpop.eup %7943  ;;  %v5860_v58 = vadd.f32 1.0, %v7942_v56 }
 0x7b0   :  { %v5861_v59 = vadd.f32 1.0, %v7944_v57 }
 0x7b1   :  { %7945 = vrcp.f32 %v5860_v58 }
 0x7b2   :  { %7947 = vrcp.f32 %v5861_v59 }
 0x7bb   :  { %v7946_v60 = vpop.eup %7945 }
 0x7bc   :  { %v7948_v39 = vpop.eup %7947  ;;  %5881 = vst [vmem:[#allocation10 + $0x20] sm:$0xff] %v7946_v60 }
 0x7bd   :  { %5882 = vst [vmem:[#allocation10 + $0x28] sm:$0xff] %v7948_v39 }
 0x7be   :  { %8048 = shalt.err (!%p8045_p8)
}
 0x7bf   :  { %s8049_s24 = scalar_lea.hbm %s8631_s14, 896 }
 0x7c0   :  { %p8050_p9 = scmp.ne.s32.totalorder %s8631_s14, %s8049_s24  ;;  %p8053_p10 = scmp.lt.u32.totalorder %s8049_s24, %s8631_s14 }
 0x7c2   :  { %p8055_p11 = pnand %p8053_p10, %p8050_p9 }
 0x7c4   :  { %8058 = shalt.err (!%p8055_p11)
}
 0x7c5   :  { %5893 = dma.vmem_to_hbm [thread:$0]  %s5891_s29, 896, %s8631_s14, [#allocation4]  }
 0x7c6   :  { %8065 = dma.done.wait [#allocation4], 896  }
 0x7c7   :  { %8066 = vsyncadd [#allocation4], 4294966400 }
 0x7c8   :  { %5901 = vsyncpa [#allocation3], 1 }
 0x7c9   :  { %5902 = vsyncpa [#allocation6], 1 }
 0x7ca   :  { %5903 = vsyncpa [#allocation9], 1 }
 0x7cb   :  { %5904 = vsyncpa [#allocation4], 1 }

</bundles_post_ra>
